<compile_context>
chip_gen: v5e
topology: v5e:2x2
jax: 0.10.0
libtpu: 0.0.40
codegen_flags: <defaults>
</compile_context>

<pallas_src>
import functools
import math

import jax
import jax.numpy as jnp
from jax import lax
from jax.experimental import pallas as pl
from jax.experimental.pallas import tpu as pltpu


# ---------------------------------------------------------------------------
# In-kernel helpers (f32 math)
# ---------------------------------------------------------------------------
def _layernorm(x, gamma, beta, eps=1e-5):
    # PyTorch nn.LayerNorm over last dim, biased variance, eps=1e-5
    mean = jnp.mean(x, axis=-1, keepdims=True)
    var = jnp.mean(jnp.square(x - mean), axis=-1, keepdims=True)
    return (x - mean) * lax.rsqrt(var + eps) * gamma + beta


# ---------------------------------------------------------------------------
# Fused per-layer kernel: PreNorm(Attention)+residual then PreNorm(FF)+residual
# One batch element per grid step; x stays resident in VMEM between sub-blocks.
# ---------------------------------------------------------------------------
def layer_kernel(x_ref, ln1g_ref, ln1b_ref, wqkv_ref, wout_ref, bout_ref,
                 ln2g_ref, ln2b_ref, w1_ref, b1_ref, w2_ref, b2_ref, o_ref,
                 *, heads, dim_head):
    x = x_ref[0]                                             # (N, D) f32
    N, D = x.shape
    inner = heads * dim_head

    # ---------------- PreNorm + Attention ----------------
    xn = _layernorm(x, ln1g_ref[0], ln1b_ref[0]).astype(jnp.bfloat16)      # (N, D) bf16

    # Fused, lane-dense QKV projection: one (N, D) @ (D, 3*inner) MXU matmul.
    # 1/sqrt(dim_head) is already folded into the q columns of wqkv (init time).
    qkv = jnp.dot(xn, wqkv_ref[...], preferred_element_type=jnp.float32)   # (N, 3*inner) f32
    qkv = qkv.astype(jnp.bfloat16)                                         # keep activations bf16

    def heads_view(col0):
        # (N, inner) lane range -> (heads, N, dim_head) via static lane slices + stack
        # (no 3-D transpose inside the kernel).
        return jnp.stack(
            [qkv[:, col0 + h * dim_head: col0 + (h + 1) * dim_head] for h in range(heads)],
            axis=0)

    q = heads_view(0 * inner)                                              # (h, N, dh) bf16
    k = heads_view(1 * inner)
    v = heads_view(2 * inner)

    # per-head scores / softmax (f32 math); scale already folded into q.
    dots = jnp.einsum('hnd,hmd->hnm', q, k, preferred_element_type=jnp.float32)   # (h, N, N)
    dots = dots - jnp.max(dots, axis=-1, keepdims=True)
    e = jnp.exp(dots)
    # approx reciprocal (EUP slot); rows sum to 1 within ~1e-3 -- fine for inference.
    attn = (e * pl.reciprocal(jnp.sum(e, axis=-1, keepdims=True), approx=True)
            ).astype(jnp.bfloat16)

    ctx = jnp.einsum('hnm,hmd->hnd', attn, v, preferred_element_type=jnp.float32)  # (h, N, dh)
    ctx = ctx.astype(jnp.bfloat16)

    # Fused output projection: single full-depth (N, inner) @ (inner, D) matmul.
    ctx_flat = jnp.concatenate([ctx[h] for h in range(heads)], axis=1)             # (N, inner)
    attn_out = jnp.dot(ctx_flat, wout_ref[...], preferred_element_type=jnp.float32)
    x = x + attn_out + bout_ref[0]                                                  # residual

    # ---------------- PreNorm + FeedForward ----------------
    xn2 = _layernorm(x, ln2g_ref[0], ln2b_ref[0]).astype(jnp.bfloat16)
    h1 = jnp.dot(xn2, w1_ref[...], preferred_element_type=jnp.float32) + b1_ref[0]
    # exact GELU (PyTorch nn.GELU default): 0.5 * x * (1 + erf(x / sqrt(2)))
    # (tanh-approx GELU would offload to the EUP on v5e if the numerics budget allows)
    h1 = 0.5 * h1 * (1.0 + lax.erf(h1 * (1.0 / math.sqrt(2.0))))
    y = jnp.dot(h1.astype(jnp.bfloat16), w2_ref[...],
                preferred_element_type=jnp.float32) + b2_ref[0]

    o_ref[0] = (x + y).astype(o_ref.dtype)                                          # residual


# ---------------------------------------------------------------------------
# BlockSpec helpers
# ---------------------------------------------------------------------------
def _param_spec(shape, single_buffer):
    # Constant-index parameter block; single-buffered when supported (saves VMEM,
    # double-buffering gains nothing for a constant index map).
    index_map = lambda b: (0,) * len(shape)
    if single_buffer:
        return pl.BlockSpec(shape, index_map, pipeline_mode=pl.Buffered(1))
    return pl.BlockSpec(shape, index_map)


# ---------------------------------------------------------------------------
# Wrapper: one fused pallas_call per transformer layer
# ---------------------------------------------------------------------------
def transformer_layer(x, p, *, heads, dim_head, single_buffer_params=True):
    B, N, D = x.shape
    inner = heads * dim_head
    H = p["w1"].shape[1]

    kernel = functools.partial(layer_kernel, heads=heads, dim_head=dim_head)
    ps = functools.partial(_param_spec, single_buffer=single_buffer_params)

    return pl.pallas_call(
        kernel,
        out_shape=jax.ShapeDtypeStruct((B, N, D), x.dtype),
        grid=(B,),
        in_specs=[
            pl.BlockSpec((1, N, D), lambda b: (b, 0, 0)),   # x (double-buffered activation)
            ps((1, D)),              # ln1 gamma
            ps((1, D)),              # ln1 beta
            ps((D, 3 * inner)),      # fused Wqkv (bf16, q-scale folded in)
            ps((inner, D)),          # Wout (bf16)
            ps((1, D)),              # bout
            ps((1, D)),              # ln2 gamma
            ps((1, D)),              # ln2 beta
            ps((D, H)),              # W1 (bf16)
            ps((1, H)),              # b1
            ps((H, D)),              # W2 (bf16)
            ps((1, D)),              # b2
        ],
        out_specs=pl.BlockSpec((1, N, D), lambda b: (b, 0, 0)),
        input_output_aliases={0: 0},
        compiler_params=pltpu.CompilerParams(
            dimension_semantics=("parallel",),
            vmem_limit_bytes=40 * 1024 * 1024,   # re-derived for v7x (64 MiB physical VMEM)
        ),
    )(x, p["ln1_g"], p["ln1_b"], p["wqkv"], p["wout"], p["bout"],
      p["ln2_g"], p["ln2_b"], p["w1"], p["b1"], p["w2"], p["b2"])


# ---------------------------------------------------------------------------
# Parameter init (f32 masters) + ONE-TIME kernel-layout prep (bf16, scale folding)
# ---------------------------------------------------------------------------
def init_transformer_params(key, dim, depth, heads, dim_head, mlp_dim):
    inner = heads * dim_head
    layers = []
    for _ in range(depth):
        key, *ks = jax.random.split(key, 5)
        layers.append(dict(
            ln1_g=jnp.ones((1, dim), jnp.float32),
            ln1_b=jnp.zeros((1, dim), jnp.float32),
            wqkv=0.02 * jax.random.normal(ks[0], (dim, 3 * inner), jnp.float32),
            wout=0.02 * jax.random.normal(ks[1], (inner, dim), jnp.float32),
            bout=jnp.zeros((1, dim), jnp.float32),
            ln2_g=jnp.ones((1, dim), jnp.float32),
            ln2_b=jnp.zeros((1, dim), jnp.float32),
            w1=0.02 * jax.random.normal(ks[2], (dim, mlp_dim), jnp.float32),
            b1=jnp.zeros((1, mlp_dim), jnp.float32),
            w2=0.02 * jax.random.normal(ks[3], (mlp_dim, dim), jnp.float32),
            b2=jnp.zeros((1, dim), jnp.float32),
        ))
    return layers


def prepare_kernel_params(layers, *, heads, dim_head):
    """One-time (init-time) cast/relayout of weights for the kernel: bf16 matmul weights,
    1/sqrt(dim_head) folded into the q columns of the fused Wqkv.  Runs once, not per call."""
    inner = heads * dim_head
    scale = dim_head ** (-0.5)
    prepped = []
    for p in layers:
        wqkv = p["wqkv"]
        wqkv_scaled = jnp.concatenate([wqkv[:, :inner] * scale, wqkv[:, inner:]], axis=1)
        prepped.append(dict(
            ln1_g=p["ln1_g"], ln1_b=p["ln1_b"],
            wqkv=wqkv_scaled.astype(jnp.bfloat16),
            wout=p["wout"].astype(jnp.bfloat16),
            bout=p["bout"],
            ln2_g=p["ln2_g"], ln2_b=p["ln2_b"],
            w1=p["w1"].astype(jnp.bfloat16),
            b1=p["b1"],
            w2=p["w2"].astype(jnp.bfloat16),
            b2=p["b2"],
        ))
    return prepped


@functools.partial(jax.jit, static_argnames=("heads", "dim_head", "single_buffer_params"))
def transformer_forward(x, kernel_layers, *, heads, dim_head, single_buffer_params=True):
    for p in kernel_layers:
        x = transformer_layer(x, p, heads=heads, dim_head=dim_head,
                              single_buffer_params=single_buffer_params)
    return x


# ---------------------------------------------------------------------------
# Pure-JAX f32 reference (semantics check)
# ---------------------------------------------------------------------------
def _ref_forward(x, layers, *, heads, dim_head):
    def ln(t, g, b):
        m = jnp.mean(t, -1, keepdims=True)
        v = jnp.mean(jnp.square(t - m), -1, keepdims=True)
        return (t - m) / jnp.sqrt(v + 1e-5) * g + b

    inner = heads * dim_head
    for p in layers:
        xn = ln(x, p["ln1_g"][0], p["ln1_b"][0])
        qkv = xn @ p["wqkv"]
        q, k, v = jnp.split(qkv, 3, axis=-1)
        B, N, _ = x.shape
        rs = lambda t: t.reshape(B, N, heads, dim_head).transpose(0, 2, 1, 3)
        q, k, v = rs(q), rs(k), rs(v)
        dots = jnp.einsum("bhnd,bhmd->bhnm", q, k) * (dim_head ** -0.5)
        attn = jax.nn.softmax(dots, axis=-1)
        o = jnp.einsum("bhnm,bhmd->bhnd", attn, v).transpose(0, 2, 1, 3).reshape(B, N, inner)
        x = o @ p["wout"] + p["bout"][0] + x
        xn = ln(x, p["ln2_g"][0], p["ln2_b"][0])
        h = xn @ p["w1"] + p["b1"][0]
        h = 0.5 * h * (1.0 + lax.erf(h / math.sqrt(2.0)))
        x = h @ p["w2"] + p["b2"][0] + x
    return x


if __name__ == "__main__":
    # Small, module-consistent shapes: batch=2, seq=8, dim=32, heads=4, dim_head=8, mlp_dim=64, depth=2
    B, N, DIM, DEPTH, HEADS, DIM_HEAD, MLP_DIM = 2, 8, 32, 2, 4, 8, 64

    key = jax.random.PRNGKey(0)
    kx, kp = jax.random.split(key)
    x = jax.random.normal(kx, (B, N, DIM), jnp.float32)
    layers = init_transformer_params(kp, DIM, DEPTH, HEADS, DIM_HEAD, MLP_DIM)
    kparams = prepare_kernel_params(layers, heads=HEADS, dim_head=DIM_HEAD)

    try:
        out = jax.block_until_ready(
            transformer_forward(x, kparams, heads=HEADS, dim_head=DIM_HEAD,
                                single_buffer_params=True))
    except Exception:
        # Fallback if this JAX build does not accept pipeline_mode=pl.Buffered(1) on BlockSpec:
        # identical kernel, default (double) buffering for the constant parameter blocks.
        out = jax.block_until_ready(
            transformer_forward(x, kparams, heads=HEADS, dim_head=DIM_HEAD,
                                single_buffer_params=False))

    ref = _ref_forward(x, layers, heads=HEADS, dim_head=DIM_HEAD)
    assert out.shape == (B, N, DIM)
    # bf16 matmul operands + approx softmax reciprocal in the kernel vs. f32 reference
    assert jnp.allclose(out, ref, rtol=2e-2, atol=2e-2), "Pallas output mismatch vs JAX reference"

    print("KERNEL_OK")
</pallas_src>

<mosaic_0001>
module attributes {stable_mosaic.version = 11 : i64} {
  func.func @layer_kernel(%arg0: i32, %arg1: memref<1x8x32xf32, #tpu.memory_space<vmem>>, %arg2: memref<1x32xf32, #tpu.memory_space<vmem>>, %arg3: memref<1x32xf32, #tpu.memory_space<vmem>>, %arg4: memref<32x96xbf16, #tpu.memory_space<vmem>>, %arg5: memref<32x32xbf16, #tpu.memory_space<vmem>>, %arg6: memref<1x32xf32, #tpu.memory_space<vmem>>, %arg7: memref<1x32xf32, #tpu.memory_space<vmem>>, %arg8: memref<1x32xf32, #tpu.memory_space<vmem>>, %arg9: memref<32x64xbf16, #tpu.memory_space<vmem>>, %arg10: memref<1x64xf32, #tpu.memory_space<vmem>>, %arg11: memref<64x32xbf16, #tpu.memory_space<vmem>>, %arg12: memref<1x32xf32, #tpu.memory_space<vmem>>, %arg13: memref<1x8x32xf32, #tpu.memory_space<vmem>>) attributes {dimension_semantics = [#tpu.dimension_semantics<parallel>], iteration_bounds = array<i64: 2>, scalar_prefetch = 0 : i64, scratch_operands = 0 : i64, tpu.core_type = #tpu.core_type<tc>, window_params = [{transform_indices = @transform_0, window_bounds = array<i64: 1, 8, 32>}, {pipeline_mode = #tpu.pipeline_mode<synchronous>, transform_indices = @transform_1, window_bounds = array<i64: 1, 32>}, {pipeline_mode = #tpu.pipeline_mode<synchronous>, transform_indices = @transform_2, window_bounds = array<i64: 1, 32>}, {pipeline_mode = #tpu.pipeline_mode<synchronous>, transform_indices = @transform_3, window_bounds = array<i64: 32, 96>}, {pipeline_mode = #tpu.pipeline_mode<synchronous>, transform_indices = @transform_4, window_bounds = array<i64: 32, 32>}, {pipeline_mode = #tpu.pipeline_mode<synchronous>, transform_indices = @transform_5, window_bounds = array<i64: 1, 32>}, {pipeline_mode = #tpu.pipeline_mode<synchronous>, transform_indices = @transform_6, window_bounds = array<i64: 1, 32>}, {pipeline_mode = #tpu.pipeline_mode<synchronous>, transform_indices = @transform_7, window_bounds = array<i64: 1, 32>}, {pipeline_mode = #tpu.pipeline_mode<synchronous>, transform_indices = @transform_8, window_bounds = array<i64: 32, 64>}, {pipeline_mode = #tpu.pipeline_mode<synchronous>, transform_indices = @transform_9, window_bounds = array<i64: 1, 64>}, {pipeline_mode = #tpu.pipeline_mode<synchronous>, transform_indices = @transform_10, window_bounds = array<i64: 64, 32>}, {pipeline_mode = #tpu.pipeline_mode<synchronous>, transform_indices = @transform_11, window_bounds = array<i64: 1, 32>}, {transform_indices = @transform_12, window_bounds = array<i64: 1, 8, 32>}]} {
    %c0 = arith.constant 0 : index
    %c0_0 = arith.constant 0 : index
    %c0_1 = arith.constant 0 : index
    %0 = vector.load %arg1[%c0, %c0_0, %c0_1] : memref<1x8x32xf32, #tpu.memory_space<vmem>>, vector<1x8x32xf32>
    %1 = vector.shape_cast %0 : vector<1x8x32xf32> to vector<8x32xf32>
    %c0_2 = arith.constant 0 : index
    %c0_3 = arith.constant 0 : index
    %2 = vector.load %arg2[%c0_2, %c0_3] : memref<1x32xf32, #tpu.memory_space<vmem>>, vector<1x32xf32>
    %3 = vector.shape_cast %2 : vector<1x32xf32> to vector<32xf32>
    %c0_4 = arith.constant 0 : index
    %c0_5 = arith.constant 0 : index
    %4 = vector.load %arg3[%c0_4, %c0_5] : memref<1x32xf32, #tpu.memory_space<vmem>>, vector<1x32xf32>
    %5 = vector.shape_cast %4 : vector<1x32xf32> to vector<32xf32>
    %cst = arith.constant dense<0.000000e+00> : vector<8xf32>
    %6 = vector.multi_reduction <add>, %1, %cst [1] : vector<8x32xf32> to vector<8xf32>
    %7 = vector.shape_cast %6 : vector<8xf32> to vector<8x1xf32>
    %cst_6 = arith.constant 3.200000e+01 : f32
    %8 = vector.broadcast %cst_6 : f32 to vector<8x1xf32>
    %9 = arith.divf %7, %8 : vector<8x1xf32>
    %10 = vector.broadcast %9 : vector<8x1xf32> to vector<8x32xf32>
    %11 = arith.subf %1, %10 : vector<8x32xf32>
    %12 = arith.mulf %11, %11 : vector<8x32xf32>
    %cst_7 = arith.constant dense<0.000000e+00> : vector<8xf32>
    %13 = vector.multi_reduction <add>, %12, %cst_7 [1] : vector<8x32xf32> to vector<8xf32>
    %14 = vector.shape_cast %13 : vector<8xf32> to vector<8x1xf32>
    %cst_8 = arith.constant 3.200000e+01 : f32
    %15 = vector.broadcast %cst_8 : f32 to vector<8x1xf32>
    %16 = arith.divf %14, %15 : vector<8x1xf32>
    %17 = vector.broadcast %9 : vector<8x1xf32> to vector<8x32xf32>
    %18 = arith.subf %1, %17 : vector<8x32xf32>
    %cst_9 = arith.constant 9.99999974E-6 : f32
    %19 = vector.broadcast %cst_9 : f32 to vector<8x1xf32>
    %20 = arith.addf %16, %19 : vector<8x1xf32>
    %21 = math.rsqrt %20 : vector<8x1xf32>
    %22 = vector.broadcast %21 : vector<8x1xf32> to vector<8x32xf32>
    %23 = arith.mulf %18, %22 : vector<8x32xf32>
    %24 = vector.shape_cast %3 : vector<32xf32> to vector<1x32xf32>
    %25 = vector.broadcast %24 : vector<1x32xf32> to vector<8x32xf32>
    %26 = arith.mulf %23, %25 : vector<8x32xf32>
    %27 = vector.shape_cast %5 : vector<32xf32> to vector<1x32xf32>
    %28 = vector.broadcast %27 : vector<1x32xf32> to vector<8x32xf32>
    %29 = arith.addf %26, %28 : vector<8x32xf32>
    %30 = arith.truncf %29 : vector<8x32xf32> to vector<8x32xbf16>
    %c0_10 = arith.constant 0 : index
    %c0_11 = arith.constant 0 : index
    %31 = vector.load %arg4[%c0_10, %c0_11] : memref<32x96xbf16, #tpu.memory_space<vmem>>, vector<32x96xbf16>
    %cst_12 = arith.constant dense<0.000000e+00> : vector<8x96xf32>
    %32 = tpu.matmul %30, %31, %cst_12 {dimension_numbers = #tpu.dot_dimension_numbers<[1], [0], [0], [1], [0, 0, 1, 1], [], []>} : vector<8x32xbf16>, vector<32x96xbf16>, vector<8x96xf32> -> vector<8x96xf32>
    %33 = arith.truncf %32 : vector<8x96xf32> to vector<8x96xbf16>
    %34 = vector.extract_strided_slice %33 {offsets = [0, 0], sizes = [8, 8], strides = [1, 1]} : vector<8x96xbf16> to vector<8x8xbf16>
    %35 = vector.extract_strided_slice %33 {offsets = [0, 8], sizes = [8, 8], strides = [1, 1]} : vector<8x96xbf16> to vector<8x8xbf16>
    %36 = vector.extract_strided_slice %33 {offsets = [0, 16], sizes = [8, 8], strides = [1, 1]} : vector<8x96xbf16> to vector<8x8xbf16>
    %37 = vector.extract_strided_slice %33 {offsets = [0, 24], sizes = [8, 8], strides = [1, 1]} : vector<8x96xbf16> to vector<8x8xbf16>
    %38 = vector.shape_cast %34 : vector<8x8xbf16> to vector<1x8x8xbf16>
    %39 = vector.shape_cast %35 : vector<8x8xbf16> to vector<1x8x8xbf16>
    %40 = vector.shape_cast %36 : vector<8x8xbf16> to vector<1x8x8xbf16>
    %41 = vector.shape_cast %37 : vector<8x8xbf16> to vector<1x8x8xbf16>
    %42 = tpu.concatenate %38, %39, %40, %41 in 0 : vector<1x8x8xbf16>, vector<1x8x8xbf16>, vector<1x8x8xbf16>, vector<1x8x8xbf16> -> vector<4x8x8xbf16>
    %43 = vector.extract_strided_slice %33 {offsets = [0, 32], sizes = [8, 8], strides = [1, 1]} : vector<8x96xbf16> to vector<8x8xbf16>
    %44 = vector.extract_strided_slice %33 {offsets = [0, 40], sizes = [8, 8], strides = [1, 1]} : vector<8x96xbf16> to vector<8x8xbf16>
    %45 = vector.extract_strided_slice %33 {offsets = [0, 48], sizes = [8, 8], strides = [1, 1]} : vector<8x96xbf16> to vector<8x8xbf16>
    %46 = vector.extract_strided_slice %33 {offsets = [0, 56], sizes = [8, 8], strides = [1, 1]} : vector<8x96xbf16> to vector<8x8xbf16>
    %47 = vector.shape_cast %43 : vector<8x8xbf16> to vector<1x8x8xbf16>
    %48 = vector.shape_cast %44 : vector<8x8xbf16> to vector<1x8x8xbf16>
    %49 = vector.shape_cast %45 : vector<8x8xbf16> to vector<1x8x8xbf16>
    %50 = vector.shape_cast %46 : vector<8x8xbf16> to vector<1x8x8xbf16>
    %51 = tpu.concatenate %47, %48, %49, %50 in 0 : vector<1x8x8xbf16>, vector<1x8x8xbf16>, vector<1x8x8xbf16>, vector<1x8x8xbf16> -> vector<4x8x8xbf16>
    %52 = vector.extract_strided_slice %33 {offsets = [0, 64], sizes = [8, 8], strides = [1, 1]} : vector<8x96xbf16> to vector<8x8xbf16>
    %53 = vector.extract_strided_slice %33 {offsets = [0, 72], sizes = [8, 8], strides = [1, 1]} : vector<8x96xbf16> to vector<8x8xbf16>
    %54 = vector.extract_strided_slice %33 {offsets = [0, 80], sizes = [8, 8], strides = [1, 1]} : vector<8x96xbf16> to vector<8x8xbf16>
    %55 = vector.extract_strided_slice %33 {offsets = [0, 88], sizes = [8, 8], strides = [1, 1]} : vector<8x96xbf16> to vector<8x8xbf16>
    %56 = vector.shape_cast %52 : vector<8x8xbf16> to vector<1x8x8xbf16>
    %57 = vector.shape_cast %53 : vector<8x8xbf16> to vector<1x8x8xbf16>
    %58 = vector.shape_cast %54 : vector<8x8xbf16> to vector<1x8x8xbf16>
    %59 = vector.shape_cast %55 : vector<8x8xbf16> to vector<1x8x8xbf16>
    %60 = tpu.concatenate %56, %57, %58, %59 in 0 : vector<1x8x8xbf16>, vector<1x8x8xbf16>, vector<1x8x8xbf16>, vector<1x8x8xbf16> -> vector<4x8x8xbf16>
    "tpu.trace_start"() <{level = 10 : i32, message = "hnd,hmd->hnm"}> : () -> ()
    %cst_13 = arith.constant dense<0.000000e+00> : vector<4x8x8xf32>
    %61 = tpu.matmul %42, %51, %cst_13 {dimension_numbers = #tpu.dot_dimension_numbers<[2], [2], [1], [1], [0, 0, 0, 1, 1, 1], [0], [0]>} : vector<4x8x8xbf16>, vector<4x8x8xbf16>, vector<4x8x8xf32> -> vector<4x8x8xf32>
    "tpu.trace_stop"() : () -> ()
    %cst_14 = arith.constant dense<0xFF800000> : vector<4x8xf32>
    %62 = vector.multi_reduction <maximumf>, %61, %cst_14 [2] : vector<4x8x8xf32> to vector<4x8xf32>
    %63 = vector.shape_cast %62 : vector<4x8xf32> to vector<4x8x1xf32>
    %64 = vector.broadcast %63 : vector<4x8x1xf32> to vector<4x8x8xf32>
    %65 = arith.subf %61, %64 : vector<4x8x8xf32>
    %66 = math.exp %65 : vector<4x8x8xf32>
    %cst_15 = arith.constant dense<0.000000e+00> : vector<4x8xf32>
    %67 = vector.multi_reduction <add>, %66, %cst_15 [2] : vector<4x8x8xf32> to vector<4x8xf32>
    %68 = vector.shape_cast %67 : vector<4x8xf32> to vector<4x8x1xf32>
    %69 = tpu.reciprocal %68 {approx = true} : vector<4x8x1xf32> -> vector<4x8x1xf32>
    %70 = vector.broadcast %69 : vector<4x8x1xf32> to vector<4x8x8xf32>
    %71 = arith.mulf %66, %70 : vector<4x8x8xf32>
    %72 = arith.truncf %71 : vector<4x8x8xf32> to vector<4x8x8xbf16>
    "tpu.trace_start"() <{level = 10 : i32, message = "hnm,hmd->hnd"}> : () -> ()
    %cst_16 = arith.constant dense<0.000000e+00> : vector<4x8x8xf32>
    %73 = tpu.matmul %72, %60, %cst_16 {dimension_numbers = #tpu.dot_dimension_numbers<[2], [1], [1], [2], [0, 0, 0, 1, 1, 2], [0], [0]>} : vector<4x8x8xbf16>, vector<4x8x8xbf16>, vector<4x8x8xf32> -> vector<4x8x8xf32>
    "tpu.trace_stop"() : () -> ()
    %74 = arith.truncf %73 : vector<4x8x8xf32> to vector<4x8x8xbf16>
    %75 = vector.extract_strided_slice %74 {offsets = [0, 0, 0], sizes = [1, 8, 8], strides = [1, 1, 1]} : vector<4x8x8xbf16> to vector<1x8x8xbf16>
    %76 = vector.shape_cast %75 : vector<1x8x8xbf16> to vector<8x8xbf16>
    %77 = vector.extract_strided_slice %74 {offsets = [1, 0, 0], sizes = [1, 8, 8], strides = [1, 1, 1]} : vector<4x8x8xbf16> to vector<1x8x8xbf16>
    %78 = vector.shape_cast %77 : vector<1x8x8xbf16> to vector<8x8xbf16>
    %79 = vector.extract_strided_slice %74 {offsets = [2, 0, 0], sizes = [1, 8, 8], strides = [1, 1, 1]} : vector<4x8x8xbf16> to vector<1x8x8xbf16>
    %80 = vector.shape_cast %79 : vector<1x8x8xbf16> to vector<8x8xbf16>
    %81 = vector.extract_strided_slice %74 {offsets = [3, 0, 0], sizes = [1, 8, 8], strides = [1, 1, 1]} : vector<4x8x8xbf16> to vector<1x8x8xbf16>
    %82 = vector.shape_cast %81 : vector<1x8x8xbf16> to vector<8x8xbf16>
    %83 = tpu.concatenate %76, %78, %80, %82 in 1 : vector<8x8xbf16>, vector<8x8xbf16>, vector<8x8xbf16>, vector<8x8xbf16> -> vector<8x32xbf16>
    %c0_17 = arith.constant 0 : index
    %c0_18 = arith.constant 0 : index
    %84 = vector.load %arg5[%c0_17, %c0_18] : memref<32x32xbf16, #tpu.memory_space<vmem>>, vector<32x32xbf16>
    %cst_19 = arith.constant dense<0.000000e+00> : vector<8x32xf32>
    %85 = tpu.matmul %83, %84, %cst_19 {dimension_numbers = #tpu.dot_dimension_numbers<[1], [0], [0], [1], [0, 0, 1, 1], [], []>} : vector<8x32xbf16>, vector<32x32xbf16>, vector<8x32xf32> -> vector<8x32xf32>
    %86 = arith.addf %1, %85 : vector<8x32xf32>
    %c0_20 = arith.constant 0 : index
    %c0_21 = arith.constant 0 : index
    %87 = vector.load %arg6[%c0_20, %c0_21] : memref<1x32xf32, #tpu.memory_space<vmem>>, vector<1x32xf32>
    %88 = vector.shape_cast %87 : vector<1x32xf32> to vector<32xf32>
    %89 = vector.shape_cast %88 : vector<32xf32> to vector<1x32xf32>
    %90 = vector.broadcast %89 : vector<1x32xf32> to vector<8x32xf32>
    %91 = arith.addf %86, %90 : vector<8x32xf32>
    %c0_22 = arith.constant 0 : index
    %c0_23 = arith.constant 0 : index
    %92 = vector.load %arg7[%c0_22, %c0_23] : memref<1x32xf32, #tpu.memory_space<vmem>>, vector<1x32xf32>
    %93 = vector.shape_cast %92 : vector<1x32xf32> to vector<32xf32>
    %c0_24 = arith.constant 0 : index
    %c0_25 = arith.constant 0 : index
    %94 = vector.load %arg8[%c0_24, %c0_25] : memref<1x32xf32, #tpu.memory_space<vmem>>, vector<1x32xf32>
    %95 = vector.shape_cast %94 : vector<1x32xf32> to vector<32xf32>
    %cst_26 = arith.constant dense<0.000000e+00> : vector<8xf32>
    %96 = vector.multi_reduction <add>, %91, %cst_26 [1] : vector<8x32xf32> to vector<8xf32>
    %97 = vector.shape_cast %96 : vector<8xf32> to vector<8x1xf32>
    %cst_27 = arith.constant 3.200000e+01 : f32
    %98 = vector.broadcast %cst_27 : f32 to vector<8x1xf32>
    %99 = arith.divf %97, %98 : vector<8x1xf32>
    %100 = vector.broadcast %99 : vector<8x1xf32> to vector<8x32xf32>
    %101 = arith.subf %91, %100 : vector<8x32xf32>
    %102 = arith.mulf %101, %101 : vector<8x32xf32>
    %cst_28 = arith.constant dense<0.000000e+00> : vector<8xf32>
    %103 = vector.multi_reduction <add>, %102, %cst_28 [1] : vector<8x32xf32> to vector<8xf32>
    %104 = vector.shape_cast %103 : vector<8xf32> to vector<8x1xf32>
    %cst_29 = arith.constant 3.200000e+01 : f32
    %105 = vector.broadcast %cst_29 : f32 to vector<8x1xf32>
    %106 = arith.divf %104, %105 : vector<8x1xf32>
    %107 = vector.broadcast %99 : vector<8x1xf32> to vector<8x32xf32>
    %108 = arith.subf %91, %107 : vector<8x32xf32>
    %cst_30 = arith.constant 9.99999974E-6 : f32
    %109 = vector.broadcast %cst_30 : f32 to vector<8x1xf32>
    %110 = arith.addf %106, %109 : vector<8x1xf32>
    %111 = math.rsqrt %110 : vector<8x1xf32>
    %112 = vector.broadcast %111 : vector<8x1xf32> to vector<8x32xf32>
    %113 = arith.mulf %108, %112 : vector<8x32xf32>
    %114 = vector.shape_cast %93 : vector<32xf32> to vector<1x32xf32>
    %115 = vector.broadcast %114 : vector<1x32xf32> to vector<8x32xf32>
    %116 = arith.mulf %113, %115 : vector<8x32xf32>
    %117 = vector.shape_cast %95 : vector<32xf32> to vector<1x32xf32>
    %118 = vector.broadcast %117 : vector<1x32xf32> to vector<8x32xf32>
    %119 = arith.addf %116, %118 : vector<8x32xf32>
    %120 = arith.truncf %119 : vector<8x32xf32> to vector<8x32xbf16>
    %c0_31 = arith.constant 0 : index
    %c0_32 = arith.constant 0 : index
    %121 = vector.load %arg9[%c0_31, %c0_32] : memref<32x64xbf16, #tpu.memory_space<vmem>>, vector<32x64xbf16>
    %cst_33 = arith.constant dense<0.000000e+00> : vector<8x64xf32>
    %122 = tpu.matmul %120, %121, %cst_33 {dimension_numbers = #tpu.dot_dimension_numbers<[1], [0], [0], [1], [0, 0, 1, 1], [], []>} : vector<8x32xbf16>, vector<32x64xbf16>, vector<8x64xf32> -> vector<8x64xf32>
    %c0_34 = arith.constant 0 : index
    %c0_35 = arith.constant 0 : index
    %123 = vector.load %arg10[%c0_34, %c0_35] : memref<1x64xf32, #tpu.memory_space<vmem>>, vector<1x64xf32>
    %124 = vector.shape_cast %123 : vector<1x64xf32> to vector<64xf32>
    %125 = vector.shape_cast %124 : vector<64xf32> to vector<1x64xf32>
    %126 = vector.broadcast %125 : vector<1x64xf32> to vector<8x64xf32>
    %127 = arith.addf %122, %126 : vector<8x64xf32>
    %cst_36 = arith.constant 5.000000e-01 : f32
    %128 = vector.broadcast %cst_36 : f32 to vector<8x64xf32>
    %129 = arith.mulf %128, %127 : vector<8x64xf32>
    %cst_37 = arith.constant 0.707106769 : f32
    %130 = vector.broadcast %cst_37 : f32 to vector<8x64xf32>
    %131 = arith.mulf %127, %130 : vector<8x64xf32>
    %132 = math.erf %131 : vector<8x64xf32>
    %cst_38 = arith.constant 1.000000e+00 : f32
    %133 = vector.broadcast %cst_38 : f32 to vector<8x64xf32>
    %134 = arith.addf %133, %132 : vector<8x64xf32>
    %135 = arith.mulf %129, %134 : vector<8x64xf32>
    %136 = arith.truncf %135 : vector<8x64xf32> to vector<8x64xbf16>
    %c0_39 = arith.constant 0 : index
    %c0_40 = arith.constant 0 : index
    %137 = vector.load %arg11[%c0_39, %c0_40] : memref<64x32xbf16, #tpu.memory_space<vmem>>, vector<64x32xbf16>
    %cst_41 = arith.constant dense<0.000000e+00> : vector<8x32xf32>
    %138 = tpu.matmul %136, %137, %cst_41 {dimension_numbers = #tpu.dot_dimension_numbers<[1], [0], [0], [1], [0, 0, 1, 1], [], []>} : vector<8x64xbf16>, vector<64x32xbf16>, vector<8x32xf32> -> vector<8x32xf32>
    %c0_42 = arith.constant 0 : index
    %c0_43 = arith.constant 0 : index
    %139 = vector.load %arg12[%c0_42, %c0_43] : memref<1x32xf32, #tpu.memory_space<vmem>>, vector<1x32xf32>
    %140 = vector.shape_cast %139 : vector<1x32xf32> to vector<32xf32>
    %141 = vector.shape_cast %140 : vector<32xf32> to vector<1x32xf32>
    %142 = vector.broadcast %141 : vector<1x32xf32> to vector<8x32xf32>
    %143 = arith.addf %138, %142 : vector<8x32xf32>
    %144 = arith.addf %91, %143 : vector<8x32xf32>
    %c0_44 = arith.constant 0 : index
    %c0_45 = arith.constant 0 : index
    %c0_46 = arith.constant 0 : index
    %145 = vector.load %arg13[%c0_44, %c0_45, %c0_46] : memref<1x8x32xf32, #tpu.memory_space<vmem>>, vector<1x8x32xf32>
    %146 = vector.shape_cast %145 : vector<1x8x32xf32> to vector<8x32xf32>
    %147 = vector.shape_cast %144 : vector<8x32xf32> to vector<1x8x32xf32>
    tpu.vector_store %arg13[%c0_44, %c0_45, %c0_46], %147 {strides = array<i32>} : memref<1x8x32xf32, #tpu.memory_space<vmem>>, vector<1x8x32xf32>,
    return
  }
  func.func @transform_0(%arg0: i32) -> (i32, i32, i32) {
    %c0_i32 = arith.constant 0 : i32
    %c0_i32_0 = arith.constant 0 : i32
    %c0_i32_1 = arith.constant 0 : i32
    return %arg0, %c0_i32, %c0_i32_0 : i32, i32, i32
  }
  func.func @transform_1(%arg0: i32) -> (i32, i32) {
    %c0_i32 = arith.constant 0 : i32
    %c0_i32_0 = arith.constant 0 : i32
    %c0_i32_1 = arith.constant 0 : i32
    return %c0_i32, %c0_i32_0 : i32, i32
  }
  func.func @transform_2(%arg0: i32) -> (i32, i32) {
    %c0_i32 = arith.constant 0 : i32
    %c0_i32_0 = arith.constant 0 : i32
    %c0_i32_1 = arith.constant 0 : i32
    return %c0_i32, %c0_i32_0 : i32, i32
  }
  func.func @transform_3(%arg0: i32) -> (i32, i32) {
    %c0_i32 = arith.constant 0 : i32
    %c0_i32_0 = arith.constant 0 : i32
    %c0_i32_1 = arith.constant 0 : i32
    return %c0_i32, %c0_i32_0 : i32, i32
  }
  func.func @transform_4(%arg0: i32) -> (i32, i32) {
    %c0_i32 = arith.constant 0 : i32
    %c0_i32_0 = arith.constant 0 : i32
    %c0_i32_1 = arith.constant 0 : i32
    return %c0_i32, %c0_i32_0 : i32, i32
  }
  func.func @transform_5(%arg0: i32) -> (i32, i32) {
    %c0_i32 = arith.constant 0 : i32
    %c0_i32_0 = arith.constant 0 : i32
    %c0_i32_1 = arith.constant 0 : i32
    return %c0_i32, %c0_i32_0 : i32, i32
  }
  func.func @transform_6(%arg0: i32) -> (i32, i32) {
    %c0_i32 = arith.constant 0 : i32
    %c0_i32_0 = arith.constant 0 : i32
    %c0_i32_1 = arith.constant 0 : i32
    return %c0_i32, %c0_i32_0 : i32, i32
  }
  func.func @transform_7(%arg0: i32) -> (i32, i32) {
    %c0_i32 = arith.constant 0 : i32
    %c0_i32_0 = arith.constant 0 : i32
    %c0_i32_1 = arith.constant 0 : i32
    return %c0_i32, %c0_i32_0 : i32, i32
  }
  func.func @transform_8(%arg0: i32) -> (i32, i32) {
    %c0_i32 = arith.constant 0 : i32
    %c0_i32_0 = arith.constant 0 : i32
    %c0_i32_1 = arith.constant 0 : i32
    return %c0_i32, %c0_i32_0 : i32, i32
  }
  func.func @transform_9(%arg0: i32) -> (i32, i32) {
    %c0_i32 = arith.constant 0 : i32
    %c0_i32_0 = arith.constant 0 : i32
    %c0_i32_1 = arith.constant 0 : i32
    return %c0_i32, %c0_i32_0 : i32, i32
  }
  func.func @transform_10(%arg0: i32) -> (i32, i32) {
    %c0_i32 = arith.constant 0 : i32
    %c0_i32_0 = arith.constant 0 : i32
    %c0_i32_1 = arith.constant 0 : i32
    return %c0_i32, %c0_i32_0 : i32, i32
  }
  func.func @transform_11(%arg0: i32) -> (i32, i32) {
    %c0_i32 = arith.constant 0 : i32
    %c0_i32_0 = arith.constant 0 : i32
    %c0_i32_1 = arith.constant 0 : i32
    return %c0_i32, %c0_i32_0 : i32, i32
  }
  func.func @transform_12(%arg0: i32) -> (i32, i32, i32) {
    %c0_i32 = arith.constant 0 : i32
    %c0_i32_0 = arith.constant 0 : i32
    %c0_i32_1 = arith.constant 0 : i32
    return %arg0, %c0_i32, %c0_i32_0 : i32, i32, i32
  }
}

module attributes {stable_mosaic.version = 11 : i64} {
  func.func @layer_kernel(%arg0: i32, %arg1: memref<1x8x32xf32, #tpu.memory_space<vmem>>, %arg2: memref<1x32xf32, #tpu.memory_space<vmem>>, %arg3: memref<1x32xf32, #tpu.memory_space<vmem>>, %arg4: memref<32x96xbf16, #tpu.memory_space<vmem>>, %arg5: memref<32x32xbf16, #tpu.memory_space<vmem>>, %arg6: memref<1x32xf32, #tpu.memory_space<vmem>>, %arg7: memref<1x32xf32, #tpu.memory_space<vmem>>, %arg8: memref<1x32xf32, #tpu.memory_space<vmem>>, %arg9: memref<32x64xbf16, #tpu.memory_space<vmem>>, %arg10: memref<1x64xf32, #tpu.memory_space<vmem>>, %arg11: memref<64x32xbf16, #tpu.memory_space<vmem>>, %arg12: memref<1x32xf32, #tpu.memory_space<vmem>>, %arg13: memref<1x8x32xf32, #tpu.memory_space<vmem>>) attributes {dimension_semantics = [#tpu.dimension_semantics<parallel>], iteration_bounds = array<i64: 2>, scalar_prefetch = 0 : i64, scratch_operands = 0 : i64, tpu.core_type = #tpu.core_type<tc>, window_params = [{transform_indices = @transform_0, window_bounds = array<i64: 1, 8, 32>}, {pipeline_mode = #tpu.pipeline_mode<synchronous>, transform_indices = @transform_1, window_bounds = array<i64: 1, 32>}, {pipeline_mode = #tpu.pipeline_mode<synchronous>, transform_indices = @transform_2, window_bounds = array<i64: 1, 32>}, {pipeline_mode = #tpu.pipeline_mode<synchronous>, transform_indices = @transform_3, window_bounds = array<i64: 32, 96>}, {pipeline_mode = #tpu.pipeline_mode<synchronous>, transform_indices = @transform_4, window_bounds = array<i64: 32, 32>}, {pipeline_mode = #tpu.pipeline_mode<synchronous>, transform_indices = @transform_5, window_bounds = array<i64: 1, 32>}, {pipeline_mode = #tpu.pipeline_mode<synchronous>, transform_indices = @transform_6, window_bounds = array<i64: 1, 32>}, {pipeline_mode = #tpu.pipeline_mode<synchronous>, transform_indices = @transform_7, window_bounds = array<i64: 1, 32>}, {pipeline_mode = #tpu.pipeline_mode<synchronous>, transform_indices = @transform_8, window_bounds = array<i64: 32, 64>}, {pipeline_mode = #tpu.pipeline_mode<synchronous>, transform_indices = @transform_9, window_bounds = array<i64: 1, 64>}, {pipeline_mode = #tpu.pipeline_mode<synchronous>, transform_indices = @transform_10, window_bounds = array<i64: 64, 32>}, {pipeline_mode = #tpu.pipeline_mode<synchronous>, transform_indices = @transform_11, window_bounds = array<i64: 1, 32>}, {transform_indices = @transform_12, window_bounds = array<i64: 1, 8, 32>}]} {
    %c0 = arith.constant 0 : index
    %c0_0 = arith.constant 0 : index
    %c0_1 = arith.constant 0 : index
    %0 = vector.load %arg1[%c0, %c0_0, %c0_1] : memref<1x8x32xf32, #tpu.memory_space<vmem>>, vector<1x8x32xf32>
    %1 = vector.shape_cast %0 : vector<1x8x32xf32> to vector<8x32xf32>
    %c0_2 = arith.constant 0 : index
    %c0_3 = arith.constant 0 : index
    %2 = vector.load %arg2[%c0_2, %c0_3] : memref<1x32xf32, #tpu.memory_space<vmem>>, vector<1x32xf32>
    %3 = vector.shape_cast %2 : vector<1x32xf32> to vector<32xf32>
    %c0_4 = arith.constant 0 : index
    %c0_5 = arith.constant 0 : index
    %4 = vector.load %arg3[%c0_4, %c0_5] : memref<1x32xf32, #tpu.memory_space<vmem>>, vector<1x32xf32>
    %5 = vector.shape_cast %4 : vector<1x32xf32> to vector<32xf32>
    %cst = arith.constant dense<0.000000e+00> : vector<8xf32>
    %6 = vector.multi_reduction <add>, %1, %cst [1] : vector<8x32xf32> to vector<8xf32>
    %7 = vector.shape_cast %6 : vector<8xf32> to vector<8x1xf32>
    %cst_6 = arith.constant 3.200000e+01 : f32
    %8 = vector.broadcast %cst_6 : f32 to vector<8x1xf32>
    %9 = arith.divf %7, %8 : vector<8x1xf32>
    %10 = vector.broadcast %9 : vector<8x1xf32> to vector<8x32xf32>
    %11 = arith.subf %1, %10 : vector<8x32xf32>
    %12 = arith.mulf %11, %11 : vector<8x32xf32>
    %cst_7 = arith.constant dense<0.000000e+00> : vector<8xf32>
    %13 = vector.multi_reduction <add>, %12, %cst_7 [1] : vector<8x32xf32> to vector<8xf32>
    %14 = vector.shape_cast %13 : vector<8xf32> to vector<8x1xf32>
    %cst_8 = arith.constant 3.200000e+01 : f32
    %15 = vector.broadcast %cst_8 : f32 to vector<8x1xf32>
    %16 = arith.divf %14, %15 : vector<8x1xf32>
    %17 = vector.broadcast %9 : vector<8x1xf32> to vector<8x32xf32>
    %18 = arith.subf %1, %17 : vector<8x32xf32>
    %cst_9 = arith.constant 9.99999974E-6 : f32
    %19 = vector.broadcast %cst_9 : f32 to vector<8x1xf32>
    %20 = arith.addf %16, %19 : vector<8x1xf32>
    %21 = math.rsqrt %20 : vector<8x1xf32>
    %22 = vector.broadcast %21 : vector<8x1xf32> to vector<8x32xf32>
    %23 = arith.mulf %18, %22 : vector<8x32xf32>
    %24 = vector.shape_cast %3 : vector<32xf32> to vector<1x32xf32>
    %25 = vector.broadcast %24 : vector<1x32xf32> to vector<8x32xf32>
    %26 = arith.mulf %23, %25 : vector<8x32xf32>
    %27 = vector.shape_cast %5 : vector<32xf32> to vector<1x32xf32>
    %28 = vector.broadcast %27 : vector<1x32xf32> to vector<8x32xf32>
    %29 = arith.addf %26, %28 : vector<8x32xf32>
    %30 = arith.truncf %29 : vector<8x32xf32> to vector<8x32xbf16>
    %c0_10 = arith.constant 0 : index
    %c0_11 = arith.constant 0 : index
    %31 = vector.load %arg4[%c0_10, %c0_11] : memref<32x96xbf16, #tpu.memory_space<vmem>>, vector<32x96xbf16>
    %cst_12 = arith.constant dense<0.000000e+00> : vector<8x96xf32>
    %32 = tpu.matmul %30, %31, %cst_12 {dimension_numbers = #tpu.dot_dimension_numbers<[1], [0], [0], [1], [0, 0, 1, 1], [], []>} : vector<8x32xbf16>, vector<32x96xbf16>, vector<8x96xf32> -> vector<8x96xf32>
    %33 = arith.truncf %32 : vector<8x96xf32> to vector<8x96xbf16>
    %34 = vector.extract_strided_slice %33 {offsets = [0, 0], sizes = [8, 8], strides = [1, 1]} : vector<8x96xbf16> to vector<8x8xbf16>
    %35 = vector.extract_strided_slice %33 {offsets = [0, 8], sizes = [8, 8], strides = [1, 1]} : vector<8x96xbf16> to vector<8x8xbf16>
    %36 = vector.extract_strided_slice %33 {offsets = [0, 16], sizes = [8, 8], strides = [1, 1]} : vector<8x96xbf16> to vector<8x8xbf16>
    %37 = vector.extract_strided_slice %33 {offsets = [0, 24], sizes = [8, 8], strides = [1, 1]} : vector<8x96xbf16> to vector<8x8xbf16>
    %38 = vector.shape_cast %34 : vector<8x8xbf16> to vector<1x8x8xbf16>
    %39 = vector.shape_cast %35 : vector<8x8xbf16> to vector<1x8x8xbf16>
    %40 = vector.shape_cast %36 : vector<8x8xbf16> to vector<1x8x8xbf16>
    %41 = vector.shape_cast %37 : vector<8x8xbf16> to vector<1x8x8xbf16>
    %42 = tpu.concatenate %38, %39, %40, %41 in 0 : vector<1x8x8xbf16>, vector<1x8x8xbf16>, vector<1x8x8xbf16>, vector<1x8x8xbf16> -> vector<4x8x8xbf16>
    %43 = vector.extract_strided_slice %33 {offsets = [0, 32], sizes = [8, 8], strides = [1, 1]} : vector<8x96xbf16> to vector<8x8xbf16>
    %44 = vector.extract_strided_slice %33 {offsets = [0, 40], sizes = [8, 8], strides = [1, 1]} : vector<8x96xbf16> to vector<8x8xbf16>
    %45 = vector.extract_strided_slice %33 {offsets = [0, 48], sizes = [8, 8], strides = [1, 1]} : vector<8x96xbf16> to vector<8x8xbf16>
    %46 = vector.extract_strided_slice %33 {offsets = [0, 56], sizes = [8, 8], strides = [1, 1]} : vector<8x96xbf16> to vector<8x8xbf16>
    %47 = vector.shape_cast %43 : vector<8x8xbf16> to vector<1x8x8xbf16>
    %48 = vector.shape_cast %44 : vector<8x8xbf16> to vector<1x8x8xbf16>
    %49 = vector.shape_cast %45 : vector<8x8xbf16> to vector<1x8x8xbf16>
    %50 = vector.shape_cast %46 : vector<8x8xbf16> to vector<1x8x8xbf16>
    %51 = tpu.concatenate %47, %48, %49, %50 in 0 : vector<1x8x8xbf16>, vector<1x8x8xbf16>, vector<1x8x8xbf16>, vector<1x8x8xbf16> -> vector<4x8x8xbf16>
    %52 = vector.extract_strided_slice %33 {offsets = [0, 64], sizes = [8, 8], strides = [1, 1]} : vector<8x96xbf16> to vector<8x8xbf16>
    %53 = vector.extract_strided_slice %33 {offsets = [0, 72], sizes = [8, 8], strides = [1, 1]} : vector<8x96xbf16> to vector<8x8xbf16>
    %54 = vector.extract_strided_slice %33 {offsets = [0, 80], sizes = [8, 8], strides = [1, 1]} : vector<8x96xbf16> to vector<8x8xbf16>
    %55 = vector.extract_strided_slice %33 {offsets = [0, 88], sizes = [8, 8], strides = [1, 1]} : vector<8x96xbf16> to vector<8x8xbf16>
    %56 = vector.shape_cast %52 : vector<8x8xbf16> to vector<1x8x8xbf16>
    %57 = vector.shape_cast %53 : vector<8x8xbf16> to vector<1x8x8xbf16>
    %58 = vector.shape_cast %54 : vector<8x8xbf16> to vector<1x8x8xbf16>
    %59 = vector.shape_cast %55 : vector<8x8xbf16> to vector<1x8x8xbf16>
    %60 = tpu.concatenate %56, %57, %58, %59 in 0 : vector<1x8x8xbf16>, vector<1x8x8xbf16>, vector<1x8x8xbf16>, vector<1x8x8xbf16> -> vector<4x8x8xbf16>
    "tpu.trace_start"() <{level = 10 : i32, message = "hnd,hmd->hnm"}> : () -> ()
    %cst_13 = arith.constant dense<0.000000e+00> : vector<4x8x8xf32>
    %61 = tpu.matmul %42, %51, %cst_13 {dimension_numbers = #tpu.dot_dimension_numbers<[2], [2], [1], [1], [0, 0, 0, 1, 1, 1], [0], [0]>} : vector<4x8x8xbf16>, vector<4x8x8xbf16>, vector<4x8x8xf32> -> vector<4x8x8xf32>
    "tpu.trace_stop"() : () -> ()
    %cst_14 = arith.constant dense<0xFF800000> : vector<4x8xf32>
    %62 = vector.multi_reduction <maximumf>, %61, %cst_14 [2] : vector<4x8x8xf32> to vector<4x8xf32>
    %63 = vector.shape_cast %62 : vector<4x8xf32> to vector<4x8x1xf32>
    %64 = vector.broadcast %63 : vector<4x8x1xf32> to vector<4x8x8xf32>
    %65 = arith.subf %61, %64 : vector<4x8x8xf32>
    %66 = math.exp %65 : vector<4x8x8xf32>
    %cst_15 = arith.constant dense<0.000000e+00> : vector<4x8xf32>
    %67 = vector.multi_reduction <add>, %66, %cst_15 [2] : vector<4x8x8xf32> to vector<4x8xf32>
    %68 = vector.shape_cast %67 : vector<4x8xf32> to vector<4x8x1xf32>
    %69 = tpu.reciprocal %68 {approx = true} : vector<4x8x1xf32> -> vector<4x8x1xf32>
    %70 = vector.broadcast %69 : vector<4x8x1xf32> to vector<4x8x8xf32>
    %71 = arith.mulf %66, %70 : vector<4x8x8xf32>
    %72 = arith.truncf %71 : vector<4x8x8xf32> to vector<4x8x8xbf16>
    "tpu.trace_start"() <{level = 10 : i32, message = "hnm,hmd->hnd"}> : () -> ()
    %cst_16 = arith.constant dense<0.000000e+00> : vector<4x8x8xf32>
    %73 = tpu.matmul %72, %60, %cst_16 {dimension_numbers = #tpu.dot_dimension_numbers<[2], [1], [1], [2], [0, 0, 0, 1, 1, 2], [0], [0]>} : vector<4x8x8xbf16>, vector<4x8x8xbf16>, vector<4x8x8xf32> -> vector<4x8x8xf32>
    "tpu.trace_stop"() : () -> ()
    %74 = arith.truncf %73 : vector<4x8x8xf32> to vector<4x8x8xbf16>
    %75 = vector.extract_strided_slice %74 {offsets = [0, 0, 0], sizes = [1, 8, 8], strides = [1, 1, 1]} : vector<4x8x8xbf16> to vector<1x8x8xbf16>
    %76 = vector.shape_cast %75 : vector<1x8x8xbf16> to vector<8x8xbf16>
    %77 = vector.extract_strided_slice %74 {offsets = [1, 0, 0], sizes = [1, 8, 8], strides = [1, 1, 1]} : vector<4x8x8xbf16> to vector<1x8x8xbf16>
    %78 = vector.shape_cast %77 : vector<1x8x8xbf16> to vector<8x8xbf16>
    %79 = vector.extract_strided_slice %74 {offsets = [2, 0, 0], sizes = [1, 8, 8], strides = [1, 1, 1]} : vector<4x8x8xbf16> to vector<1x8x8xbf16>
    %80 = vector.shape_cast %79 : vector<1x8x8xbf16> to vector<8x8xbf16>
    %81 = vector.extract_strided_slice %74 {offsets = [3, 0, 0], sizes = [1, 8, 8], strides = [1, 1, 1]} : vector<4x8x8xbf16> to vector<1x8x8xbf16>
    %82 = vector.shape_cast %81 : vector<1x8x8xbf16> to vector<8x8xbf16>
    %83 = tpu.concatenate %76, %78, %80, %82 in 1 : vector<8x8xbf16>, vector<8x8xbf16>, vector<8x8xbf16>, vector<8x8xbf16> -> vector<8x32xbf16>
    %c0_17 = arith.constant 0 : index
    %c0_18 = arith.constant 0 : index
    %84 = vector.load %arg5[%c0_17, %c0_18] : memref<32x32xbf16, #tpu.memory_space<vmem>>, vector<32x32xbf16>
    %cst_19 = arith.constant dense<0.000000e+00> : vector<8x32xf32>
    %85 = tpu.matmul %83, %84, %cst_19 {dimension_numbers = #tpu.dot_dimension_numbers<[1], [0], [0], [1], [0, 0, 1, 1], [], []>} : vector<8x32xbf16>, vector<32x32xbf16>, vector<8x32xf32> -> vector<8x32xf32>
    %86 = arith.addf %1, %85 : vector<8x32xf32>
    %c0_20 = arith.constant 0 : index
    %c0_21 = arith.constant 0 : index
    %87 = vector.load %arg6[%c0_20, %c0_21] : memref<1x32xf32, #tpu.memory_space<vmem>>, vector<1x32xf32>
    %88 = vector.shape_cast %87 : vector<1x32xf32> to vector<32xf32>
    %89 = vector.shape_cast %88 : vector<32xf32> to vector<1x32xf32>
    %90 = vector.broadcast %89 : vector<1x32xf32> to vector<8x32xf32>
    %91 = arith.addf %86, %90 : vector<8x32xf32>
    %c0_22 = arith.constant 0 : index
    %c0_23 = arith.constant 0 : index
    %92 = vector.load %arg7[%c0_22, %c0_23] : memref<1x32xf32, #tpu.memory_space<vmem>>, vector<1x32xf32>
    %93 = vector.shape_cast %92 : vector<1x32xf32> to vector<32xf32>
    %c0_24 = arith.constant 0 : index
    %c0_25 = arith.constant 0 : index
    %94 = vector.load %arg8[%c0_24, %c0_25] : memref<1x32xf32, #tpu.memory_space<vmem>>, vector<1x32xf32>
    %95 = vector.shape_cast %94 : vector<1x32xf32> to vector<32xf32>
    %cst_26 = arith.constant dense<0.000000e+00> : vector<8xf32>
    %96 = vector.multi_reduction <add>, %91, %cst_26 [1] : vector<8x32xf32> to vector<8xf32>
    %97 = vector.shape_cast %96 : vector<8xf32> to vector<8x1xf32>
    %cst_27 = arith.constant 3.200000e+01 : f32
    %98 = vector.broadcast %cst_27 : f32 to vector<8x1xf32>
    %99 = arith.divf %97, %98 : vector<8x1xf32>
    %100 = vector.broadcast %99 : vector<8x1xf32> to vector<8x32xf32>
    %101 = arith.subf %91, %100 : vector<8x32xf32>
    %102 = arith.mulf %101, %101 : vector<8x32xf32>
    %cst_28 = arith.constant dense<0.000000e+00> : vector<8xf32>
    %103 = vector.multi_reduction <add>, %102, %cst_28 [1] : vector<8x32xf32> to vector<8xf32>
    %104 = vector.shape_cast %103 : vector<8xf32> to vector<8x1xf32>
    %cst_29 = arith.constant 3.200000e+01 : f32
    %105 = vector.broadcast %cst_29 : f32 to vector<8x1xf32>
    %106 = arith.divf %104, %105 : vector<8x1xf32>
    %107 = vector.broadcast %99 : vector<8x1xf32> to vector<8x32xf32>
    %108 = arith.subf %91, %107 : vector<8x32xf32>
    %cst_30 = arith.constant 9.99999974E-6 : f32
    %109 = vector.broadcast %cst_30 : f32 to vector<8x1xf32>
    %110 = arith.addf %106, %109 : vector<8x1xf32>
    %111 = math.rsqrt %110 : vector<8x1xf32>
    %112 = vector.broadcast %111 : vector<8x1xf32> to vector<8x32xf32>
    %113 = arith.mulf %108, %112 : vector<8x32xf32>
    %114 = vector.shape_cast %93 : vector<32xf32> to vector<1x32xf32>
    %115 = vector.broadcast %114 : vector<1x32xf32> to vector<8x32xf32>
    %116 = arith.mulf %113, %115 : vector<8x32xf32>
    %117 = vector.shape_cast %95 : vector<32xf32> to vector<1x32xf32>
    %118 = vector.broadcast %117 : vector<1x32xf32> to vector<8x32xf32>
    %119 = arith.addf %116, %118 : vector<8x32xf32>
    %120 = arith.truncf %119 : vector<8x32xf32> to vector<8x32xbf16>
    %c0_31 = arith.constant 0 : index
    %c0_32 = arith.constant 0 : index
    %121 = vector.load %arg9[%c0_31, %c0_32] : memref<32x64xbf16, #tpu.memory_space<vmem>>, vector<32x64xbf16>
    %cst_33 = arith.constant dense<0.000000e+00> : vector<8x64xf32>
    %122 = tpu.matmul %120, %121, %cst_33 {dimension_numbers = #tpu.dot_dimension_numbers<[1], [0], [0], [1], [0, 0, 1, 1], [], []>} : vector<8x32xbf16>, vector<32x64xbf16>, vector<8x64xf32> -> vector<8x64xf32>
    %c0_34 = arith.constant 0 : index
    %c0_35 = arith.constant 0 : index
    %123 = vector.load %arg10[%c0_34, %c0_35] : memref<1x64xf32, #tpu.memory_space<vmem>>, vector<1x64xf32>
    %124 = vector.shape_cast %123 : vector<1x64xf32> to vector<64xf32>
    %125 = vector.shape_cast %124 : vector<64xf32> to vector<1x64xf32>
    %126 = vector.broadcast %125 : vector<1x64xf32> to vector<8x64xf32>
    %127 = arith.addf %122, %126 : vector<8x64xf32>
    %cst_36 = arith.constant 5.000000e-01 : f32
    %128 = vector.broadcast %cst_36 : f32 to vector<8x64xf32>
    %129 = arith.mulf %128, %127 : vector<8x64xf32>
    %cst_37 = arith.constant 0.707106769 : f32
    %130 = vector.broadcast %cst_37 : f32 to vector<8x64xf32>
    %131 = arith.mulf %127, %130 : vector<8x64xf32>
    %132 = math.erf %131 : vector<8x64xf32>
    %cst_38 = arith.constant 1.000000e+00 : f32
    %133 = vector.broadcast %cst_38 : f32 to vector<8x64xf32>
    %134 = arith.addf %133, %132 : vector<8x64xf32>
    %135 = arith.mulf %129, %134 : vector<8x64xf32>
    %136 = arith.truncf %135 : vector<8x64xf32> to vector<8x64xbf16>
    %c0_39 = arith.constant 0 : index
    %c0_40 = arith.constant 0 : index
    %137 = vector.load %arg11[%c0_39, %c0_40] : memref<64x32xbf16, #tpu.memory_space<vmem>>, vector<64x32xbf16>
    %cst_41 = arith.constant dense<0.000000e+00> : vector<8x32xf32>
    %138 = tpu.matmul %136, %137, %cst_41 {dimension_numbers = #tpu.dot_dimension_numbers<[1], [0], [0], [1], [0, 0, 1, 1], [], []>} : vector<8x64xbf16>, vector<64x32xbf16>, vector<8x32xf32> -> vector<8x32xf32>
    %c0_42 = arith.constant 0 : index
    %c0_43 = arith.constant 0 : index
    %139 = vector.load %arg12[%c0_42, %c0_43] : memref<1x32xf32, #tpu.memory_space<vmem>>, vector<1x32xf32>
    %140 = vector.shape_cast %139 : vector<1x32xf32> to vector<32xf32>
    %141 = vector.shape_cast %140 : vector<32xf32> to vector<1x32xf32>
    %142 = vector.broadcast %141 : vector<1x32xf32> to vector<8x32xf32>
    %143 = arith.addf %138, %142 : vector<8x32xf32>
    %144 = arith.addf %91, %143 : vector<8x32xf32>
    %c0_44 = arith.constant 0 : index
    %c0_45 = arith.constant 0 : index
    %c0_46 = arith.constant 0 : index
    %145 = vector.load %arg13[%c0_44, %c0_45, %c0_46] : memref<1x8x32xf32, #tpu.memory_space<vmem>>, vector<1x8x32xf32>
    %146 = vector.shape_cast %145 : vector<1x8x32xf32> to vector<8x32xf32>
    %147 = vector.shape_cast %144 : vector<8x32xf32> to vector<1x8x32xf32>
    tpu.vector_store %arg13[%c0_44, %c0_45, %c0_46], %147 {strides = array<i32>} : memref<1x8x32xf32, #tpu.memory_space<vmem>>, vector<1x8x32xf32>,
    return
  }
  func.func @transform_0(%arg0: i32) -> (i32, i32, i32) {
    %c0_i32 = arith.constant 0 : i32
    %c0_i32_0 = arith.constant 0 : i32
    %c0_i32_1 = arith.constant 0 : i32
    return %arg0, %c0_i32, %c0_i32_0 : i32, i32, i32
  }
  func.func @transform_1(%arg0: i32) -> (i32, i32) {
    %c0_i32 = arith.constant 0 : i32
    %c0_i32_0 = arith.constant 0 : i32
    %c0_i32_1 = arith.constant 0 : i32
    return %c0_i32, %c0_i32_0 : i32, i32
  }
  func.func @transform_2(%arg0: i32) -> (i32, i32) {
    %c0_i32 = arith.constant 0 : i32
    %c0_i32_0 = arith.constant 0 : i32
    %c0_i32_1 = arith.constant 0 : i32
    return %c0_i32, %c0_i32_0 : i32, i32
  }
  func.func @transform_3(%arg0: i32) -> (i32, i32) {
    %c0_i32 = arith.constant 0 : i32
    %c0_i32_0 = arith.constant 0 : i32
    %c0_i32_1 = arith.constant 0 : i32
    return %c0_i32, %c0_i32_0 : i32, i32
  }
  func.func @transform_4(%arg0: i32) -> (i32, i32) {
    %c0_i32 = arith.constant 0 : i32
    %c0_i32_0 = arith.constant 0 : i32
    %c0_i32_1 = arith.constant 0 : i32
    return %c0_i32, %c0_i32_0 : i32, i32
  }
  func.func @transform_5(%arg0: i32) -> (i32, i32) {
    %c0_i32 = arith.constant 0 : i32
    %c0_i32_0 = arith.constant 0 : i32
    %c0_i32_1 = arith.constant 0 : i32
    return %c0_i32, %c0_i32_0 : i32, i32
  }
  func.func @transform_6(%arg0: i32) -> (i32, i32) {
    %c0_i32 = arith.constant 0 : i32
    %c0_i32_0 = arith.constant 0 : i32
    %c0_i32_1 = arith.constant 0 : i32
    return %c0_i32, %c0_i32_0 : i32, i32
  }
  func.func @transform_7(%arg0: i32) -> (i32, i32) {
    %c0_i32 = arith.constant 0 : i32
    %c0_i32_0 = arith.constant 0 : i32
    %c0_i32_1 = arith.constant 0 : i32
    return %c0_i32, %c0_i32_0 : i32, i32
  }
  func.func @transform_8(%arg0: i32) -> (i32, i32) {
    %c0_i32 = arith.constant 0 : i32
    %c0_i32_0 = arith.constant 0 : i32
    %c0_i32_1 = arith.constant 0 : i32
    return %c0_i32, %c0_i32_0 : i32, i32
  }
  func.func @transform_9(%arg0: i32) -> (i32, i32) {
    %c0_i32 = arith.constant 0 : i32
    %c0_i32_0 = arith.constant 0 : i32
    %c0_i32_1 = arith.constant 0 : i32
    return %c0_i32, %c0_i32_0 : i32, i32
  }
  func.func @transform_10(%arg0: i32) -> (i32, i32) {
    %c0_i32 = arith.constant 0 : i32
    %c0_i32_0 = arith.constant 0 : i32
    %c0_i32_1 = arith.constant 0 : i32
    return %c0_i32, %c0_i32_0 : i32, i32
  }
  func.func @transform_11(%arg0: i32) -> (i32, i32) {
    %c0_i32 = arith.constant 0 : i32
    %c0_i32_0 = arith.constant 0 : i32
    %c0_i32_1 = arith.constant 0 : i32
    return %c0_i32, %c0_i32_0 : i32, i32
  }
  func.func @transform_12(%arg0: i32) -> (i32, i32, i32) {
    %c0_i32 = arith.constant 0 : i32
    %c0_i32_0 = arith.constant 0 : i32
    %c0_i32_1 = arith.constant 0 : i32
    return %arg0, %c0_i32, %c0_i32_0 : i32, i32, i32
  }
}

module attributes {stable_mosaic.version = 11 : i64} {
  func.func @layer_kernel(%arg0: i32, %arg1: memref<1x8x32xf32, #tpu.memory_space<vmem>>, %arg2: memref<1x32xf32, #tpu.memory_space<vmem>>, %arg3: memref<1x32xf32, #tpu.memory_space<vmem>>, %arg4: memref<32x96xbf16, #tpu.memory_space<vmem>>, %arg5: memref<32x32xbf16, #tpu.memory_space<vmem>>, %arg6: memref<1x32xf32, #tpu.memory_space<vmem>>, %arg7: memref<1x32xf32, #tpu.memory_space<vmem>>, %arg8: memref<1x32xf32, #tpu.memory_space<vmem>>, %arg9: memref<32x64xbf16, #tpu.memory_space<vmem>>, %arg10: memref<1x64xf32, #tpu.memory_space<vmem>>, %arg11: memref<64x32xbf16, #tpu.memory_space<vmem>>, %arg12: memref<1x32xf32, #tpu.memory_space<vmem>>, %arg13: memref<1x8x32xf32, #tpu.memory_space<vmem>>) attributes {dimension_semantics = [#tpu.dimension_semantics<parallel>], iteration_bounds = array<i64: 2>, scalar_prefetch = 0 : i64, scratch_operands = 0 : i64, tpu.core_type = #tpu.core_type<tc>, window_params = [{transform_indices = @transform_0, window_bounds = array<i64: 1, 8, 32>}, {pipeline_mode = #tpu.pipeline_mode<synchronous>, transform_indices = @transform_1, window_bounds = array<i64: 1, 32>}, {pipeline_mode = #tpu.pipeline_mode<synchronous>, transform_indices = @transform_2, window_bounds = array<i64: 1, 32>}, {pipeline_mode = #tpu.pipeline_mode<synchronous>, transform_indices = @transform_3, window_bounds = array<i64: 32, 96>}, {pipeline_mode = #tpu.pipeline_mode<synchronous>, transform_indices = @transform_4, window_bounds = array<i64: 32, 32>}, {pipeline_mode = #tpu.pipeline_mode<synchronous>, transform_indices = @transform_5, window_bounds = array<i64: 1, 32>}, {pipeline_mode = #tpu.pipeline_mode<synchronous>, transform_indices = @transform_6, window_bounds = array<i64: 1, 32>}, {pipeline_mode = #tpu.pipeline_mode<synchronous>, transform_indices = @transform_7, window_bounds = array<i64: 1, 32>}, {pipeline_mode = #tpu.pipeline_mode<synchronous>, transform_indices = @transform_8, window_bounds = array<i64: 32, 64>}, {pipeline_mode = #tpu.pipeline_mode<synchronous>, transform_indices = @transform_9, window_bounds = array<i64: 1, 64>}, {pipeline_mode = #tpu.pipeline_mode<synchronous>, transform_indices = @transform_10, window_bounds = array<i64: 64, 32>}, {pipeline_mode = #tpu.pipeline_mode<synchronous>, transform_indices = @transform_11, window_bounds = array<i64: 1, 32>}, {transform_indices = @transform_12, window_bounds = array<i64: 1, 8, 32>}]} {
    %c0 = arith.constant 0 : index
    %c0_0 = arith.constant 0 : index
    %c0_1 = arith.constant 0 : index
    %0 = vector.load %arg1[%c0, %c0_0, %c0_1] : memref<1x8x32xf32, #tpu.memory_space<vmem>>, vector<1x8x32xf32>
    %1 = vector.shape_cast %0 : vector<1x8x32xf32> to vector<8x32xf32>
    %c0_2 = arith.constant 0 : index
    %c0_3 = arith.constant 0 : index
    %2 = vector.load %arg2[%c0_2, %c0_3] : memref<1x32xf32, #tpu.memory_space<vmem>>, vector<1x32xf32>
    %3 = vector.shape_cast %2 : vector<1x32xf32> to vector<32xf32>
    %c0_4 = arith.constant 0 : index
    %c0_5 = arith.constant 0 : index
    %4 = vector.load %arg3[%c0_4, %c0_5] : memref<1x32xf32, #tpu.memory_space<vmem>>, vector<1x32xf32>
    %5 = vector.shape_cast %4 : vector<1x32xf32> to vector<32xf32>
    %cst = arith.constant dense<0.000000e+00> : vector<8xf32>
    %6 = vector.multi_reduction <add>, %1, %cst [1] : vector<8x32xf32> to vector<8xf32>
    %7 = vector.shape_cast %6 : vector<8xf32> to vector<8x1xf32>
    %cst_6 = arith.constant 3.200000e+01 : f32
    %8 = vector.broadcast %cst_6 : f32 to vector<8x1xf32>
    %9 = arith.divf %7, %8 : vector<8x1xf32>
    %10 = vector.broadcast %9 : vector<8x1xf32> to vector<8x32xf32>
    %11 = arith.subf %1, %10 : vector<8x32xf32>
    %12 = arith.mulf %11, %11 : vector<8x32xf32>
    %cst_7 = arith.constant dense<0.000000e+00> : vector<8xf32>
    %13 = vector.multi_reduction <add>, %12, %cst_7 [1] : vector<8x32xf32> to vector<8xf32>
    %14 = vector.shape_cast %13 : vector<8xf32> to vector<8x1xf32>
    %cst_8 = arith.constant 3.200000e+01 : f32
    %15 = vector.broadcast %cst_8 : f32 to vector<8x1xf32>
    %16 = arith.divf %14, %15 : vector<8x1xf32>
    %17 = vector.broadcast %9 : vector<8x1xf32> to vector<8x32xf32>
    %18 = arith.subf %1, %17 : vector<8x32xf32>
    %cst_9 = arith.constant 9.99999974E-6 : f32
    %19 = vector.broadcast %cst_9 : f32 to vector<8x1xf32>
    %20 = arith.addf %16, %19 : vector<8x1xf32>
    %21 = math.rsqrt %20 : vector<8x1xf32>
    %22 = vector.broadcast %21 : vector<8x1xf32> to vector<8x32xf32>
    %23 = arith.mulf %18, %22 : vector<8x32xf32>
    %24 = vector.shape_cast %3 : vector<32xf32> to vector<1x32xf32>
    %25 = vector.broadcast %24 : vector<1x32xf32> to vector<8x32xf32>
    %26 = arith.mulf %23, %25 : vector<8x32xf32>
    %27 = vector.shape_cast %5 : vector<32xf32> to vector<1x32xf32>
    %28 = vector.broadcast %27 : vector<1x32xf32> to vector<8x32xf32>
    %29 = arith.addf %26, %28 : vector<8x32xf32>
    %30 = arith.truncf %29 : vector<8x32xf32> to vector<8x32xbf16>
    %c0_10 = arith.constant 0 : index
    %c0_11 = arith.constant 0 : index
    %31 = vector.load %arg4[%c0_10, %c0_11] : memref<32x96xbf16, #tpu.memory_space<vmem>>, vector<32x96xbf16>
    %cst_12 = arith.constant dense<0.000000e+00> : vector<8x96xf32>
    %32 = tpu.matmul %30, %31, %cst_12 {dimension_numbers = #tpu.dot_dimension_numbers<[1], [0], [0], [1], [0, 0, 1, 1], [], []>} : vector<8x32xbf16>, vector<32x96xbf16>, vector<8x96xf32> -> vector<8x96xf32>
    %33 = arith.truncf %32 : vector<8x96xf32> to vector<8x96xbf16>
    %34 = vector.extract_strided_slice %33 {offsets = [0, 0], sizes = [8, 8], strides = [1, 1]} : vector<8x96xbf16> to vector<8x8xbf16>
    %35 = vector.extract_strided_slice %33 {offsets = [0, 8], sizes = [8, 8], strides = [1, 1]} : vector<8x96xbf16> to vector<8x8xbf16>
    %36 = vector.extract_strided_slice %33 {offsets = [0, 16], sizes = [8, 8], strides = [1, 1]} : vector<8x96xbf16> to vector<8x8xbf16>
    %37 = vector.extract_strided_slice %33 {offsets = [0, 24], sizes = [8, 8], strides = [1, 1]} : vector<8x96xbf16> to vector<8x8xbf16>
    %38 = vector.shape_cast %34 : vector<8x8xbf16> to vector<1x8x8xbf16>
    %39 = vector.shape_cast %35 : vector<8x8xbf16> to vector<1x8x8xbf16>
    %40 = vector.shape_cast %36 : vector<8x8xbf16> to vector<1x8x8xbf16>
    %41 = vector.shape_cast %37 : vector<8x8xbf16> to vector<1x8x8xbf16>
    %42 = tpu.concatenate %38, %39, %40, %41 in 0 : vector<1x8x8xbf16>, vector<1x8x8xbf16>, vector<1x8x8xbf16>, vector<1x8x8xbf16> -> vector<4x8x8xbf16>
    %43 = vector.extract_strided_slice %33 {offsets = [0, 32], sizes = [8, 8], strides = [1, 1]} : vector<8x96xbf16> to vector<8x8xbf16>
    %44 = vector.extract_strided_slice %33 {offsets = [0, 40], sizes = [8, 8], strides = [1, 1]} : vector<8x96xbf16> to vector<8x8xbf16>
    %45 = vector.extract_strided_slice %33 {offsets = [0, 48], sizes = [8, 8], strides = [1, 1]} : vector<8x96xbf16> to vector<8x8xbf16>
    %46 = vector.extract_strided_slice %33 {offsets = [0, 56], sizes = [8, 8], strides = [1, 1]} : vector<8x96xbf16> to vector<8x8xbf16>
    %47 = vector.shape_cast %43 : vector<8x8xbf16> to vector<1x8x8xbf16>
    %48 = vector.shape_cast %44 : vector<8x8xbf16> to vector<1x8x8xbf16>
    %49 = vector.shape_cast %45 : vector<8x8xbf16> to vector<1x8x8xbf16>
    %50 = vector.shape_cast %46 : vector<8x8xbf16> to vector<1x8x8xbf16>
    %51 = tpu.concatenate %47, %48, %49, %50 in 0 : vector<1x8x8xbf16>, vector<1x8x8xbf16>, vector<1x8x8xbf16>, vector<1x8x8xbf16> -> vector<4x8x8xbf16>
    %52 = vector.extract_strided_slice %33 {offsets = [0, 64], sizes = [8, 8], strides = [1, 1]} : vector<8x96xbf16> to vector<8x8xbf16>
    %53 = vector.extract_strided_slice %33 {offsets = [0, 72], sizes = [8, 8], strides = [1, 1]} : vector<8x96xbf16> to vector<8x8xbf16>
    %54 = vector.extract_strided_slice %33 {offsets = [0, 80], sizes = [8, 8], strides = [1, 1]} : vector<8x96xbf16> to vector<8x8xbf16>
    %55 = vector.extract_strided_slice %33 {offsets = [0, 88], sizes = [8, 8], strides = [1, 1]} : vector<8x96xbf16> to vector<8x8xbf16>
    %56 = vector.shape_cast %52 : vector<8x8xbf16> to vector<1x8x8xbf16>
    %57 = vector.shape_cast %53 : vector<8x8xbf16> to vector<1x8x8xbf16>
    %58 = vector.shape_cast %54 : vector<8x8xbf16> to vector<1x8x8xbf16>
    %59 = vector.shape_cast %55 : vector<8x8xbf16> to vector<1x8x8xbf16>
    %60 = tpu.concatenate %56, %57, %58, %59 in 0 : vector<1x8x8xbf16>, vector<1x8x8xbf16>, vector<1x8x8xbf16>, vector<1x8x8xbf16> -> vector<4x8x8xbf16>
    "tpu.trace_start"() <{level = 10 : i32, message = "hnd,hmd->hnm"}> : () -> ()
    %cst_13 = arith.constant dense<0.000000e+00> : vector<4x8x8xf32>
    %61 = tpu.matmul %42, %51, %cst_13 {dimension_numbers = #tpu.dot_dimension_numbers<[2], [2], [1], [1], [0, 0, 0, 1, 1, 1], [0], [0]>} : vector<4x8x8xbf16>, vector<4x8x8xbf16>, vector<4x8x8xf32> -> vector<4x8x8xf32>
    "tpu.trace_stop"() : () -> ()
    %cst_14 = arith.constant dense<0xFF800000> : vector<4x8xf32>
    %62 = vector.multi_reduction <maximumf>, %61, %cst_14 [2] : vector<4x8x8xf32> to vector<4x8xf32>
    %63 = vector.shape_cast %62 : vector<4x8xf32> to vector<4x8x1xf32>
    %64 = vector.broadcast %63 : vector<4x8x1xf32> to vector<4x8x8xf32>
    %65 = arith.subf %61, %64 : vector<4x8x8xf32>
    %66 = math.exp %65 : vector<4x8x8xf32>
    %cst_15 = arith.constant dense<0.000000e+00> : vector<4x8xf32>
    %67 = vector.multi_reduction <add>, %66, %cst_15 [2] : vector<4x8x8xf32> to vector<4x8xf32>
    %68 = vector.shape_cast %67 : vector<4x8xf32> to vector<4x8x1xf32>
    %69 = tpu.reciprocal %68 {approx = true} : vector<4x8x1xf32> -> vector<4x8x1xf32>
    %70 = vector.broadcast %69 : vector<4x8x1xf32> to vector<4x8x8xf32>
    %71 = arith.mulf %66, %70 : vector<4x8x8xf32>
    %72 = arith.truncf %71 : vector<4x8x8xf32> to vector<4x8x8xbf16>
    "tpu.trace_start"() <{level = 10 : i32, message = "hnm,hmd->hnd"}> : () -> ()
    %cst_16 = arith.constant dense<0.000000e+00> : vector<4x8x8xf32>
    %73 = tpu.matmul %72, %60, %cst_16 {dimension_numbers = #tpu.dot_dimension_numbers<[2], [1], [1], [2], [0, 0, 0, 1, 1, 2], [0], [0]>} : vector<4x8x8xbf16>, vector<4x8x8xbf16>, vector<4x8x8xf32> -> vector<4x8x8xf32>
    "tpu.trace_stop"() : () -> ()
    %74 = arith.truncf %73 : vector<4x8x8xf32> to vector<4x8x8xbf16>
    %75 = vector.extract_strided_slice %74 {offsets = [0, 0, 0], sizes = [1, 8, 8], strides = [1, 1, 1]} : vector<4x8x8xbf16> to vector<1x8x8xbf16>
    %76 = vector.shape_cast %75 : vector<1x8x8xbf16> to vector<8x8xbf16>
    %77 = vector.extract_strided_slice %74 {offsets = [1, 0, 0], sizes = [1, 8, 8], strides = [1, 1, 1]} : vector<4x8x8xbf16> to vector<1x8x8xbf16>
    %78 = vector.shape_cast %77 : vector<1x8x8xbf16> to vector<8x8xbf16>
    %79 = vector.extract_strided_slice %74 {offsets = [2, 0, 0], sizes = [1, 8, 8], strides = [1, 1, 1]} : vector<4x8x8xbf16> to vector<1x8x8xbf16>
    %80 = vector.shape_cast %79 : vector<1x8x8xbf16> to vector<8x8xbf16>
    %81 = vector.extract_strided_slice %74 {offsets = [3, 0, 0], sizes = [1, 8, 8], strides = [1, 1, 1]} : vector<4x8x8xbf16> to vector<1x8x8xbf16>
    %82 = vector.shape_cast %81 : vector<1x8x8xbf16> to vector<8x8xbf16>
    %83 = tpu.concatenate %76, %78, %80, %82 in 1 : vector<8x8xbf16>, vector<8x8xbf16>, vector<8x8xbf16>, vector<8x8xbf16> -> vector<8x32xbf16>
    %c0_17 = arith.constant 0 : index
    %c0_18 = arith.constant 0 : index
    %84 = vector.load %arg5[%c0_17, %c0_18] : memref<32x32xbf16, #tpu.memory_space<vmem>>, vector<32x32xbf16>
    %cst_19 = arith.constant dense<0.000000e+00> : vector<8x32xf32>
    %85 = tpu.matmul %83, %84, %cst_19 {dimension_numbers = #tpu.dot_dimension_numbers<[1], [0], [0], [1], [0, 0, 1, 1], [], []>} : vector<8x32xbf16>, vector<32x32xbf16>, vector<8x32xf32> -> vector<8x32xf32>
    %86 = arith.addf %1, %85 : vector<8x32xf32>
    %c0_20 = arith.constant 0 : index
    %c0_21 = arith.constant 0 : index
    %87 = vector.load %arg6[%c0_20, %c0_21] : memref<1x32xf32, #tpu.memory_space<vmem>>, vector<1x32xf32>
    %88 = vector.shape_cast %87 : vector<1x32xf32> to vector<32xf32>
    %89 = vector.shape_cast %88 : vector<32xf32> to vector<1x32xf32>
    %90 = vector.broadcast %89 : vector<1x32xf32> to vector<8x32xf32>
    %91 = arith.addf %86, %90 : vector<8x32xf32>
    %c0_22 = arith.constant 0 : index
    %c0_23 = arith.constant 0 : index
    %92 = vector.load %arg7[%c0_22, %c0_23] : memref<1x32xf32, #tpu.memory_space<vmem>>, vector<1x32xf32>
    %93 = vector.shape_cast %92 : vector<1x32xf32> to vector<32xf32>
    %c0_24 = arith.constant 0 : index
    %c0_25 = arith.constant 0 : index
    %94 = vector.load %arg8[%c0_24, %c0_25] : memref<1x32xf32, #tpu.memory_space<vmem>>, vector<1x32xf32>
    %95 = vector.shape_cast %94 : vector<1x32xf32> to vector<32xf32>
    %cst_26 = arith.constant dense<0.000000e+00> : vector<8xf32>
    %96 = vector.multi_reduction <add>, %91, %cst_26 [1] : vector<8x32xf32> to vector<8xf32>
    %97 = vector.shape_cast %96 : vector<8xf32> to vector<8x1xf32>
    %cst_27 = arith.constant 3.200000e+01 : f32
    %98 = vector.broadcast %cst_27 : f32 to vector<8x1xf32>
    %99 = arith.divf %97, %98 : vector<8x1xf32>
    %100 = vector.broadcast %99 : vector<8x1xf32> to vector<8x32xf32>
    %101 = arith.subf %91, %100 : vector<8x32xf32>
    %102 = arith.mulf %101, %101 : vector<8x32xf32>
    %cst_28 = arith.constant dense<0.000000e+00> : vector<8xf32>
    %103 = vector.multi_reduction <add>, %102, %cst_28 [1] : vector<8x32xf32> to vector<8xf32>
    %104 = vector.shape_cast %103 : vector<8xf32> to vector<8x1xf32>
    %cst_29 = arith.constant 3.200000e+01 : f32
    %105 = vector.broadcast %cst_29 : f32 to vector<8x1xf32>
    %106 = arith.divf %104, %105 : vector<8x1xf32>
    %107 = vector.broadcast %99 : vector<8x1xf32> to vector<8x32xf32>
    %108 = arith.subf %91, %107 : vector<8x32xf32>
    %cst_30 = arith.constant 9.99999974E-6 : f32
    %109 = vector.broadcast %cst_30 : f32 to vector<8x1xf32>
    %110 = arith.addf %106, %109 : vector<8x1xf32>
    %111 = math.rsqrt %110 : vector<8x1xf32>
    %112 = vector.broadcast %111 : vector<8x1xf32> to vector<8x32xf32>
    %113 = arith.mulf %108, %112 : vector<8x32xf32>
    %114 = vector.shape_cast %93 : vector<32xf32> to vector<1x32xf32>
    %115 = vector.broadcast %114 : vector<1x32xf32> to vector<8x32xf32>
    %116 = arith.mulf %113, %115 : vector<8x32xf32>
    %117 = vector.shape_cast %95 : vector<32xf32> to vector<1x32xf32>
    %118 = vector.broadcast %117 : vector<1x32xf32> to vector<8x32xf32>
    %119 = arith.addf %116, %118 : vector<8x32xf32>
    %120 = arith.truncf %119 : vector<8x32xf32> to vector<8x32xbf16>
    %c0_31 = arith.constant 0 : index
    %c0_32 = arith.constant 0 : index
    %121 = vector.load %arg9[%c0_31, %c0_32] : memref<32x64xbf16, #tpu.memory_space<vmem>>, vector<32x64xbf16>
    %cst_33 = arith.constant dense<0.000000e+00> : vector<8x64xf32>
    %122 = tpu.matmul %120, %121, %cst_33 {dimension_numbers = #tpu.dot_dimension_numbers<[1], [0], [0], [1], [0, 0, 1, 1], [], []>} : vector<8x32xbf16>, vector<32x64xbf16>, vector<8x64xf32> -> vector<8x64xf32>
    %c0_34 = arith.constant 0 : index
    %c0_35 = arith.constant 0 : index
    %123 = vector.load %arg10[%c0_34, %c0_35] : memref<1x64xf32, #tpu.memory_space<vmem>>, vector<1x64xf32>
    %124 = vector.shape_cast %123 : vector<1x64xf32> to vector<64xf32>
    %125 = vector.shape_cast %124 : vector<64xf32> to vector<1x64xf32>
    %126 = vector.broadcast %125 : vector<1x64xf32> to vector<8x64xf32>
    %127 = arith.addf %122, %126 : vector<8x64xf32>
    %cst_36 = arith.constant 5.000000e-01 : f32
    %128 = vector.broadcast %cst_36 : f32 to vector<8x64xf32>
    %129 = arith.mulf %128, %127 : vector<8x64xf32>
    %cst_37 = arith.constant 0.707106769 : f32
    %130 = vector.broadcast %cst_37 : f32 to vector<8x64xf32>
    %131 = arith.mulf %127, %130 : vector<8x64xf32>
    %132 = math.erf %131 : vector<8x64xf32>
    %cst_38 = arith.constant 1.000000e+00 : f32
    %133 = vector.broadcast %cst_38 : f32 to vector<8x64xf32>
    %134 = arith.addf %133, %132 : vector<8x64xf32>
    %135 = arith.mulf %129, %134 : vector<8x64xf32>
    %136 = arith.truncf %135 : vector<8x64xf32> to vector<8x64xbf16>
    %c0_39 = arith.constant 0 : index
    %c0_40 = arith.constant 0 : index
    %137 = vector.load %arg11[%c0_39, %c0_40] : memref<64x32xbf16, #tpu.memory_space<vmem>>, vector<64x32xbf16>
    %cst_41 = arith.constant dense<0.000000e+00> : vector<8x32xf32>
    %138 = tpu.matmul %136, %137, %cst_41 {dimension_numbers = #tpu.dot_dimension_numbers<[1], [0], [0], [1], [0, 0, 1, 1], [], []>} : vector<8x64xbf16>, vector<64x32xbf16>, vector<8x32xf32> -> vector<8x32xf32>
    %c0_42 = arith.constant 0 : index
    %c0_43 = arith.constant 0 : index
    %139 = vector.load %arg12[%c0_42, %c0_43] : memref<1x32xf32, #tpu.memory_space<vmem>>, vector<1x32xf32>
    %140 = vector.shape_cast %139 : vector<1x32xf32> to vector<32xf32>
    %141 = vector.shape_cast %140 : vector<32xf32> to vector<1x32xf32>
    %142 = vector.broadcast %141 : vector<1x32xf32> to vector<8x32xf32>
    %143 = arith.addf %138, %142 : vector<8x32xf32>
    %144 = arith.addf %91, %143 : vector<8x32xf32>
    %c0_44 = arith.constant 0 : index
    %c0_45 = arith.constant 0 : index
    %c0_46 = arith.constant 0 : index
    %145 = vector.load %arg13[%c0_44, %c0_45, %c0_46] : memref<1x8x32xf32, #tpu.memory_space<vmem>>, vector<1x8x32xf32>
    %146 = vector.shape_cast %145 : vector<1x8x32xf32> to vector<8x32xf32>
    %147 = vector.shape_cast %144 : vector<8x32xf32> to vector<1x8x32xf32>
    tpu.vector_store %arg13[%c0_44, %c0_45, %c0_46], %147 {strides = array<i32>} : memref<1x8x32xf32, #tpu.memory_space<vmem>>, vector<1x8x32xf32>,
    return
  }
  func.func @transform_0(%arg0: i32) -> (i32, i32, i32) {
    %c0_i32 = arith.constant 0 : i32
    %c0_i32_0 = arith.constant 0 : i32
    %c0_i32_1 = arith.constant 0 : i32
    return %arg0, %c0_i32, %c0_i32_0 : i32, i32, i32
  }
  func.func @transform_1(%arg0: i32) -> (i32, i32) {
    %c0_i32 = arith.constant 0 : i32
    %c0_i32_0 = arith.constant 0 : i32
    %c0_i32_1 = arith.constant 0 : i32
    return %c0_i32, %c0_i32_0 : i32, i32
  }
  func.func @transform_2(%arg0: i32) -> (i32, i32) {
    %c0_i32 = arith.constant 0 : i32
    %c0_i32_0 = arith.constant 0 : i32
    %c0_i32_1 = arith.constant 0 : i32
    return %c0_i32, %c0_i32_0 : i32, i32
  }
  func.func @transform_3(%arg0: i32) -> (i32, i32) {
    %c0_i32 = arith.constant 0 : i32
    %c0_i32_0 = arith.constant 0 : i32
    %c0_i32_1 = arith.constant 0 : i32
    return %c0_i32, %c0_i32_0 : i32, i32
  }
  func.func @transform_4(%arg0: i32) -> (i32, i32) {
    %c0_i32 = arith.constant 0 : i32
    %c0_i32_0 = arith.constant 0 : i32
    %c0_i32_1 = arith.constant 0 : i32
    return %c0_i32, %c0_i32_0 : i32, i32
  }
  func.func @transform_5(%arg0: i32) -> (i32, i32) {
    %c0_i32 = arith.constant 0 : i32
    %c0_i32_0 = arith.constant 0 : i32
    %c0_i32_1 = arith.constant 0 : i32
    return %c0_i32, %c0_i32_0 : i32, i32
  }
  func.func @transform_6(%arg0: i32) -> (i32, i32) {
    %c0_i32 = arith.constant 0 : i32
    %c0_i32_0 = arith.constant 0 : i32
    %c0_i32_1 = arith.constant 0 : i32
    return %c0_i32, %c0_i32_0 : i32, i32
  }
  func.func @transform_7(%arg0: i32) -> (i32, i32) {
    %c0_i32 = arith.constant 0 : i32
    %c0_i32_0 = arith.constant 0 : i32
    %c0_i32_1 = arith.constant 0 : i32
    return %c0_i32, %c0_i32_0 : i32, i32
  }
  func.func @transform_8(%arg0: i32) -> (i32, i32) {
    %c0_i32 = arith.constant 0 : i32
    %c0_i32_0 = arith.constant 0 : i32
    %c0_i32_1 = arith.constant 0 : i32
    return %c0_i32, %c0_i32_0 : i32, i32
  }
  func.func @transform_9(%arg0: i32) -> (i32, i32) {
    %c0_i32 = arith.constant 0 : i32
    %c0_i32_0 = arith.constant 0 : i32
    %c0_i32_1 = arith.constant 0 : i32
    return %c0_i32, %c0_i32_0 : i32, i32
  }
  func.func @transform_10(%arg0: i32) -> (i32, i32) {
    %c0_i32 = arith.constant 0 : i32
    %c0_i32_0 = arith.constant 0 : i32
    %c0_i32_1 = arith.constant 0 : i32
    return %c0_i32, %c0_i32_0 : i32, i32
  }
  func.func @transform_11(%arg0: i32) -> (i32, i32) {
    %c0_i32 = arith.constant 0 : i32
    %c0_i32_0 = arith.constant 0 : i32
    %c0_i32_1 = arith.constant 0 : i32
    return %c0_i32, %c0_i32_0 : i32, i32
  }
  func.func @transform_12(%arg0: i32) -> (i32, i32, i32) {
    %c0_i32 = arith.constant 0 : i32
    %c0_i32_0 = arith.constant 0 : i32
    %c0_i32_1 = arith.constant 0 : i32
    return %arg0, %c0_i32, %c0_i32_0 : i32, i32, i32
  }
}

module attributes {stable_mosaic.version = 11 : i64} {
  func.func @layer_kernel(%arg0: i32, %arg1: memref<1x8x32xf32, #tpu.memory_space<vmem>>, %arg2: memref<1x32xf32, #tpu.memory_space<vmem>>, %arg3: memref<1x32xf32, #tpu.memory_space<vmem>>, %arg4: memref<32x96xbf16, #tpu.memory_space<vmem>>, %arg5: memref<32x32xbf16, #tpu.memory_space<vmem>>, %arg6: memref<1x32xf32, #tpu.memory_space<vmem>>, %arg7: memref<1x32xf32, #tpu.memory_space<vmem>>, %arg8: memref<1x32xf32, #tpu.memory_space<vmem>>, %arg9: memref<32x64xbf16, #tpu.memory_space<vmem>>, %arg10: memref<1x64xf32, #tpu.memory_space<vmem>>, %arg11: memref<64x32xbf16, #tpu.memory_space<vmem>>, %arg12: memref<1x32xf32, #tpu.memory_space<vmem>>, %arg13: memref<1x8x32xf32, #tpu.memory_space<vmem>>) attributes {dimension_semantics = [#tpu.dimension_semantics<parallel>], iteration_bounds = array<i64: 2>, scalar_prefetch = 0 : i64, scratch_operands = 0 : i64, tpu.core_type = #tpu.core_type<tc>, window_params = [{transform_indices = @transform_0, window_bounds = array<i64: 1, 8, 32>}, {pipeline_mode = #tpu.pipeline_mode<synchronous>, transform_indices = @transform_1, window_bounds = array<i64: 1, 32>}, {pipeline_mode = #tpu.pipeline_mode<synchronous>, transform_indices = @transform_2, window_bounds = array<i64: 1, 32>}, {pipeline_mode = #tpu.pipeline_mode<synchronous>, transform_indices = @transform_3, window_bounds = array<i64: 32, 96>}, {pipeline_mode = #tpu.pipeline_mode<synchronous>, transform_indices = @transform_4, window_bounds = array<i64: 32, 32>}, {pipeline_mode = #tpu.pipeline_mode<synchronous>, transform_indices = @transform_5, window_bounds = array<i64: 1, 32>}, {pipeline_mode = #tpu.pipeline_mode<synchronous>, transform_indices = @transform_6, window_bounds = array<i64: 1, 32>}, {pipeline_mode = #tpu.pipeline_mode<synchronous>, transform_indices = @transform_7, window_bounds = array<i64: 1, 32>}, {pipeline_mode = #tpu.pipeline_mode<synchronous>, transform_indices = @transform_8, window_bounds = array<i64: 32, 64>}, {pipeline_mode = #tpu.pipeline_mode<synchronous>, transform_indices = @transform_9, window_bounds = array<i64: 1, 64>}, {pipeline_mode = #tpu.pipeline_mode<synchronous>, transform_indices = @transform_10, window_bounds = array<i64: 64, 32>}, {pipeline_mode = #tpu.pipeline_mode<synchronous>, transform_indices = @transform_11, window_bounds = array<i64: 1, 32>}, {transform_indices = @transform_12, window_bounds = array<i64: 1, 8, 32>}]} {
    %c0 = arith.constant 0 : index
    %c0_0 = arith.constant 0 : index
    %c0_1 = arith.constant 0 : index
    %0 = vector.load %arg1[%c0, %c0_0, %c0_1] : memref<1x8x32xf32, #tpu.memory_space<vmem>>, vector<1x8x32xf32>
    %1 = vector.shape_cast %0 : vector<1x8x32xf32> to vector<8x32xf32>
    %c0_2 = arith.constant 0 : index
    %c0_3 = arith.constant 0 : index
    %2 = vector.load %arg2[%c0_2, %c0_3] : memref<1x32xf32, #tpu.memory_space<vmem>>, vector<1x32xf32>
    %3 = vector.shape_cast %2 : vector<1x32xf32> to vector<32xf32>
    %c0_4 = arith.constant 0 : index
    %c0_5 = arith.constant 0 : index
    %4 = vector.load %arg3[%c0_4, %c0_5] : memref<1x32xf32, #tpu.memory_space<vmem>>, vector<1x32xf32>
    %5 = vector.shape_cast %4 : vector<1x32xf32> to vector<32xf32>
    %cst = arith.constant dense<0.000000e+00> : vector<8xf32>
    %6 = vector.multi_reduction <add>, %1, %cst [1] : vector<8x32xf32> to vector<8xf32>
    %7 = vector.shape_cast %6 : vector<8xf32> to vector<8x1xf32>
    %cst_6 = arith.constant 3.200000e+01 : f32
    %8 = vector.broadcast %cst_6 : f32 to vector<8x1xf32>
    %9 = arith.divf %7, %8 : vector<8x1xf32>
    %10 = vector.broadcast %9 : vector<8x1xf32> to vector<8x32xf32>
    %11 = arith.subf %1, %10 : vector<8x32xf32>
    %12 = arith.mulf %11, %11 : vector<8x32xf32>
    %cst_7 = arith.constant dense<0.000000e+00> : vector<8xf32>
    %13 = vector.multi_reduction <add>, %12, %cst_7 [1] : vector<8x32xf32> to vector<8xf32>
    %14 = vector.shape_cast %13 : vector<8xf32> to vector<8x1xf32>
    %cst_8 = arith.constant 3.200000e+01 : f32
    %15 = vector.broadcast %cst_8 : f32 to vector<8x1xf32>
    %16 = arith.divf %14, %15 : vector<8x1xf32>
    %17 = vector.broadcast %9 : vector<8x1xf32> to vector<8x32xf32>
    %18 = arith.subf %1, %17 : vector<8x32xf32>
    %cst_9 = arith.constant 9.99999974E-6 : f32
    %19 = vector.broadcast %cst_9 : f32 to vector<8x1xf32>
    %20 = arith.addf %16, %19 : vector<8x1xf32>
    %21 = math.rsqrt %20 : vector<8x1xf32>
    %22 = vector.broadcast %21 : vector<8x1xf32> to vector<8x32xf32>
    %23 = arith.mulf %18, %22 : vector<8x32xf32>
    %24 = vector.shape_cast %3 : vector<32xf32> to vector<1x32xf32>
    %25 = vector.broadcast %24 : vector<1x32xf32> to vector<8x32xf32>
    %26 = arith.mulf %23, %25 : vector<8x32xf32>
    %27 = vector.shape_cast %5 : vector<32xf32> to vector<1x32xf32>
    %28 = vector.broadcast %27 : vector<1x32xf32> to vector<8x32xf32>
    %29 = arith.addf %26, %28 : vector<8x32xf32>
    %30 = arith.truncf %29 : vector<8x32xf32> to vector<8x32xbf16>
    %c0_10 = arith.constant 0 : index
    %c0_11 = arith.constant 0 : index
    %31 = vector.load %arg4[%c0_10, %c0_11] : memref<32x96xbf16, #tpu.memory_space<vmem>>, vector<32x96xbf16>
    %cst_12 = arith.constant dense<0.000000e+00> : vector<8x96xf32>
    %32 = tpu.matmul %30, %31, %cst_12 {dimension_numbers = #tpu.dot_dimension_numbers<[1], [0], [0], [1], [0, 0, 1, 1], [], []>} : vector<8x32xbf16>, vector<32x96xbf16>, vector<8x96xf32> -> vector<8x96xf32>
    %33 = arith.truncf %32 : vector<8x96xf32> to vector<8x96xbf16>
    %34 = vector.extract_strided_slice %33 {offsets = [0, 0], sizes = [8, 8], strides = [1, 1]} : vector<8x96xbf16> to vector<8x8xbf16>
    %35 = vector.extract_strided_slice %33 {offsets = [0, 8], sizes = [8, 8], strides = [1, 1]} : vector<8x96xbf16> to vector<8x8xbf16>
    %36 = vector.extract_strided_slice %33 {offsets = [0, 16], sizes = [8, 8], strides = [1, 1]} : vector<8x96xbf16> to vector<8x8xbf16>
    %37 = vector.extract_strided_slice %33 {offsets = [0, 24], sizes = [8, 8], strides = [1, 1]} : vector<8x96xbf16> to vector<8x8xbf16>
    %38 = vector.shape_cast %34 : vector<8x8xbf16> to vector<1x8x8xbf16>
    %39 = vector.shape_cast %35 : vector<8x8xbf16> to vector<1x8x8xbf16>
    %40 = vector.shape_cast %36 : vector<8x8xbf16> to vector<1x8x8xbf16>
    %41 = vector.shape_cast %37 : vector<8x8xbf16> to vector<1x8x8xbf16>
    %42 = tpu.concatenate %38, %39, %40, %41 in 0 : vector<1x8x8xbf16>, vector<1x8x8xbf16>, vector<1x8x8xbf16>, vector<1x8x8xbf16> -> vector<4x8x8xbf16>
    %43 = vector.extract_strided_slice %33 {offsets = [0, 32], sizes = [8, 8], strides = [1, 1]} : vector<8x96xbf16> to vector<8x8xbf16>
    %44 = vector.extract_strided_slice %33 {offsets = [0, 40], sizes = [8, 8], strides = [1, 1]} : vector<8x96xbf16> to vector<8x8xbf16>
    %45 = vector.extract_strided_slice %33 {offsets = [0, 48], sizes = [8, 8], strides = [1, 1]} : vector<8x96xbf16> to vector<8x8xbf16>
    %46 = vector.extract_strided_slice %33 {offsets = [0, 56], sizes = [8, 8], strides = [1, 1]} : vector<8x96xbf16> to vector<8x8xbf16>
    %47 = vector.shape_cast %43 : vector<8x8xbf16> to vector<1x8x8xbf16>
    %48 = vector.shape_cast %44 : vector<8x8xbf16> to vector<1x8x8xbf16>
    %49 = vector.shape_cast %45 : vector<8x8xbf16> to vector<1x8x8xbf16>
    %50 = vector.shape_cast %46 : vector<8x8xbf16> to vector<1x8x8xbf16>
    %51 = tpu.concatenate %47, %48, %49, %50 in 0 : vector<1x8x8xbf16>, vector<1x8x8xbf16>, vector<1x8x8xbf16>, vector<1x8x8xbf16> -> vector<4x8x8xbf16>
    %52 = vector.extract_strided_slice %33 {offsets = [0, 64], sizes = [8, 8], strides = [1, 1]} : vector<8x96xbf16> to vector<8x8xbf16>
    %53 = vector.extract_strided_slice %33 {offsets = [0, 72], sizes = [8, 8], strides = [1, 1]} : vector<8x96xbf16> to vector<8x8xbf16>
    %54 = vector.extract_strided_slice %33 {offsets = [0, 80], sizes = [8, 8], strides = [1, 1]} : vector<8x96xbf16> to vector<8x8xbf16>
    %55 = vector.extract_strided_slice %33 {offsets = [0, 88], sizes = [8, 8], strides = [1, 1]} : vector<8x96xbf16> to vector<8x8xbf16>
    %56 = vector.shape_cast %52 : vector<8x8xbf16> to vector<1x8x8xbf16>
    %57 = vector.shape_cast %53 : vector<8x8xbf16> to vector<1x8x8xbf16>
    %58 = vector.shape_cast %54 : vector<8x8xbf16> to vector<1x8x8xbf16>
    %59 = vector.shape_cast %55 : vector<8x8xbf16> to vector<1x8x8xbf16>
    %60 = tpu.concatenate %56, %57, %58, %59 in 0 : vector<1x8x8xbf16>, vector<1x8x8xbf16>, vector<1x8x8xbf16>, vector<1x8x8xbf16> -> vector<4x8x8xbf16>
    "tpu.trace_start"() <{level = 10 : i32, message = "hnd,hmd->hnm"}> : () -> ()
    %cst_13 = arith.constant dense<0.000000e+00> : vector<4x8x8xf32>
    %61 = tpu.matmul %42, %51, %cst_13 {dimension_numbers = #tpu.dot_dimension_numbers<[2], [2], [1], [1], [0, 0, 0, 1, 1, 1], [0], [0]>} : vector<4x8x8xbf16>, vector<4x8x8xbf16>, vector<4x8x8xf32> -> vector<4x8x8xf32>
    "tpu.trace_stop"() : () -> ()
    %cst_14 = arith.constant dense<0xFF800000> : vector<4x8xf32>
    %62 = vector.multi_reduction <maximumf>, %61, %cst_14 [2] : vector<4x8x8xf32> to vector<4x8xf32>
    %63 = vector.shape_cast %62 : vector<4x8xf32> to vector<4x8x1xf32>
    %64 = vector.broadcast %63 : vector<4x8x1xf32> to vector<4x8x8xf32>
    %65 = arith.subf %61, %64 : vector<4x8x8xf32>
    %66 = math.exp %65 : vector<4x8x8xf32>
    %cst_15 = arith.constant dense<0.000000e+00> : vector<4x8xf32>
    %67 = vector.multi_reduction <add>, %66, %cst_15 [2] : vector<4x8x8xf32> to vector<4x8xf32>
    %68 = vector.shape_cast %67 : vector<4x8xf32> to vector<4x8x1xf32>
    %69 = tpu.reciprocal %68 {approx = true} : vector<4x8x1xf32> -> vector<4x8x1xf32>
    %70 = vector.broadcast %69 : vector<4x8x1xf32> to vector<4x8x8xf32>
    %71 = arith.mulf %66, %70 : vector<4x8x8xf32>
    %72 = arith.truncf %71 : vector<4x8x8xf32> to vector<4x8x8xbf16>
    "tpu.trace_start"() <{level = 10 : i32, message = "hnm,hmd->hnd"}> : () -> ()
    %cst_16 = arith.constant dense<0.000000e+00> : vector<4x8x8xf32>
    %73 = tpu.matmul %72, %60, %cst_16 {dimension_numbers = #tpu.dot_dimension_numbers<[2], [1], [1], [2], [0, 0, 0, 1, 1, 2], [0], [0]>} : vector<4x8x8xbf16>, vector<4x8x8xbf16>, vector<4x8x8xf32> -> vector<4x8x8xf32>
    "tpu.trace_stop"() : () -> ()
    %74 = arith.truncf %73 : vector<4x8x8xf32> to vector<4x8x8xbf16>
    %75 = vector.extract_strided_slice %74 {offsets = [0, 0, 0], sizes = [1, 8, 8], strides = [1, 1, 1]} : vector<4x8x8xbf16> to vector<1x8x8xbf16>
    %76 = vector.shape_cast %75 : vector<1x8x8xbf16> to vector<8x8xbf16>
    %77 = vector.extract_strided_slice %74 {offsets = [1, 0, 0], sizes = [1, 8, 8], strides = [1, 1, 1]} : vector<4x8x8xbf16> to vector<1x8x8xbf16>
    %78 = vector.shape_cast %77 : vector<1x8x8xbf16> to vector<8x8xbf16>
    %79 = vector.extract_strided_slice %74 {offsets = [2, 0, 0], sizes = [1, 8, 8], strides = [1, 1, 1]} : vector<4x8x8xbf16> to vector<1x8x8xbf16>
    %80 = vector.shape_cast %79 : vector<1x8x8xbf16> to vector<8x8xbf16>
    %81 = vector.extract_strided_slice %74 {offsets = [3, 0, 0], sizes = [1, 8, 8], strides = [1, 1, 1]} : vector<4x8x8xbf16> to vector<1x8x8xbf16>
    %82 = vector.shape_cast %81 : vector<1x8x8xbf16> to vector<8x8xbf16>
    %83 = tpu.concatenate %76, %78, %80, %82 in 1 : vector<8x8xbf16>, vector<8x8xbf16>, vector<8x8xbf16>, vector<8x8xbf16> -> vector<8x32xbf16>
    %c0_17 = arith.constant 0 : index
    %c0_18 = arith.constant 0 : index
    %84 = vector.load %arg5[%c0_17, %c0_18] : memref<32x32xbf16, #tpu.memory_space<vmem>>, vector<32x32xbf16>
    %cst_19 = arith.constant dense<0.000000e+00> : vector<8x32xf32>
    %85 = tpu.matmul %83, %84, %cst_19 {dimension_numbers = #tpu.dot_dimension_numbers<[1], [0], [0], [1], [0, 0, 1, 1], [], []>} : vector<8x32xbf16>, vector<32x32xbf16>, vector<8x32xf32> -> vector<8x32xf32>
    %86 = arith.addf %1, %85 : vector<8x32xf32>
    %c0_20 = arith.constant 0 : index
    %c0_21 = arith.constant 0 : index
    %87 = vector.load %arg6[%c0_20, %c0_21] : memref<1x32xf32, #tpu.memory_space<vmem>>, vector<1x32xf32>
    %88 = vector.shape_cast %87 : vector<1x32xf32> to vector<32xf32>
    %89 = vector.shape_cast %88 : vector<32xf32> to vector<1x32xf32>
    %90 = vector.broadcast %89 : vector<1x32xf32> to vector<8x32xf32>
    %91 = arith.addf %86, %90 : vector<8x32xf32>
    %c0_22 = arith.constant 0 : index
    %c0_23 = arith.constant 0 : index
    %92 = vector.load %arg7[%c0_22, %c0_23] : memref<1x32xf32, #tpu.memory_space<vmem>>, vector<1x32xf32>
    %93 = vector.shape_cast %92 : vector<1x32xf32> to vector<32xf32>
    %c0_24 = arith.constant 0 : index
    %c0_25 = arith.constant 0 : index
    %94 = vector.load %arg8[%c0_24, %c0_25] : memref<1x32xf32, #tpu.memory_space<vmem>>, vector<1x32xf32>
    %95 = vector.shape_cast %94 : vector<1x32xf32> to vector<32xf32>
    %cst_26 = arith.constant dense<0.000000e+00> : vector<8xf32>
    %96 = vector.multi_reduction <add>, %91, %cst_26 [1] : vector<8x32xf32> to vector<8xf32>
    %97 = vector.shape_cast %96 : vector<8xf32> to vector<8x1xf32>
    %cst_27 = arith.constant 3.200000e+01 : f32
    %98 = vector.broadcast %cst_27 : f32 to vector<8x1xf32>
    %99 = arith.divf %97, %98 : vector<8x1xf32>
    %100 = vector.broadcast %99 : vector<8x1xf32> to vector<8x32xf32>
    %101 = arith.subf %91, %100 : vector<8x32xf32>
    %102 = arith.mulf %101, %101 : vector<8x32xf32>
    %cst_28 = arith.constant dense<0.000000e+00> : vector<8xf32>
    %103 = vector.multi_reduction <add>, %102, %cst_28 [1] : vector<8x32xf32> to vector<8xf32>
    %104 = vector.shape_cast %103 : vector<8xf32> to vector<8x1xf32>
    %cst_29 = arith.constant 3.200000e+01 : f32
    %105 = vector.broadcast %cst_29 : f32 to vector<8x1xf32>
    %106 = arith.divf %104, %105 : vector<8x1xf32>
    %107 = vector.broadcast %99 : vector<8x1xf32> to vector<8x32xf32>
    %108 = arith.subf %91, %107 : vector<8x32xf32>
    %cst_30 = arith.constant 9.99999974E-6 : f32
    %109 = vector.broadcast %cst_30 : f32 to vector<8x1xf32>
    %110 = arith.addf %106, %109 : vector<8x1xf32>
    %111 = math.rsqrt %110 : vector<8x1xf32>
    %112 = vector.broadcast %111 : vector<8x1xf32> to vector<8x32xf32>
    %113 = arith.mulf %108, %112 : vector<8x32xf32>
    %114 = vector.shape_cast %93 : vector<32xf32> to vector<1x32xf32>
    %115 = vector.broadcast %114 : vector<1x32xf32> to vector<8x32xf32>
    %116 = arith.mulf %113, %115 : vector<8x32xf32>
    %117 = vector.shape_cast %95 : vector<32xf32> to vector<1x32xf32>
    %118 = vector.broadcast %117 : vector<1x32xf32> to vector<8x32xf32>
    %119 = arith.addf %116, %118 : vector<8x32xf32>
    %120 = arith.truncf %119 : vector<8x32xf32> to vector<8x32xbf16>
    %c0_31 = arith.constant 0 : index
    %c0_32 = arith.constant 0 : index
    %121 = vector.load %arg9[%c0_31, %c0_32] : memref<32x64xbf16, #tpu.memory_space<vmem>>, vector<32x64xbf16>
    %cst_33 = arith.constant dense<0.000000e+00> : vector<8x64xf32>
    %122 = tpu.matmul %120, %121, %cst_33 {dimension_numbers = #tpu.dot_dimension_numbers<[1], [0], [0], [1], [0, 0, 1, 1], [], []>} : vector<8x32xbf16>, vector<32x64xbf16>, vector<8x64xf32> -> vector<8x64xf32>
    %c0_34 = arith.constant 0 : index
    %c0_35 = arith.constant 0 : index
    %123 = vector.load %arg10[%c0_34, %c0_35] : memref<1x64xf32, #tpu.memory_space<vmem>>, vector<1x64xf32>
    %124 = vector.shape_cast %123 : vector<1x64xf32> to vector<64xf32>
    %125 = vector.shape_cast %124 : vector<64xf32> to vector<1x64xf32>
    %126 = vector.broadcast %125 : vector<1x64xf32> to vector<8x64xf32>
    %127 = arith.addf %122, %126 : vector<8x64xf32>
    %cst_36 = arith.constant 5.000000e-01 : f32
    %128 = vector.broadcast %cst_36 : f32 to vector<8x64xf32>
    %129 = arith.mulf %128, %127 : vector<8x64xf32>
    %cst_37 = arith.constant 0.707106769 : f32
    %130 = vector.broadcast %cst_37 : f32 to vector<8x64xf32>
    %131 = arith.mulf %127, %130 : vector<8x64xf32>
    %132 = math.erf %131 : vector<8x64xf32>
    %cst_38 = arith.constant 1.000000e+00 : f32
    %133 = vector.broadcast %cst_38 : f32 to vector<8x64xf32>
    %134 = arith.addf %133, %132 : vector<8x64xf32>
    %135 = arith.mulf %129, %134 : vector<8x64xf32>
    %136 = arith.truncf %135 : vector<8x64xf32> to vector<8x64xbf16>
    %c0_39 = arith.constant 0 : index
    %c0_40 = arith.constant 0 : index
    %137 = vector.load %arg11[%c0_39, %c0_40] : memref<64x32xbf16, #tpu.memory_space<vmem>>, vector<64x32xbf16>
    %cst_41 = arith.constant dense<0.000000e+00> : vector<8x32xf32>
    %138 = tpu.matmul %136, %137, %cst_41 {dimension_numbers = #tpu.dot_dimension_numbers<[1], [0], [0], [1], [0, 0, 1, 1], [], []>} : vector<8x64xbf16>, vector<64x32xbf16>, vector<8x32xf32> -> vector<8x32xf32>
    %c0_42 = arith.constant 0 : index
    %c0_43 = arith.constant 0 : index
    %139 = vector.load %arg12[%c0_42, %c0_43] : memref<1x32xf32, #tpu.memory_space<vmem>>, vector<1x32xf32>
    %140 = vector.shape_cast %139 : vector<1x32xf32> to vector<32xf32>
    %141 = vector.shape_cast %140 : vector<32xf32> to vector<1x32xf32>
    %142 = vector.broadcast %141 : vector<1x32xf32> to vector<8x32xf32>
    %143 = arith.addf %138, %142 : vector<8x32xf32>
    %144 = arith.addf %91, %143 : vector<8x32xf32>
    %c0_44 = arith.constant 0 : index
    %c0_45 = arith.constant 0 : index
    %c0_46 = arith.constant 0 : index
    %145 = vector.load %arg13[%c0_44, %c0_45, %c0_46] : memref<1x8x32xf32, #tpu.memory_space<vmem>>, vector<1x8x32xf32>
    %146 = vector.shape_cast %145 : vector<1x8x32xf32> to vector<8x32xf32>
    %147 = vector.shape_cast %144 : vector<8x32xf32> to vector<1x8x32xf32>
    tpu.vector_store %arg13[%c0_44, %c0_45, %c0_46], %147 {strides = array<i32>} : memref<1x8x32xf32, #tpu.memory_space<vmem>>, vector<1x8x32xf32>,
    return
  }
  func.func @transform_0(%arg0: i32) -> (i32, i32, i32) {
    %c0_i32 = arith.constant 0 : i32
    %c0_i32_0 = arith.constant 0 : i32
    %c0_i32_1 = arith.constant 0 : i32
    return %arg0, %c0_i32, %c0_i32_0 : i32, i32, i32
  }
  func.func @transform_1(%arg0: i32) -> (i32, i32) {
    %c0_i32 = arith.constant 0 : i32
    %c0_i32_0 = arith.constant 0 : i32
    %c0_i32_1 = arith.constant 0 : i32
    return %c0_i32, %c0_i32_0 : i32, i32
  }
  func.func @transform_2(%arg0: i32) -> (i32, i32) {
    %c0_i32 = arith.constant 0 : i32
    %c0_i32_0 = arith.constant 0 : i32
    %c0_i32_1 = arith.constant 0 : i32
    return %c0_i32, %c0_i32_0 : i32, i32
  }
  func.func @transform_3(%arg0: i32) -> (i32, i32) {
    %c0_i32 = arith.constant 0 : i32
    %c0_i32_0 = arith.constant 0 : i32
    %c0_i32_1 = arith.constant 0 : i32
    return %c0_i32, %c0_i32_0 : i32, i32
  }
  func.func @transform_4(%arg0: i32) -> (i32, i32) {
    %c0_i32 = arith.constant 0 : i32
    %c0_i32_0 = arith.constant 0 : i32
    %c0_i32_1 = arith.constant 0 : i32
    return %c0_i32, %c0_i32_0 : i32, i32
  }
  func.func @transform_5(%arg0: i32) -> (i32, i32) {
    %c0_i32 = arith.constant 0 : i32
    %c0_i32_0 = arith.constant 0 : i32
    %c0_i32_1 = arith.constant 0 : i32
    return %c0_i32, %c0_i32_0 : i32, i32
  }
  func.func @transform_6(%arg0: i32) -> (i32, i32) {
    %c0_i32 = arith.constant 0 : i32
    %c0_i32_0 = arith.constant 0 : i32
    %c0_i32_1 = arith.constant 0 : i32
    return %c0_i32, %c0_i32_0 : i32, i32
  }
  func.func @transform_7(%arg0: i32) -> (i32, i32) {
    %c0_i32 = arith.constant 0 : i32
    %c0_i32_0 = arith.constant 0 : i32
    %c0_i32_1 = arith.constant 0 : i32
    return %c0_i32, %c0_i32_0 : i32, i32
  }
  func.func @transform_8(%arg0: i32) -> (i32, i32) {
    %c0_i32 = arith.constant 0 : i32
    %c0_i32_0 = arith.constant 0 : i32
    %c0_i32_1 = arith.constant 0 : i32
    return %c0_i32, %c0_i32_0 : i32, i32
  }
  func.func @transform_9(%arg0: i32) -> (i32, i32) {
    %c0_i32 = arith.constant 0 : i32
    %c0_i32_0 = arith.constant 0 : i32
    %c0_i32_1 = arith.constant 0 : i32
    return %c0_i32, %c0_i32_0 : i32, i32
  }
  func.func @transform_10(%arg0: i32) -> (i32, i32) {
    %c0_i32 = arith.constant 0 : i32
    %c0_i32_0 = arith.constant 0 : i32
    %c0_i32_1 = arith.constant 0 : i32
    return %c0_i32, %c0_i32_0 : i32, i32
  }
  func.func @transform_11(%arg0: i32) -> (i32, i32) {
    %c0_i32 = arith.constant 0 : i32
    %c0_i32_0 = arith.constant 0 : i32
    %c0_i32_1 = arith.constant 0 : i32
    return %c0_i32, %c0_i32_0 : i32, i32
  }
  func.func @transform_12(%arg0: i32) -> (i32, i32, i32) {
    %c0_i32 = arith.constant 0 : i32
    %c0_i32_0 = arith.constant 0 : i32
    %c0_i32_1 = arith.constant 0 : i32
    return %arg0, %c0_i32, %c0_i32_0 : i32, i32, i32
  }
}

</mosaic_0001>

<bundles_post_ra>
// kernel: transformer_forward.2
= control target key start
LH: loop header
LB: loop body
LE: loop exit
PB: predicated region body
PF: predicated region fallthrough
CT: control target
= control target key end

     0   :  { %s1674_s0 = inlined_call_operand.vmem [shape: f32[2,8,32], index: 0, kind: input, shape index: {}, may-alias: {0,12}]   ;;  %s1675_s1 = inlined_call_operand.vmem [shape: f32[1,32], index: 1, kind: input, shape index: {}]   ;;  %s1676_s2 = inlined_call_operand.vmem [shape: f32[1,32], index: 2, kind: input, shape index: {}]   ;;  %s1677_s3 = inlined_call_operand.vmem [shape: bf16[32,96], index: 3, kind: input, shape index: {}]   ;;  %s1678_s4 = inlined_call_operand.vmem [shape: bf16[32,32], index: 4, kind: input, shape index: {}]   ;;  %s1679_s5 = inlined_call_operand.hbm [shape: f32[1,32], index: 5, kind: input, shape index: {}]   ;;  %s1680_s6 = inlined_call_operand.vmem [shape: f32[1,32], index: 6, kind: input, shape index: {}]   ;;  %s1681_s7 = inlined_call_operand.vmem [shape: f32[1,32], index: 7, kind: input, shape index: {}]   ;;  %s1682_s8 = inlined_call_operand.hbm [shape: bf16[32,64], index: 8, kind: input, shape index: {}]   ;;  %s1683_s9 = inlined_call_operand.hbm [shape: f32[1,64], index: 9, kind: input, shape index: {}]   ;;  %s1684_s10 = inlined_call_operand.vmem [shape: bf16[64,32], index: 10, kind: input, shape index: {}]   ;;  %s1685_s11 = inlined_call_operand.hbm [shape: f32[1,32], index: 11, kind: input, shape index: {}]   ;;  %s1686_s12 = inlined_call_operand.vmem [shape: f32[2,8,32], index: 12, kind: output, shape index: {}, may-alias: {0,12}]  }
   0x1   :  { %1687 = sst [smem:[#allocation12_spill]] %s1679_s5 }
   0x2   :  { %17 = vsyncpa [#allocation3], 0 }
   0x3   :  { %18 = vsyncpa [#allocation5], 0 }
   0x4   :  { %19 = vsyncpa [#allocation8], 0  ;;  %s1498_s21 = smov 0  }
   0x5 LB: > { %s354_s24 = sshll.u32 %s1682_s8, 4  ;;  %s1507_s25 = sadd.s32 4294967295, %s1416_s21   ;;  %s1416_s21 = sphi %s1498_s21, %s25_s21   ;;  %s355_s24 = int_to_ptr.hbm [resolvable:$true] %s354_s24 }
   0x6   : > { %p1109_p0 = scmp.ge.s32.totalorder %s1416_s21, 1  ;;  %p313_p1 = scmp.lt.s32.totalorder %s1416_s21, 3 }
   0x7   : > { %p1216_p2 = scmp.eq.s32.totalorder %s1507_s25, 0  ;;  %s1418_s27 = smov [#allocation4]  }
   0x8   : > { %p1512_p3 = pnand %p1109_p0, %p313_p1  ;;  %s356_s28 = sshll.u32 %s1418_s27, 4  ;;  %s357_s28 = int_to_ptr.vmem [resolvable:$true] %s356_s28 }
   0x9   : > { %s1689_s5 = sld [smem:[#allocation12_spill]]  ;;  %s1419_s15 = smov [#allocation2]  }
   0xa   : > { %p1203_p4 = pneg %p1512_p3  ;;  %s339_s16 = sshll.u32 %s1419_s15, 4  ;;  %s340_s16 = int_to_ptr.vmem [resolvable:$true] %s339_s16 }
   0xb   : > { %s369_s19 = sshll.u32 %s1683_s9, 4  ;;  %s1420_s20 = smov 64   ;;  %s370_s19 = int_to_ptr.hbm [resolvable:$true] %s369_s19 }
   0xc   : > { %p1523_p5 = pnand %p1216_p2, %p1203_p4  ;;  %s1421_s22 = smov 4  }
   0xd   : > { %s1422_s23 = smov [#allocation6]   ;;  %s1423_s15 = smov [#allocation7]  }
   0xe   : > { %1209 = dma.hbm_to_vmem [thread:$0]  (!%p1523_p5), %s355_s24, 256, %s357_s28, [#allocation5], %s1420_s20, %s1420_s20, %s1421_s22  }
   0xf   : > { %s337_s13 = sshll.u32 %s1689_s5, 4  ;;  %s371_s27 = sshll.u32 %s1422_s23, 4  ;;  %s338_s13 = int_to_ptr.hbm [resolvable:$true] %s337_s13  ;;  %s372_s27 = int_to_ptr.vmem [resolvable:$true] %s371_s27 }
  0x10   : > { %1206 = dma.hbm_to_vmem [thread:$0]  (!%p1523_p5), %s338_s13, 16, %s340_s16, [#allocation3]  }
  0x11   : > { %s384_s5 = sshll.u32 %s1685_s11, 4  ;;  %s386_s17 = sshll.u32 %s1423_s15, 4  ;;  %s385_s5 = int_to_ptr.hbm [resolvable:$true] %s384_s5  ;;  %s387_s17 = int_to_ptr.vmem [resolvable:$true] %s386_s17 }
  0x12   : > { %1212 = dma.hbm_to_vmem [thread:$0]  (!%p1523_p5), %s370_s19, 16, %s372_s27, [#allocation5]  }
  0x13   : > { %1215 = dma.hbm_to_vmem [thread:$0]  (!%p1523_p5), %s385_s5, 16, %s387_s17, [#allocation8]  }
  0x14   : > { %406 = sbr.rel (%p1512_p3) target bundleno = 2034 (0x7f2), region = 68 }
  0x19   : > { %1403 = dma.done.wait (%p1216_p2), [#allocation3], 16  }
  0x1a   : > { %1405 = vsyncadd (%p1216_p2), [#allocation3], 4294967280 }
  0x1b   : > { %1407 = dma.done.wait (%p1216_p2), [#allocation5], 272  }
  0x1c   : > { %1409 = vsyncadd (%p1216_p2), [#allocation5], 4294967024 }
  0x1d   : > { %1411 = dma.done.wait (%p1216_p2), [#allocation8], 16  }
  0x1e   : > { %1413 = vsyncadd (%p1216_p2), [#allocation8], 4294967280  ;;  %p462_p6 = scmp.lt.s32.totalorder %s1507_s25, 1  ;;  %vm474_vm0 = vcmask 261120   ;;  %v1424_v2 = vmov 32.0   ;;  %v1178_v14 = vld [vmem:[%s1677_s3 + $0x8] sm:$0xff] }
  0x1f   : > { %1254 = vrcp.f32 %v1424_v2  ;;  %538 = vmatpush.bf16.msra.mxu0 %v1178_v14  ;;  %v1177_v15 = vld [vmem:[%s1677_s3] sm:$0xff]  ;;  %s1425_s27 = smov 104   ;;  %s1426_s29 = smov 120   ;;  %vm557_vm5 = vcmask 64512   ;;  %vm699_vm6 = vcmask 1043456   ;;  %vm801_vm7 = vcmask 130048  }
  0x20   : > { %s1692_s25 = smov (!%p462_p6, %s1507_s25), 1  ;;  %v1247_v25 = vld [vmem:[%s1675_s1] ss:$0 sm:$0xff]  ;;  %s1427_s30 = smov 112   ;;  %vm804_vm8 = vcmask 195584  }
  0x21   : > { %s1120_s5 = sshll.u32 %s1692_s25, 3  ;;  %v1248_v28 = vld [vmem:[%s1676_s2] ss:$0 sm:$0xff]  ;;  %s1428_s15 = smov 96  }
  0x22   : > { %s465_s28 = scalar_lea.vmem %s1674_s0, %s1120_s5  ;;  %s1429_s17 = smov 64  }
  0x23   : > { %v1565_v0 = vld [vmem:[%s465_s28] sm:$0xff]  ;;  %539 = vmatpush.bf16.msra.mxu0 %v1177_v15  ;;  %s1430_s24 = smov 8   ;;  %s1431_s26 = smov 24  }
  0x24   : > { %v475_v1 = vsel %vm474_vm0, %v1565_v0, 0.0  ;;  %s1432_s28 = smov 16   ;;  %s469_s16 = scalar_lea.vmem %s1686_s12, %s1120_s5 }
  0x25   : > { %476 = vadd.xlane.f32.xlu0 %v475_v1  ;;  %v1255_v3 = vpop.eup %1254 }
  0x26   : > { %v479_v4 = vmul.f32 32.0, %v1255_v3  ;;  %vm483_vm1 = vweird.f32 %v1255_v3 }
  0x28   : > { %v480_v5 = vsub.f32 1.0, %v479_v4 }
  0x2a   : > { %v481_v6 = vmul.f32 %v1255_v3, %v480_v5 }
  0x2c   : > { %v482_v7 = vadd.f32 %v1255_v3, %v481_v6 }
  0x2e   : > { %v1569_v8 = vsel %vm483_vm1, %v1255_v3, %v482_v7  ;;  %vm994_vm1 = vcmask 523264  }
  0x98   : > { %v477_v9 = vpop.xlane.xlu0 %476 }
  0x99   : > { %v485_v10 = vmul.f32 %v1569_v8, %v477_v9 }
  0x9b   : > { %v486_v11 = vsub.f32 %v1565_v0, %v485_v10 }
  0x9d   : > { %v487_v12 = vmul.f32 %v486_v11, %v486_v11 }
  0x9f   : > { %v488_v13 = vsel %vm474_vm0, %v487_v12, 0.0 }
  0xa0   : > { %489 = vadd.xlane.f32.xlu0 %v488_v13 }
 0x113   : > { %v490_v16 = vpop.xlane.xlu0 %489 }
 0x114   : > { %v491_v17 = vmul.f32 %v490_v16, %v1569_v8 }
 0x116   : > { %v492_v18 = vadd.f32 1e-05, %v491_v17 }
 0x118   : > { %1256 = vrsqrt.f32 %v492_v18  ;;  %vm499_vm3 = vweird.f32 %v492_v18 }
 0x11e   : > { %v1257_v19 = vpop.eup %1256 }
 0x11f   : > { %v494_v20 = vmul.f32 %v1257_v19, %v492_v18  ;;  %vm500_vm2 = vweird.f32 %v1257_v19 }
 0x120   : > { %vm501_vm4 = vmor %vm499_vm3, %vm500_vm2 }
 0x121   : > { %v495_v21 = vmul.f32 %v1257_v19, %v494_v20 }
 0x123   : > { %v496_v22 = vmul.f32 0.5, %v495_v21 }
 0x125   : > { %v497_v23 = vsub.f32 1.5, %v496_v22 }
 0x127   : > { %v498_v24 = vmul.f32 %v1257_v19, %v497_v23 }
 0x129   : > { %v502_v26 = vsel %vm501_vm4, %v1257_v19, %v498_v24 }
 0x12a   : > { %v503_v27 = vmul.f32 %v502_v26, %v486_v11 }
 0x12c   : > { %v507_v29 = vmul.f32 %v1247_v25, %v503_v27 }
 0x12e   : > { %v511_v30 = vadd.f32 %v1248_v28, %v507_v29 }
 0x130   : > { %v512_v31 = vpack.c.bf16 %v511_v30, %v511_v30 }
 0x132   : > { %1130 = vmatmul.msk.bf16.vlgmr.msra.gmra.mxu0 %vm474_vm0, %v512_v31 }
 0x1af   : > { %v541_v32 = vpop.f32.mrf.mxu0 }
 0x1b0   : > { %v545_v33 = vpack.c.bf16 %v541_v32, %v541_v32 }
 0x1b2   : > { %551 = vrot.lane.b32.xlu2 %v545_v33, %s1425_s27  ;;  %547 = vrot.lane.b32.xlu1 %v545_v33, %s1426_s29  ;;  %v553_v41 = vunpack.c.l.b16 %v545_v33 }
 0x1b4   : > { %v1593_v45 = vpack.c.b16 %v553_v41, %v553_v41 }
 0x1b7   : > { %v543_v34 = vpop.f32.mrf.mxu0 }
 0x1ba   : > { %549 = vrot.lane.b32.xlu1 %v545_v33, %s1427_s30 }
 0x20c   : > { %v552_v35 = vpop.permute.xlu2 %551 }
 0x20d   : > { %v623_v36 = vunpack.c.l.b16 %v552_v35 }
 0x20f   : > { %v1588_v37 = vpack.c.b16 %v623_v36, %v623_v36 }
 0x211   : > { %625 = vrot.lane.b32.xlu1 %v1588_v37, %s1428_s15 }
 0x224   : > { %v548_v38 = vpop.permute.xlu1 %547 }
 0x225   : > { %v577_v39 = vunpack.c.l.b16 %v548_v38 }
 0x227   : > { %v578_v40 = vpack.c.b16 %v577_v39, %v577_v39 }
 0x229   : > { %579 = vrot.lane.b32.xlu2 %v578_v40, %s1428_s15 }
 0x22c   : > { %v550_v42 = vpop.permute.xlu1 %549 }
 0x22d   : > { %v600_v43 = vunpack.c.l.b16 %v550_v42 }
 0x22f   : > { %v1591_v44 = vpack.c.b16 %v600_v43, %v600_v43 }
 0x231   : > { %602 = vrot.lane.b32.xlu0 %v1591_v44, %s1428_s15  ;;  %555 = vrot.lane.b32.xlu2 %v1593_v45, %s1428_s15 }
 0x283   : > { %v580_v46 = vpop.permute.xlu2 %579  ;;  %v626_v47 = vpop.permute.xlu1 %625 }
 0x284   : > { %v585_v48 = vsel %vm557_vm5, %v580_v46, 0  ;;  %v631_v49 = vsel %vm557_vm5, %v626_v47, 0 }
 0x285   : > { %594 = vmatpush.bf16.xpose.msra.mxu2 %v585_v48  ;;  %640 = vmatpush.bf16.xpose.msrb.mxu0 %v631_v49 }
 0x28b   : > { %v556_v50 = vpop.permute.xlu2 %555 }
 0x28c   : > { %1132 = vmatmul.msk.bf16.vlgmr.msra.gmra.mxu2 %vm557_vm5, %v548_v38  ;;  %1134 = vmatmul.msk.bf16.vlgmr.msrb.gmra.mxu0 %vm557_vm5, %v552_v35  ;;  %v562_v51 = vsel %vm557_vm5, %v556_v50, 0 }
 0x28d   : > { %571 = vmatpush.bf16.xpose.msra.mxu1 %v562_v51 }
 0x294   : > { %1131 = vmatmul.msk.bf16.vlgmr.msra.gmra.mxu1 %vm557_vm5, %v545_v33 }
 0x2a3   : > { %v603_v52 = vpop.permute.xlu0 %602 }
 0x2a4   : > { %v608_v53 = vsel %vm557_vm5, %v603_v52, 0 }
 0x2a5   : > { %617 = vmatpush.bf16.xpose.msra.mxu3 %v608_v53 }
 0x2ac   : > { %1133 = vmatmul.msk.bf16.vlgmr.msra.gmra.mxu3 %vm557_vm5, %v550_v42 }
 0x309   : > { %v642_v54 = vpop.f32.mrf.mxu0 }
 0x30a   : > { %v655_v55 = vsel %vm557_vm5, %v642_v54, -inf }
 0x30b   : > { %656 = vmax.xlane.f32.xlu0 %v655_v55 }
 0x30f   : > { %v596_v56 = vpop.f32.mrf.mxu2 }
 0x310   : > { %v649_v57 = vsel %vm557_vm5, %v596_v56, -inf }
 0x311   : > { %650 = vmax.xlane.f32.xlu1 %v649_v57  ;;  %v573_v58 = vpop.f32.mrf.mxu1  ;;  %v644_v59 = vpop.f32.mrf.mxu0 }
 0x312   : > { %v646_v2 = vsel %vm557_vm5, %v573_v58, -inf }
 0x317   : > { %v598_v60 = vpop.f32.mrf.mxu2 }
 0x319   : > { %v575_v61 = vpop.f32.mrf.mxu1 }
 0x31f   : > { %716 = vrot.lane.b32.xlu0 %v578_v40, %s1429_s17 }
 0x32f   : > { %v619_v62 = vpop.f32.mrf.mxu3 }
 0x330   : > { %v652_v63 = vsel %vm557_vm5, %v619_v62, -inf }
 0x331   : > { %653 = vmax.xlane.f32.xlu2 %v652_v63 }
 0x337   : > { %v621_v1 = vpop.f32.mrf.mxu3 }
 0x339   : > { %647 = vmax.xlane.f32.xlu2 %v646_v2  ;;  %v1180_v2 = vld [vmem:[%s1678_s4 + $0x8] sm:$0xff] }
 0x37e   : > { %v657_v3 = vpop.xlane.xlu0 %656 }
 0x37f   : > { %v661_v4 = vsub.f32 %v642_v54, %v657_v3  ;;  %v1179_v3 = vld [vmem:[%s1678_s4] sm:$0xff] }
 0x381   : > { %v668_v5 = vmul.f32 1.442695, %v661_v4 }
 0x383   : > { %1258 = vpow2.f32 %v668_v5 }
 0x384   : > { %v651_v6 = vpop.xlane.xlu1 %650 }
 0x385   : > { %v659_v7 = vsub.f32 %v596_v56, %v651_v6 }
 0x387   : > { %v664_v9 = vmul.f32 1.442695, %v659_v7 }
 0x389   : > { %v1259_v10 = vpop.eup %1258  ;;  %1260 = vpow2.f32 %v664_v9 }
 0x38a   : > { %v679_v11 = vsel %vm557_vm5, %v1259_v10, 0.0 }
 0x38b   : > { %680 = vadd.xlane.f32.xlu1 %v679_v11 }
 0x38f   : > { %v1261_v12 = vpop.eup %1260 }
 0x390   : > { %v673_v14 = vsel %vm557_vm5, %v1261_v12, 0.0 }
 0x391   : > { %v717_v13 = vpop.permute.xlu0 %716 }
 0x392   : > { %v722_v15 = vsel %vm699_vm6, %v717_v13, 0 }
 0x393   : > { %674 = vadd.xlane.f32.xlu1 %v673_v14  ;;  %731 = vmatpush.bf16.msrb.mxu2 %v722_v15 }
 0x3a4   : > { %v654_v16 = vpop.xlane.xlu2 %653 }
 0x3a5   : > { %v660_v17 = vsub.f32 %v619_v62, %v654_v16 }
 0x3a7   : > { %v666_v18 = vmul.f32 1.442695, %v660_v17 }
 0x3a9   : > { %1262 = vpow2.f32 %v666_v18 }
 0x3ac   : > { %v648_v19 = vpop.xlane.xlu2 %647  ;;  %758 = vrot.lane.b32.xlu1 %v1588_v37, %s1429_s17 }
 0x3ad   : > { %v658_v20 = vsub.f32 %v573_v58, %v648_v19 }
 0x3af   : > { %v1263_v21 = vpop.eup %1262  ;;  %v662_v22 = vmul.f32 1.442695, %v658_v20 }
 0x3b0   : > { %v676_v23 = vsel %vm557_vm5, %v1263_v21, 0.0 }
 0x3b1   : > { %1264 = vpow2.f32 %v662_v22  ;;  %677 = vadd.xlane.f32.xlu2 %v676_v23  ;;  %v1182_v23 = vld [vmem:[#allocation4 + $0x8] sm:$0xff] }
 0x3b2   : > { %906 = vmatpush.bf16.msra.mxu2 %v1182_v23 }
 0x3b7   : > { %v1265_v24 = vpop.eup %1264 }
 0x3b8   : > { %v670_v25 = vsel %vm557_vm5, %v1265_v24, 0.0 }
 0x3b9   : > { %671 = vadd.xlane.f32.xlu0 %v670_v25 }
 0x3c9   : > { %737 = vrot.lane.b32.xlu2 %v1591_v44, %s1429_s17 }
 0x3d1   : > { %694 = vrot.lane.b32.xlu2 %v1593_v45, %s1429_s17 }
 0x3fe   : > { %v681_v26 = vpop.xlane.xlu1 %680 }
 0x406   : > { %v675_v27 = vpop.xlane.xlu1 %674 }
 0x407   : > { %1266 = vrcp.f32 %v675_v27 }
 0x408   : > { %1268 = vrcp.f32 %v681_v26 }
 0x40d   : > { %v1267_v28 = vpop.eup %1266 }
 0x40e   : > { %v687_v29 = vmul.f32 %v1267_v28, %v1261_v12  ;;  %v1269_v31 = vpop.eup %1268  ;;  %v1249_v12 = vld [vmem:[#allocation2] ss:$0 sm:$0xff] }
 0x40f   : > { %v689_v32 = vmul.f32 %v1269_v31, %v1259_v10 }
 0x410   : > { %v691_v30 = vpack.c.bf16 %v687_v29, %v687_v29 }
 0x411   : > { %v693_v35 = vpack.c.bf16 %v689_v32, %v689_v32 }
 0x412   : > { %1136 = vmatmul.msk.bf16.vlgmr.msrb.gmra.mxu2 %vm557_vm5, %v691_v30 }
 0x41e   : > { %v759_v33 = vpop.permute.xlu1 %758 }
 0x41f   : > { %v764_v34 = vsel %vm699_vm6, %v759_v33, 0  ;;  %v1250_v33 = vld [vmem:[%s1680_s6] ss:$0 sm:$0xff] }
 0x420   : > { %773 = vmatpush.bf16.msra.mxu0 %v764_v34 }
 0x423   : > { %1138 = vmatmul.msk.bf16.vlgmr.msra.gmra.mxu0 %vm557_vm5, %v693_v35 }
 0x424   : > { %v678_v36 = vpop.xlane.xlu2 %677 }
 0x425   : > { %1270 = vrcp.f32 %v678_v36 }
 0x42b   : > { %v1271_v37 = vpop.eup %1270 }
 0x42c   : > { %v688_v38 = vmul.f32 %v1271_v37, %v1263_v21  ;;  %v738_v39 = vpop.permute.xlu2 %737  ;;  %v672_v40 = vpop.xlane.xlu0 %671 }
 0x42d   : > { %1272 = vrcp.f32 %v672_v40  ;;  %v743_v41 = vsel %vm699_vm6, %v738_v39, 0  ;;  %v1252_v39 = vld [vmem:[#allocation6] ss:$0 sm:$0xff] }
 0x42e   : > { %752 = vmatpush.bf16.msrb.mxu3 %v743_v41  ;;  %v692_v42 = vpack.c.bf16 %v688_v38, %v688_v38 }
 0x431   : > { %1137 = vmatmul.msk.bf16.vlgmr.msrb.gmra.mxu3 %vm557_vm5, %v692_v42 }
 0x433   : > { %v1273_v43 = vpop.eup %1272 }
 0x434   : > { %v686_v44 = vmul.f32 %v1273_v43, %v1265_v24  ;;  %v695_v45 = vpop.permute.xlu2 %694  ;;  %v1181_v24 = vld [vmem:[#allocation4] sm:$0xff] }
 0x435   : > { %v701_v46 = vsel %vm699_vm6, %v695_v45, 0  ;;  %907 = vmatpush.bf16.msra.mxu2 %v1181_v24 }
 0x436   : > { %v690_v47 = vpack.c.bf16 %v686_v44, %v686_v44  ;;  %710 = vmatpush.bf16.msrb.mxu1 %v701_v46  ;;  %v1186_v46 = vld [vmem:[%s1684_s10 + $0x18] sm:$0xff] }
 0x437   : > { %1002 = vmatpush.bf16.msra.mxu3 %v1186_v46 }
 0x439   : > { %1135 = vmatmul.msk.bf16.vlgmr.msrb.gmra.mxu1 %vm557_vm5, %v690_v47 }
 0x43a   : > { %831 = vmatpush.bf16.msra.mxu1 %v1180_v2 }
 0x43e   : > { %832 = vmatpush.bf16.msra.mxu1 %v1179_v3 }
 0x495   : > { %v733_v48 = vpop.f32.mrf.mxu2 }
 0x496   : > { %v780_v49 = vpack.c.bf16 %v733_v48, %v733_v48 }
 0x498   : > { %v784_v50 = vunpack.c.l.b16 %v780_v49 }
 0x49a   : > { %v785_v51 = vpack.c.b16 %v784_v50, %v784_v50 }
 0x49c   : > { %786 = vrot.lane.b32.xlu1 %v785_v51, %s1430_s24  ;;  %v1185_v51 = vld [vmem:[%s1684_s10 + $0x10] sm:$0xff] }
 0x49d   : > { %v735_v52 = vpop.f32.mrf.mxu2  ;;  %1003 = vmatpush.bf16.msra.mxu3 %v1185_v51 }
 0x4a0   : > { %v775_v53 = vpop.f32.mrf.mxu0 }
 0x4a1   : > { %v782_v54 = vpack.c.bf16 %v775_v53, %v775_v53 }
 0x4a3   : > { %v794_v55 = vunpack.c.l.b16 %v782_v54 }
 0x4a5   : > { %v795_v56 = vpack.c.b16 %v794_v55, %v794_v55 }
 0x4a7   : > { %796 = vrot.lane.b32.xlu1 %v795_v56, %s1431_s26  ;;  %v1184_v56 = vld [vmem:[%s1684_s10 + $0x8] sm:$0xff] }
 0x4a8   : > { %v777_v57 = vpop.f32.mrf.mxu0  ;;  %1004 = vmatpush.bf16.msra.mxu3 %v1184_v56 }
 0x4b4   : > { %v754_v58 = vpop.f32.mrf.mxu3 }
 0x4b5   : > { %v781_v59 = vpack.c.bf16 %v754_v58, %v754_v58 }
 0x4b6   : > { %v712_v60 = vpop.f32.mrf.mxu1 }
 0x4b7   : > { %v789_v61 = vunpack.c.l.b16 %v781_v59  ;;  %v779_v5 = vpack.c.bf16 %v712_v60, %v712_v60  ;;  %v1183_v60 = vld [vmem:[%s1684_s10] sm:$0xff] }
 0x4b8   : > { %1005 = vmatpush.bf16.msra.mxu3 %v1183_v60 }
 0x4b9   : > { %v790_v62 = vpack.c.b16 %v789_v61, %v789_v61 }
 0x4bb   : > { %791 = vrot.lane.b32.xlu2 %v790_v62, %s1432_s28 }
 0x4bc   : > { %v756_v63 = vpop.f32.mrf.mxu3 }
 0x4be   : > { %v714_v1 = vpop.f32.mrf.mxu1 }
 0x50e   : > { %v787_v4 = vpop.permute.xlu1 %786 }
 0x50f   : > { %v800_v7 = vsel %vm557_vm5, %v779_v5, %v787_v4 }
 0x515   : > { %v792_v6 = vpop.permute.xlu2 %791 }
 0x516   : > { %v803_v9 = vsel %vm801_vm7, %v800_v7, %v792_v6 }
 0x519   : > { %v797_v10 = vpop.permute.xlu1 %796 }
 0x51a   : > { %v806_v11 = vsel %vm804_vm8, %v803_v9, %v797_v10 }
 0x51b   : > { %1147 = vmatmul.msk.bf16.vlgmr.msra.gmra.mxu1 %vm474_vm0, %v806_v11 }
 0x598   : > { %v834_v13 = vpop.f32.mrf.mxu1 }
 0x599   : > { %v838_v14 = vadd.f32 %v834_v13, %v1565_v0 }
 0x59b   : > { %v1637_v15 = vadd.f32 %v1249_v12, %v838_v14 }
 0x59d   : > { %v846_v16 = vsel %vm474_vm0, %v1637_v15, 0.0 }
 0x59e   : > { %847 = vadd.xlane.f32.xlu2 %v846_v16 }
 0x5a0   : > { %v836_v17 = vpop.f32.mrf.mxu1 }
 0x611   : > { %v848_v18 = vpop.xlane.xlu2 %847 }
 0x612   : > { %v849_v19 = vmul.f32 %v848_v18, %v1569_v8 }
 0x614   : > { %v850_v20 = vsub.f32 %v1637_v15, %v849_v19 }
 0x616   : > { %v851_v21 = vmul.f32 %v850_v20, %v850_v20 }
 0x618   : > { %v852_v22 = vsel %vm474_vm0, %v851_v21, 0.0 }
 0x619   : > { %853 = vadd.xlane.f32.xlu1 %v852_v22 }
 0x68c   : > { %v854_v0 = vpop.xlane.xlu1 %853 }
 0x68d   : > { %v855_v25 = vmul.f32 %v854_v0, %v1569_v8  ;;  %v1251_v8 = vld [vmem:[%s1681_s7] ss:$0 sm:$0xff] }
 0x68f   : > { %v856_v26 = vadd.f32 1e-05, %v855_v25  ;;  %v1253_v25 = vld [vmem:[#allocation7] ss:$0 sm:$0xff] }
 0x691   : > { %1274 = vrsqrt.f32 %v856_v26  ;;  %vm863_vm10 = vweird.f32 %v856_v26 }
 0x697   : > { %v1275_v27 = vpop.eup %1274 }
 0x698   : > { %v858_v28 = vmul.f32 %v1275_v27, %v856_v26  ;;  %vm864_vm9 = vweird.f32 %v1275_v27 }
 0x699   : > { %vm865_vm11 = vmor %vm863_vm10, %vm864_vm9 }
 0x69a   : > { %v859_v29 = vmul.f32 %v1275_v27, %v858_v28 }
 0x69c   : > { %v860_v30 = vmul.f32 0.5, %v859_v29 }
 0x69e   : > { %v861_v31 = vsub.f32 1.5, %v860_v30 }
 0x6a0   : > { %v862_v32 = vmul.f32 %v1275_v27, %v861_v31 }
 0x6a2   : > { %v866_v34 = vsel %vm865_vm11, %v1275_v27, %v862_v32 }
 0x6a3   : > { %v867_v35 = vmul.f32 %v866_v34, %v850_v20 }
 0x6a5   : > { %v871_v36 = vmul.f32 %v1250_v33, %v867_v35 }
 0x6a7   : > { %v875_v37 = vadd.f32 %v1251_v8, %v871_v36 }
 0x6a9   : > { %v876_v38 = vpack.c.bf16 %v875_v37, %v875_v37 }
 0x6ab   : > { %1156 = vmatmul.msk.bf16.vlgmr.msra.gmra.mxu2 %vm474_vm0, %v876_v38 }
 0x72e   : > { %v909_v40 = vpop.f32.mrf.mxu2 }
 0x72f   : > { %v910_v41 = vadd.f32 %v1252_v39, %v909_v40 }
 0x731   : > { %v914_v42 = vmul.f32 0.70710677, %v910_v41  ;;  %v913_v22 = vmul.f32 0.5, %v910_v41 }
 0x733   : > { %v915_v43 = vmul.f32 %v914_v42, %v914_v42 }
 0x735   : > { %v916_v44 = vmin.f32 %v915_v43, 16.0 }
 0x736   : > { %v911_v45 = vpop.f32.mrf.mxu2 }
 0x737   : > { %v917_v47 = vmul.f32 2.1237322e-06, %v916_v44  ;;  %v928_v48 = vmul.f32 3.8918573e-05, %v916_v44 }
 0x739   : > { %v918_v49 = vadd.f32 0.00028619796, %v917_v47  ;;  %v929_v50 = vadd.f32 0.001143296, %v928_v48 }
 0x73b   : > { %v919_v52 = vmul.f32 %v918_v49, %v916_v44  ;;  %v930_v53 = vmul.f32 %v929_v50, %v916_v44 }
 0x73d   : > { %v931_v54 = vadd.f32 0.014752088, %v930_v53  ;;  %v920_v55 = vadd.f32 0.0036580483, %v919_v52 }
 0x73f   : > { %v932_v57 = vmul.f32 %v931_v54, %v916_v44  ;;  %v921_v59 = vmul.f32 %v920_v55, %v916_v44 }
 0x741   : > { %v933_v58 = vadd.f32 0.112945676, %v932_v57  ;;  %v922_v63 = vadd.f32 0.05243302, %v921_v59 }
 0x743   : > { %v934_v61 = vmul.f32 %v933_v58, %v916_v44  ;;  %v923_v3 = vmul.f32 %v922_v63, %v916_v44 }
 0x745   : > { %v935_v62 = vadd.f32 0.4994258, %v934_v61  ;;  %v924_v4 = vadd.f32 0.18741608, %v923_v3 }
 0x747   : > { %v936_v1 = vmul.f32 %v935_v62, %v916_v44  ;;  %v925_v6 = vmul.f32 %v924_v4, %v916_v44 }
 0x749   : > { %v937_v2 = vadd.f32 1.0, %v936_v1  ;;  %v926_v11 = vadd.f32 1.1283791, %v925_v6 }
 0x74b   : > { %1276 = vrcp.f32 %v937_v2  ;;  %v949_v10 = vand.u32 2147483648, %v937_v2  ;;  %v947_v13 = vand.u32 2147483647, %v937_v2  ;;  %vm943_vm13 = vweird.f32 %v937_v2 }
 0x74c   : > { %v927_v17 = vmul.f32 %v926_v11, %v914_v42 }
 0x74d   : > { %v950_v16 = vor.u32 1.1754944e-38, %v949_v10  ;;  %vm948_vm15 = vcmp.eq.f32.partialorder %v947_v13, 8.507059e+37 }
 0x751   : > { %v1277_v5 = vpop.eup %1276 }
 0x752   : > { %v939_v7 = vmul.f32 %v1277_v5, %v937_v2  ;;  %vm944_vm12 = vweird.f32 %v1277_v5 }
 0x753   : > { %vm945_vm14 = vmor %vm943_vm13, %vm944_vm12 }
 0x754   : > { %v940_v9 = vsub.f32 1.0, %v939_v7 }
 0x756   : > { %v941_v12 = vmul.f32 %v1277_v5, %v940_v9 }
 0x758   : > { %v942_v14 = vadd.f32 %v1277_v5, %v941_v12 }
 0x75a   : > { %v946_v18 = vsel %vm945_vm14, %v1277_v5, %v942_v14 }
 0x75b   : > { %v951_v19 = vsel %vm948_vm15, %v950_v16, %v946_v18 }
 0x75c   : > { %v952_v20 = vmul.f32 %v951_v19, %v927_v17 }
 0x75e   : > { %v1157_v21 = vclamps-f32 %v952_v20, 1.0 }
 0x760   : > { %v955_v23 = vadd.f32 1.0, %v1157_v21 }
 0x762   : > { %v956_v24 = vmul.f32 %v955_v23, %v913_v22 }
 0x764   : > { %v957_v0 = vpack.c.bf16 %v956_v24, %v956_v24 }
 0x766   : > { %1174 = vmatmul.msk.bf16.vlgmr.msra.gmra.mxu3 %vm994_vm1, %v957_v0 }
 0x7e9   : > { %v1007_v26 = vpop.f32.mrf.mxu3 }
 0x7ea   : > { %v1008_v27 = vadd.f32 %v1253_v25, %v1007_v26 }
 0x7ec   : > { %v1011_v28 = vadd.f32 %v1008_v27, %v1637_v15 }
 0x7ee   : > { %1012 = vst.msk [vmem:[%s469_s16] sm:$0xff] %vm474_vm0, %v1011_v28 }
 0x7f1   : > { %v1009_v29 = vpop.f32.mrf.mxu3 }
 0x7f2 PF: > { %s25_s21 = sadd.s32 1, %s1416_s21  }
 0x7f3   : > { %p22_p7 = scmp.ge.s32.totalorder %s25_s21, 4  }
 0x7f5   :  { %24 = sbr.rel (!%p22_p7) target bundleno = 5 (0x5), region = 115 }
 0x7fa   :  { %1032 = vsyncpa [#allocation3], 1 }
 0x7fb   :  { %1034 = vsyncpa [#allocation3 + $0x1], 1 }
 0x7fc   :  { %1035 = vsyncpa [#allocation5], 1 }
 0x7fd   :  { %1036 = vsyncpa [#allocation8], 1 }

// kernel: transformer_forward.3
= control target key start
LH: loop header
LB: loop body
LE: loop exit
PB: predicated region body
PF: predicated region fallthrough
CT: control target
= control target key end

     0   :  { %17 = vsyncpa [#allocation3], 0  ;;  %s1640_s0 = inlined_call_operand.hbm [shape: f32[2,8,32], index: 0, kind: input, shape index: {}, may-alias: {0,12}]   ;;  %s1641_s1 = inlined_call_operand.vmem [shape: f32[1,32], index: 1, kind: input, shape index: {}]   ;;  %s1642_s2 = inlined_call_operand.vmem [shape: f32[1,32], index: 2, kind: input, shape index: {}]   ;;  %s1643_s3 = inlined_call_operand.vmem [shape: bf16[32,96], index: 3, kind: input, shape index: {}]   ;;  %s1644_s4 = inlined_call_operand.vmem [shape: bf16[32,32], index: 4, kind: input, shape index: {}]   ;;  %s1645_s5 = inlined_call_operand.vmem [shape: f32[1,32], index: 5, kind: input, shape index: {}]   ;;  %s1646_s6 = inlined_call_operand.vmem [shape: f32[1,32], index: 6, kind: input, shape index: {}]   ;;  %s1647_s7 = inlined_call_operand.vmem [shape: f32[1,32], index: 7, kind: input, shape index: {}]   ;;  %s1648_s8 = inlined_call_operand.vmem [shape: bf16[32,64], index: 8, kind: input, shape index: {}]   ;;  %s1649_s9 = inlined_call_operand.vmem [shape: f32[1,64], index: 9, kind: input, shape index: {}]   ;;  %s1650_s10 = inlined_call_operand.vmem [shape: bf16[64,32], index: 10, kind: input, shape index: {}]   ;;  %s1651_s11 = inlined_call_operand.vmem [shape: f32[1,32], index: 11, kind: input, shape index: {}]   ;;  %s1652_s12 = inlined_call_operand.hbm [shape: f32[2,8,32], index: 12, kind: output, shape index: {}, may-alias: {0,12}]  }
   0x1   :  { %19 = vsyncpa [#allocation3 + $0x1], 0 }
   0x2   :  { %20 = vsyncpa [#allocation4], 0 }
   0x3   :  { %22 = vsyncpa [#allocation4 + $0x1], 0  ;;  %s1393_s21 = smov 0   ;;  %s1395_s22 = smov 0  }
   0x4   :  { %s1397_s23 = smov 0   ;;  %s1399_s24 = smov 0  }
   0x5 LB: > { %1660 = sst [smem:[#allocation8_spill]] %s1305_s21  ;;  %s1414_s25 = sadd.s32 4294967295, %s1317_s24   ;;  %s1317_s24 = sphi %s1399_s24, %s1675_s24   ;;  %s1313_s23 = sphi %s1397_s23, %s1677_s23   ;;  %s1309_s22 = sphi %s1395_s22, %s1679_s22   ;;  %s1305_s21 = sphi %s1393_s21, %s1678_s21  }
   0x6   : > { %1661 = sst [smem:[#allocation9_spill]] %s1313_s23  ;;  %s1060_s26 = sadd.s32 4294967294, %s1317_s24  }
   0x7   : > { %s1418_s27 = sadd.s32 1, %s1317_s24   ;;  %s35_s28 = sadd.s32 1, %s1313_s23 }
   0x8   : > { %1662 = sst [smem:[#allocation10_spill]] %s1418_s27  ;;  %s32_s29 = ssub.s32 %s1317_s24, %s1418_s27 }
   0x9   : > { %p42_p0 = scmp.ne.s32.totalorder %s1313_s23, %s1309_s22  ;;  %p33_p1 = scmp.eq.s32.totalorder %s32_s29, 0 }
   0xa   : > { %p43_p2 = scmp.eq.s32.totalorder %s1317_s24, 0  ;;  %p48_p3 = scmp.ne.s32.totalorder %s1309_s22, %s1305_s21 }
   0xb   : > { %p49_p4 = scmp.eq.s32.totalorder %s1414_s25, 0  ;;  %p303_p7 = scmp.eq.s32.totalorder %s1414_s25, 1 }
   0xc   : > { %s1430_s30 = scalar_select %p33_p1, %s1313_s23, %s35_s28  }
   0xd   : > { %p1432_p5 = por %p43_p2, %p42_p0  ;;  %p1436_p6 = por %p49_p4, %p48_p3 }
   0xe   : > { %1663 = sst [smem:[#allocation11_spill]] %s1430_s30  ;;  %p309_p8 = scmp.eq.s32.totalorder %s1060_s26, 1 }
   0xf   : > { %p1147_p10 = scmp.lt.s32.totalorder %s1317_s24, 2  ;;  %p1443_p11 = por %p303_p7, %p42_p0 }
  0x10   : > { %p1447_p12 = por %p309_p8, %p48_p3  ;;  %s362_s17 = sand.u32 1, %s1313_s23  }
  0x11   : > { %s1666_s15 = scalar_select %p1443_p11, 1, 0 }
  0x12   : > { %s1668_s16 = scalar_select %p1447_p12, 1, 0 }
  0x13   : > { %1667 = sst [smem:[#allocation12_spill]] %s1666_s15  ;;  %s1064_s18 = sshll.u32 %s1317_s24, 3 }
  0x14   : > { %1669 = sst [smem:[#allocation13_spill]] %s1668_s16  ;;  %s1063_s19 = sshll.u32 %s362_s17, 3 }
  0x15   : > { %s370_s29 = scalar_lea.hbm %s1640_s0, %s1064_s18  ;;  %s366_s26 = scalar_lea.vmem [#allocation2], %s1063_s19 }
  0x16   : > { %s372_s30 = sshll.u32 %s370_s29, 4  ;;  %s374_s27 = sshll.u32 %s366_s26, 4  ;;  %s373_s30 = int_to_ptr.hbm [resolvable:$true] %s372_s30  ;;  %s375_s27 = int_to_ptr.vmem [resolvable:$true] %s374_s27 }
  0x17   : > { %p1458_p13 = pnand %p1147_p10, %p1432_p5  ;;  %p1065_p0 = scmp.ge.s32.totalorder %s1317_s24, 1 }
  0x18   : > { %p379_p1 = scmp.lt.s32.totalorder %s1317_s24, 3  ;;  %s363_s23 = scalar_lea.sflag [#allocation3], %s362_s17 }
  0x19   : > { %s1221_s16 = sshra.s32 %s373_s30, 4  ;;  %p1225_p3 = pneg %p1458_p13  ;;  %s1222_s16 = int_to_ptr.hbm [resolvable:$true] %s1221_s16 }
  0x1a   : > { %s1223_s15 = scalar_lea.hbm %s1222_s16, 8  ;;  %s1228_s13 = scalar_lea.hbm %s1640_s0, 16 }
  0x1b   : > { %p1224_p2 = scmp.ne.s32.totalorder %s1222_s16, %s1223_s15  ;;  %p1229_p5 = scmp.lt.s32.totalorder %s1222_s16, %s1640_s0 }
  0x1c   : > { %p1230_p8 = scmp.lt.s32.totalorder %s1228_s13, %s1223_s15 }
  0x1d   : > { %p1226_p4 = pnand %p1225_p3, %p1224_p2 }
  0x1e   : > { %p1231_p10 = por %p1230_p8, %p1229_p5 }
  0x1f   : > { %p1227_p7 = pneg %p1226_p4 }
  0x21   : > { %p1232_p9 = pnand %p1231_p10, %p1227_p7 }
  0x23   : > { %1235 = shalt.err (!%p1232_p9)
}
  0x24   : > { %1142 = dma.hbm_to_vmem [thread:$0]  (!%p1458_p13), %s373_s30, 128, %s375_s27, %s363_s23  }
  0x25   : > { %p380_p2 = pnand %p1065_p0, %p379_p1 }
  0x26   : > { %s1479_s17 = sand.u32 (!%p380_p2), 1, %s1309_s22  }
  0x27   : > { %383 = sbr.rel (%p380_p2) target bundleno = 2044 (0x7fc), region = 68  ;;  %s1066_s15 = sshll.u32 (!%p380_p2), %s1479_s17, 3 }
  0x28   : > { %s386_s16 = scalar_lea.sflag (!%p380_p2), [#allocation3], %s1479_s17  ;;  %s389_s29 = scalar_lea.vmem (!%p380_p2), [#allocation2], %s1066_s15 }
  0x2c   : > { %1296 = dma.done.wait (%p1436_p6), %s386_s16, 128  }
  0x2d   : > { %1298 = vsyncadd (%p1436_p6), %s386_s16, 4294967168  ;;  %vm435_vm0 = vcmask 261120   ;;  %v1489_v0 = vld [vmem:[%s389_s29] sm:$0xff]  ;;  %v1319_v2 = vmov 32.0   ;;  %s1320_s13 = smov 104   ;;  %s1321_s20 = smov 120  }
  0x2e   : > { %v436_v1 = vsel %vm435_vm0, %v1489_v0, 0.0  ;;  %1197 = vrcp.f32 %v1319_v2  ;;  %v1126_v14 = vld [vmem:[%s1643_s3 + $0x8] sm:$0xff]  ;;  %v1125_v15 = vld [vmem:[%s1643_s3] sm:$0xff]  ;;  %s1322_s28 = smov 112   ;;  %s1323_s16 = smov 96   ;;  %vm518_vm5 = vcmask 64512  }
  0x2f   : > { %437 = vadd.xlane.f32.xlu0 %v436_v1  ;;  %499 = vmatpush.bf16.msra.mxu0 %v1126_v14  ;;  %v1190_v25 = vld [vmem:[%s1641_s1] ss:$0 sm:$0xff]  ;;  %s1324_s29 = smov 64   ;;  %vm660_vm6 = vcmask 1043456   ;;  %s1325_s21 = smov 8   ;;  %vm762_vm7 = vcmask 130048  }
  0x30   : > { %v1191_v28 = vld [vmem:[%s1642_s2] ss:$0 sm:$0xff]  ;;  %s1326_s23 = smov 24   ;;  %s1327_s27 = smov 16   ;;  %vm765_vm8 = vcmask 195584  }
  0x33   : > { %500 = vmatpush.bf16.msra.mxu0 %v1125_v15 }
  0x34   : > { %v1198_v3 = vpop.eup %1197 }
  0x35   : > { %v440_v4 = vmul.f32 32.0, %v1198_v3  ;;  %vm444_vm1 = vweird.f32 %v1198_v3 }
  0x37   : > { %v441_v5 = vsub.f32 1.0, %v440_v4 }
  0x39   : > { %v442_v6 = vmul.f32 %v1198_v3, %v441_v5 }
  0x3b   : > { %v443_v7 = vadd.f32 %v1198_v3, %v442_v6 }
  0x3d   : > { %v1493_v8 = vsel %vm444_vm1, %v1198_v3, %v443_v7  ;;  %vm955_vm1 = vcmask 523264  }
  0xa2   : > { %v438_v9 = vpop.xlane.xlu0 %437 }
  0xa3   : > { %v446_v10 = vmul.f32 %v1493_v8, %v438_v9 }
  0xa5   : > { %v447_v11 = vsub.f32 %v1489_v0, %v446_v10 }
  0xa7   : > { %v448_v12 = vmul.f32 %v447_v11, %v447_v11 }
  0xa9   : > { %v449_v13 = vsel %vm435_vm0, %v448_v12, 0.0 }
  0xaa   : > { %450 = vadd.xlane.f32.xlu0 %v449_v13 }
 0x11d   : > { %v451_v16 = vpop.xlane.xlu0 %450 }
 0x11e   : > { %v452_v17 = vmul.f32 %v451_v16, %v1493_v8 }
 0x120   : > { %v453_v18 = vadd.f32 1e-05, %v452_v17 }
 0x122   : > { %1199 = vrsqrt.f32 %v453_v18  ;;  %vm460_vm3 = vweird.f32 %v453_v18 }
 0x128   : > { %v1200_v19 = vpop.eup %1199 }
 0x129   : > { %v455_v20 = vmul.f32 %v1200_v19, %v453_v18  ;;  %vm461_vm2 = vweird.f32 %v1200_v19 }
 0x12a   : > { %vm462_vm4 = vmor %vm460_vm3, %vm461_vm2 }
 0x12b   : > { %v456_v21 = vmul.f32 %v1200_v19, %v455_v20 }
 0x12d   : > { %v457_v22 = vmul.f32 0.5, %v456_v21 }
 0x12f   : > { %v458_v23 = vsub.f32 1.5, %v457_v22 }
 0x131   : > { %v459_v24 = vmul.f32 %v1200_v19, %v458_v23 }
 0x133   : > { %v463_v26 = vsel %vm462_vm4, %v1200_v19, %v459_v24 }
 0x134   : > { %v464_v27 = vmul.f32 %v463_v26, %v447_v11 }
 0x136   : > { %v468_v29 = vmul.f32 %v1190_v25, %v464_v27 }
 0x138   : > { %v472_v30 = vadd.f32 %v1191_v28, %v468_v29 }
 0x13a   : > { %v473_v31 = vpack.c.bf16 %v472_v30, %v472_v30 }
 0x13c   : > { %1076 = vmatmul.msk.bf16.vlgmr.msra.gmra.mxu0 %vm435_vm0, %v473_v31 }
 0x1b9   : > { %v502_v32 = vpop.f32.mrf.mxu0 }
 0x1ba   : > { %v506_v33 = vpack.c.bf16 %v502_v32, %v502_v32 }
 0x1bc   : > { %512 = vrot.lane.b32.xlu2 %v506_v33, %s1320_s13  ;;  %508 = vrot.lane.b32.xlu1 %v506_v33, %s1321_s20  ;;  %v514_v41 = vunpack.c.l.b16 %v506_v33  ;;  %s430_s13 = scalar_lea.vmem [#allocation5], %s1066_s15  ;;  %s1271_s15 = scalar_lea.hbm %s1652_s12, 16 }
 0x1bd   : > { %s987_s20 = sshll.u32 %s430_s13, 4  ;;  %s988_s20 = int_to_ptr.vmem [resolvable:$true] %s987_s20 }
 0x1be   : > { %v1517_v45 = vpack.c.b16 %v514_v41, %v514_v41 }
 0x1c1   : > { %v504_v34 = vpop.f32.mrf.mxu0 }
 0x1c4   : > { %510 = vrot.lane.b32.xlu1 %v506_v33, %s1322_s28 }
 0x216   : > { %v513_v35 = vpop.permute.xlu2 %512 }
 0x217   : > { %v584_v36 = vunpack.c.l.b16 %v513_v35 }
 0x219   : > { %v1512_v37 = vpack.c.b16 %v584_v36, %v584_v36 }
 0x21b   : > { %586 = vrot.lane.b32.xlu1 %v1512_v37, %s1323_s16 }
 0x22e   : > { %v509_v38 = vpop.permute.xlu1 %508 }
 0x22f   : > { %v538_v39 = vunpack.c.l.b16 %v509_v38 }
 0x231   : > { %v539_v40 = vpack.c.b16 %v538_v39, %v538_v39 }
 0x233   : > { %540 = vrot.lane.b32.xlu2 %v539_v40, %s1323_s16 }
 0x236   : > { %v511_v42 = vpop.permute.xlu1 %510 }
 0x237   : > { %v561_v43 = vunpack.c.l.b16 %v511_v42 }
 0x239   : > { %v1515_v44 = vpack.c.b16 %v561_v43, %v561_v43 }
 0x23b   : > { %563 = vrot.lane.b32.xlu0 %v1515_v44, %s1323_s16  ;;  %516 = vrot.lane.b32.xlu2 %v1517_v45, %s1323_s16 }
 0x28d   : > { %v541_v46 = vpop.permute.xlu2 %540  ;;  %v587_v47 = vpop.permute.xlu1 %586 }
 0x28e   : > { %v546_v48 = vsel %vm518_vm5, %v541_v46, 0  ;;  %v592_v49 = vsel %vm518_vm5, %v587_v47, 0 }
 0x28f   : > { %555 = vmatpush.bf16.xpose.msra.mxu2 %v546_v48  ;;  %601 = vmatpush.bf16.xpose.msrb.mxu0 %v592_v49 }
 0x295   : > { %v517_v50 = vpop.permute.xlu2 %516 }
 0x296   : > { %1078 = vmatmul.msk.bf16.vlgmr.msra.gmra.mxu2 %vm518_vm5, %v509_v38  ;;  %1080 = vmatmul.msk.bf16.vlgmr.msrb.gmra.mxu0 %vm518_vm5, %v513_v35  ;;  %v523_v51 = vsel %vm518_vm5, %v517_v50, 0 }
 0x297   : > { %532 = vmatpush.bf16.xpose.msra.mxu1 %v523_v51 }
 0x29e   : > { %1077 = vmatmul.msk.bf16.vlgmr.msra.gmra.mxu1 %vm518_vm5, %v506_v33 }
 0x2ad   : > { %v564_v52 = vpop.permute.xlu0 %563 }
 0x2ae   : > { %v569_v53 = vsel %vm518_vm5, %v564_v52, 0 }
 0x2af   : > { %578 = vmatpush.bf16.xpose.msra.mxu3 %v569_v53 }
 0x2b6   : > { %1079 = vmatmul.msk.bf16.vlgmr.msra.gmra.mxu3 %vm518_vm5, %v511_v42 }
 0x313   : > { %v603_v54 = vpop.f32.mrf.mxu0 }
 0x314   : > { %v616_v55 = vsel %vm518_vm5, %v603_v54, -inf }
 0x315   : > { %617 = vmax.xlane.f32.xlu0 %v616_v55 }
 0x319   : > { %v557_v56 = vpop.f32.mrf.mxu2 }
 0x31a   : > { %v610_v57 = vsel %vm518_vm5, %v557_v56, -inf }
 0x31b   : > { %611 = vmax.xlane.f32.xlu1 %v610_v57  ;;  %v534_v58 = vpop.f32.mrf.mxu1  ;;  %v605_v59 = vpop.f32.mrf.mxu0 }
 0x31c   : > { %v607_v2 = vsel %vm518_vm5, %v534_v58, -inf }
 0x321   : > { %v559_v60 = vpop.f32.mrf.mxu2 }
 0x323   : > { %v536_v61 = vpop.f32.mrf.mxu1 }
 0x329   : > { %677 = vrot.lane.b32.xlu0 %v539_v40, %s1324_s29 }
 0x339   : > { %v580_v62 = vpop.f32.mrf.mxu3 }
 0x33a   : > { %v613_v63 = vsel %vm518_vm5, %v580_v62, -inf }
 0x33b   : > { %614 = vmax.xlane.f32.xlu2 %v613_v63 }
 0x341   : > { %v582_v1 = vpop.f32.mrf.mxu3 }
 0x343   : > { %608 = vmax.xlane.f32.xlu2 %v607_v2  ;;  %v1128_v2 = vld [vmem:[%s1644_s4 + $0x8] sm:$0xff] }
 0x388   : > { %v618_v3 = vpop.xlane.xlu0 %617 }
 0x389   : > { %v622_v4 = vsub.f32 %v603_v54, %v618_v3  ;;  %v1127_v3 = vld [vmem:[%s1644_s4] sm:$0xff] }
 0x38b   : > { %v629_v5 = vmul.f32 1.442695, %v622_v4 }
 0x38d   : > { %1201 = vpow2.f32 %v629_v5 }
 0x38e   : > { %v612_v6 = vpop.xlane.xlu1 %611 }
 0x38f   : > { %v620_v7 = vsub.f32 %v557_v56, %v612_v6 }
 0x391   : > { %v625_v9 = vmul.f32 1.442695, %v620_v7 }
 0x393   : > { %v1202_v10 = vpop.eup %1201  ;;  %1203 = vpow2.f32 %v625_v9 }
 0x394   : > { %v640_v11 = vsel %vm518_vm5, %v1202_v10, 0.0 }
 0x395   : > { %641 = vadd.xlane.f32.xlu1 %v640_v11 }
 0x399   : > { %v1204_v12 = vpop.eup %1203 }
 0x39a   : > { %v634_v14 = vsel %vm518_vm5, %v1204_v12, 0.0 }
 0x39b   : > { %v678_v13 = vpop.permute.xlu0 %677 }
 0x39c   : > { %v683_v15 = vsel %vm660_vm6, %v678_v13, 0 }
 0x39d   : > { %635 = vadd.xlane.f32.xlu1 %v634_v14  ;;  %692 = vmatpush.bf16.msrb.mxu2 %v683_v15 }
 0x3ae   : > { %v615_v16 = vpop.xlane.xlu2 %614 }
 0x3af   : > { %v621_v17 = vsub.f32 %v580_v62, %v615_v16 }
 0x3b1   : > { %v627_v18 = vmul.f32 1.442695, %v621_v17 }
 0x3b3   : > { %1205 = vpow2.f32 %v627_v18 }
 0x3b6   : > { %v609_v19 = vpop.xlane.xlu2 %608  ;;  %719 = vrot.lane.b32.xlu1 %v1512_v37, %s1324_s29 }
 0x3b7   : > { %v619_v20 = vsub.f32 %v534_v58, %v609_v19 }
 0x3b9   : > { %v1206_v21 = vpop.eup %1205  ;;  %v623_v22 = vmul.f32 1.442695, %v619_v20 }
 0x3ba   : > { %v637_v23 = vsel %vm518_vm5, %v1206_v21, 0.0 }
 0x3bb   : > { %1207 = vpow2.f32 %v623_v22  ;;  %638 = vadd.xlane.f32.xlu2 %v637_v23  ;;  %v1129_v23 = vld [vmem:[%s1648_s8] sm:$0xff] }
 0x3c1   : > { %v1208_v24 = vpop.eup %1207 }
 0x3c2   : > { %v631_v25 = vsel %vm518_vm5, %v1208_v24, 0.0 }
 0x3c3   : > { %632 = vadd.xlane.f32.xlu0 %v631_v25 }
 0x3d3   : > { %698 = vrot.lane.b32.xlu2 %v1515_v44, %s1324_s29 }
 0x3db   : > { %655 = vrot.lane.b32.xlu2 %v1517_v45, %s1324_s29 }
 0x408   : > { %v642_v26 = vpop.xlane.xlu1 %641 }
 0x410   : > { %v636_v27 = vpop.xlane.xlu1 %635 }
 0x411   : > { %1209 = vrcp.f32 %v636_v27 }
 0x412   : > { %1211 = vrcp.f32 %v642_v26 }
 0x417   : > { %v1210_v28 = vpop.eup %1209 }
 0x418   : > { %v648_v29 = vmul.f32 %v1210_v28, %v1204_v12  ;;  %v1212_v31 = vpop.eup %1211  ;;  %v1192_v12 = vld [vmem:[%s1645_s5] ss:$0 sm:$0xff] }
 0x419   : > { %v650_v32 = vmul.f32 %v1212_v31, %v1202_v10 }
 0x41a   : > { %v652_v30 = vpack.c.bf16 %v648_v29, %v648_v29 }
 0x41b   : > { %v654_v35 = vpack.c.bf16 %v650_v32, %v650_v32 }
 0x41c   : > { %1082 = vmatmul.msk.bf16.vlgmr.msrb.gmra.mxu2 %vm518_vm5, %v652_v30 }
 0x428   : > { %v720_v33 = vpop.permute.xlu1 %719 }
 0x429   : > { %v725_v34 = vsel %vm660_vm6, %v720_v33, 0  ;;  %v1193_v33 = vld [vmem:[%s1646_s6] ss:$0 sm:$0xff] }
 0x42a   : > { %734 = vmatpush.bf16.msra.mxu0 %v725_v34 }
 0x42d   : > { %1084 = vmatmul.msk.bf16.vlgmr.msra.gmra.mxu0 %vm518_vm5, %v654_v35 }
 0x42e   : > { %v639_v36 = vpop.xlane.xlu2 %638 }
 0x42f   : > { %1213 = vrcp.f32 %v639_v36 }
 0x435   : > { %v1214_v37 = vpop.eup %1213 }
 0x436   : > { %v649_v38 = vmul.f32 %v1214_v37, %v1206_v21  ;;  %v699_v39 = vpop.permute.xlu2 %698  ;;  %v633_v40 = vpop.xlane.xlu0 %632 }
 0x437   : > { %1215 = vrcp.f32 %v633_v40  ;;  %v704_v41 = vsel %vm660_vm6, %v699_v39, 0  ;;  %v1195_v39 = vld [vmem:[%s1649_s9] ss:$0 sm:$0xff] }
 0x438   : > { %713 = vmatpush.bf16.msrb.mxu3 %v704_v41  ;;  %v653_v42 = vpack.c.bf16 %v649_v38, %v649_v38 }
 0x43b   : > { %1083 = vmatmul.msk.bf16.vlgmr.msrb.gmra.mxu3 %vm518_vm5, %v653_v42 }
 0x43d   : > { %v1216_v43 = vpop.eup %1215 }
 0x43e   : > { %v647_v44 = vmul.f32 %v1216_v43, %v1208_v24  ;;  %v656_v45 = vpop.permute.xlu2 %655 }
 0x43f   : > { %v662_v46 = vsel %vm660_vm6, %v656_v45, 0 }
 0x440   : > { %v651_v47 = vpack.c.bf16 %v647_v44, %v647_v44  ;;  %671 = vmatpush.bf16.msrb.mxu1 %v662_v46  ;;  %v1134_v46 = vld [vmem:[%s1650_s10 + $0x18] sm:$0xff] }
 0x441   : > { %963 = vmatpush.bf16.msra.mxu3 %v1134_v46 }
 0x443   : > { %1081 = vmatmul.msk.bf16.vlgmr.msrb.gmra.mxu1 %vm518_vm5, %v651_v47 }
 0x444   : > { %792 = vmatpush.bf16.msra.mxu1 %v1128_v2 }
 0x448   : > { %793 = vmatpush.bf16.msra.mxu1 %v1127_v3 }
 0x49f   : > { %v694_v48 = vpop.f32.mrf.mxu2 }
 0x4a0   : > { %v741_v49 = vpack.c.bf16 %v694_v48, %v694_v48 }
 0x4a2   : > { %v745_v50 = vunpack.c.l.b16 %v741_v49 }
 0x4a4   : > { %v746_v51 = vpack.c.b16 %v745_v50, %v745_v50 }
 0x4a6   : > { %747 = vrot.lane.b32.xlu1 %v746_v51, %s1325_s21  ;;  %v1133_v51 = vld [vmem:[%s1650_s10 + $0x10] sm:$0xff] }
 0x4a7   : > { %v696_v52 = vpop.f32.mrf.mxu2  ;;  %964 = vmatpush.bf16.msra.mxu3 %v1133_v51 }
 0x4aa   : > { %v736_v53 = vpop.f32.mrf.mxu0 }
 0x4ab   : > { %v743_v54 = vpack.c.bf16 %v736_v53, %v736_v53 }
 0x4ad   : > { %v755_v55 = vunpack.c.l.b16 %v743_v54 }
 0x4af   : > { %v756_v56 = vpack.c.b16 %v755_v55, %v755_v55 }
 0x4b1   : > { %757 = vrot.lane.b32.xlu1 %v756_v56, %s1326_s23  ;;  %v1132_v56 = vld [vmem:[%s1650_s10 + $0x8] sm:$0xff]  ;;  %s1122_s23 = sshll.u32 %s1414_s25, 3  ;;  %s975_s25 = scalar_lea.sflag [#allocation4], %s1479_s17 }
 0x4b2   : > { %v738_v57 = vpop.f32.mrf.mxu0  ;;  %965 = vmatpush.bf16.msra.mxu3 %v1132_v56  ;;  %s985_s19 = scalar_lea.hbm %s1652_s12, %s1122_s23 }
 0x4b3   : > { %s989_s28 = sshll.u32 %s985_s19, 4  ;;  %s990_s28 = int_to_ptr.hbm [resolvable:$true] %s989_s28 }
 0x4b4   : > { %s1265_s16 = sshra.s32 %s990_s28, 4  ;;  %s1266_s16 = int_to_ptr.hbm [resolvable:$true] %s1265_s16 }
 0x4b5   : > { %s1267_s29 = scalar_lea.hbm %s1266_s16, 8  ;;  %p1272_p0 = scmp.lt.s32.totalorder %s1266_s16, %s1652_s12 }
 0x4b6   : > { %p1268_p6 = scmp.ne.s32.totalorder %s1266_s16, %s1267_s29  ;;  %p1273_p1 = scmp.lt.s32.totalorder %s1271_s15, %s1267_s29 }
 0x4b8   : > { %p1269_p9 = pnand %p1268_p6, %p1443_p11  ;;  %p1274_p3 = por %p1273_p1, %p1272_p0 }
 0x4ba   : > { %p1270_p13 = pneg %p1269_p9 }
 0x4bc   : > { %p1275_p4 = pnand %p1274_p3, %p1270_p13 }
 0x4be   : > { %v715_v58 = vpop.f32.mrf.mxu3 }
 0x4bf   : > { %v742_v59 = vpack.c.bf16 %v715_v58, %v715_v58 }
 0x4c0   : > { %v673_v60 = vpop.f32.mrf.mxu1 }
 0x4c1   : > { %v750_v61 = vunpack.c.l.b16 %v742_v59  ;;  %v740_v5 = vpack.c.bf16 %v673_v60, %v673_v60  ;;  %v1131_v60 = vld [vmem:[%s1650_s10] sm:$0xff] }
 0x4c2   : > { %966 = vmatpush.bf16.msra.mxu3 %v1131_v60 }
 0x4c3   : > { %v751_v62 = vpack.c.b16 %v750_v61, %v750_v61 }
 0x4c5   : > { %752 = vrot.lane.b32.xlu2 %v751_v62, %s1327_s27 }
 0x4c6   : > { %v717_v63 = vpop.f32.mrf.mxu3 }
 0x4c8   : > { %v675_v1 = vpop.f32.mrf.mxu1 }
 0x518   : > { %v748_v4 = vpop.permute.xlu1 %747 }
 0x519   : > { %v761_v7 = vsel %vm518_vm5, %v740_v5, %v748_v4 }
 0x51f   : > { %v753_v6 = vpop.permute.xlu2 %752 }
 0x520   : > { %v764_v9 = vsel %vm762_vm7, %v761_v7, %v753_v6 }
 0x523   : > { %v758_v10 = vpop.permute.xlu1 %757 }
 0x524   : > { %v767_v11 = vsel %vm765_vm8, %v764_v9, %v758_v10 }
 0x525   : > { %1093 = vmatmul.msk.bf16.vlgmr.msra.gmra.mxu1 %vm435_vm0, %v767_v11 }
 0x5a2   : > { %v795_v13 = vpop.f32.mrf.mxu1 }
 0x5a3   : > { %v799_v14 = vadd.f32 %v795_v13, %v1489_v0  ;;  %v1130_v0 = vld [vmem:[%s1648_s8 + $0x8] sm:$0xff] }
 0x5a4   : > { %867 = vmatpush.bf16.msra.mxu2 %v1130_v0 }
 0x5a5   : > { %v1564_v15 = vadd.f32 %v1192_v12, %v799_v14 }
 0x5a7   : > { %v807_v16 = vsel %vm435_vm0, %v1564_v15, 0.0 }
 0x5a8   : > { %808 = vadd.xlane.f32.xlu2 %v807_v16  ;;  %868 = vmatpush.bf16.msra.mxu2 %v1129_v23 }
 0x5aa   : > { %v797_v17 = vpop.f32.mrf.mxu1 }
 0x61b   : > { %v809_v18 = vpop.xlane.xlu2 %808 }
 0x61c   : > { %v810_v19 = vmul.f32 %v809_v18, %v1493_v8 }
 0x61e   : > { %v811_v20 = vsub.f32 %v1564_v15, %v810_v19 }
 0x620   : > { %v812_v21 = vmul.f32 %v811_v20, %v811_v20 }
 0x622   : > { %v813_v22 = vsel %vm435_vm0, %v812_v21, 0.0 }
 0x623   : > { %814 = vadd.xlane.f32.xlu1 %v813_v22 }
 0x696   : > { %v815_v24 = vpop.xlane.xlu1 %814 }
 0x697   : > { %v816_v25 = vmul.f32 %v815_v24, %v1493_v8  ;;  %v1194_v8 = vld [vmem:[%s1647_s7] ss:$0 sm:$0xff] }
 0x699   : > { %v817_v26 = vadd.f32 1e-05, %v816_v25  ;;  %v1196_v25 = vld [vmem:[%s1651_s11] ss:$0 sm:$0xff] }
 0x69b   : > { %1217 = vrsqrt.f32 %v817_v26  ;;  %vm824_vm10 = vweird.f32 %v817_v26 }
 0x6a1   : > { %v1218_v27 = vpop.eup %1217 }
 0x6a2   : > { %v819_v28 = vmul.f32 %v1218_v27, %v817_v26  ;;  %vm825_vm9 = vweird.f32 %v1218_v27 }
 0x6a3   : > { %vm826_vm11 = vmor %vm824_vm10, %vm825_vm9 }
 0x6a4   : > { %v820_v29 = vmul.f32 %v1218_v27, %v819_v28 }
 0x6a6   : > { %v821_v30 = vmul.f32 0.5, %v820_v29 }
 0x6a8   : > { %v822_v31 = vsub.f32 1.5, %v821_v30 }
 0x6aa   : > { %v823_v32 = vmul.f32 %v1218_v27, %v822_v31 }
 0x6ac   : > { %v827_v34 = vsel %vm826_vm11, %v1218_v27, %v823_v32 }
 0x6ad   : > { %v828_v35 = vmul.f32 %v827_v34, %v811_v20 }
 0x6af   : > { %v832_v36 = vmul.f32 %v1193_v33, %v828_v35 }
 0x6b1   : > { %v836_v37 = vadd.f32 %v1194_v8, %v832_v36 }
 0x6b3   : > { %v837_v38 = vpack.c.bf16 %v836_v37, %v836_v37 }
 0x6b5   : > { %1102 = vmatmul.msk.bf16.vlgmr.msra.gmra.mxu2 %vm435_vm0, %v837_v38 }
 0x738   : > { %v870_v40 = vpop.f32.mrf.mxu2 }
 0x739   : > { %v871_v41 = vadd.f32 %v1195_v39, %v870_v40 }
 0x73b   : > { %v875_v42 = vmul.f32 0.70710677, %v871_v41  ;;  %v874_v22 = vmul.f32 0.5, %v871_v41 }
 0x73d   : > { %v876_v43 = vmul.f32 %v875_v42, %v875_v42 }
 0x73f   : > { %v877_v44 = vmin.f32 %v876_v43, 16.0 }
 0x740   : > { %v872_v45 = vpop.f32.mrf.mxu2 }
 0x741   : > { %v878_v47 = vmul.f32 2.1237322e-06, %v877_v44  ;;  %v889_v48 = vmul.f32 3.8918573e-05, %v877_v44 }
 0x743   : > { %v879_v49 = vadd.f32 0.00028619796, %v878_v47  ;;  %v890_v50 = vadd.f32 0.001143296, %v889_v48 }
 0x745   : > { %v880_v52 = vmul.f32 %v879_v49, %v877_v44  ;;  %v891_v53 = vmul.f32 %v890_v50, %v877_v44 }
 0x747   : > { %v892_v54 = vadd.f32 0.014752088, %v891_v53  ;;  %v881_v55 = vadd.f32 0.0036580483, %v880_v52 }
 0x749   : > { %v893_v57 = vmul.f32 %v892_v54, %v877_v44  ;;  %v882_v59 = vmul.f32 %v881_v55, %v877_v44 }
 0x74b   : > { %v894_v58 = vadd.f32 0.112945676, %v893_v57  ;;  %v883_v63 = vadd.f32 0.05243302, %v882_v59 }
 0x74d   : > { %v895_v61 = vmul.f32 %v894_v58, %v877_v44  ;;  %v884_v3 = vmul.f32 %v883_v63, %v877_v44 }
 0x74f   : > { %v896_v62 = vadd.f32 0.4994258, %v895_v61  ;;  %v885_v4 = vadd.f32 0.18741608, %v884_v3 }
 0x751   : > { %v897_v1 = vmul.f32 %v896_v62, %v877_v44  ;;  %v886_v6 = vmul.f32 %v885_v4, %v877_v44 }
 0x753   : > { %v898_v2 = vadd.f32 1.0, %v897_v1  ;;  %v887_v11 = vadd.f32 1.1283791, %v886_v6 }
 0x755   : > { %1219 = vrcp.f32 %v898_v2  ;;  %v910_v10 = vand.u32 2147483648, %v898_v2  ;;  %v908_v13 = vand.u32 2147483647, %v898_v2  ;;  %vm904_vm13 = vweird.f32 %v898_v2 }
 0x756   : > { %v888_v17 = vmul.f32 %v887_v11, %v875_v42 }
 0x757   : > { %v911_v16 = vor.u32 1.1754944e-38, %v910_v10  ;;  %vm909_vm15 = vcmp.eq.f32.partialorder %v908_v13, 8.507059e+37 }
 0x75b   : > { %v1220_v5 = vpop.eup %1219 }
 0x75c   : > { %v900_v7 = vmul.f32 %v1220_v5, %v898_v2  ;;  %vm905_vm12 = vweird.f32 %v1220_v5 }
 0x75d   : > { %vm906_vm14 = vmor %vm904_vm13, %vm905_vm12 }
 0x75e   : > { %v901_v9 = vsub.f32 1.0, %v900_v7 }
 0x760   : > { %v902_v12 = vmul.f32 %v1220_v5, %v901_v9 }
 0x762   : > { %v903_v14 = vadd.f32 %v1220_v5, %v902_v12 }
 0x764   : > { %v907_v18 = vsel %vm906_vm14, %v1220_v5, %v903_v14 }
 0x765   : > { %v912_v19 = vsel %vm909_vm15, %v911_v16, %v907_v18 }
 0x766   : > { %v913_v20 = vmul.f32 %v912_v19, %v888_v17 }
 0x768   : > { %v1103_v21 = vclamps-f32 %v913_v20, 1.0 }
 0x76a   : > { %v916_v0 = vadd.f32 1.0, %v1103_v21 }
 0x76c   : > { %v917_v23 = vmul.f32 %v916_v0, %v874_v22 }
 0x76e   : > { %v918_v24 = vpack.c.bf16 %v917_v23, %v917_v23 }
 0x770   : > { %1120 = vmatmul.msk.bf16.vlgmr.msra.gmra.mxu3 %vm955_vm1, %v918_v24 }
 0x7f3   : > { %v968_v26 = vpop.f32.mrf.mxu3 }
 0x7f4   : > { %v969_v27 = vadd.f32 %v1196_v25, %v968_v26 }
 0x7f6   : > { %v972_v28 = vadd.f32 %v969_v27, %v1564_v15 }
 0x7f8   : > { %973 = vst.msk [vmem:[%s430_s13] sm:$0xff] %vm435_vm0, %v972_v28 }
 0x7f9   : > { %1278 = shalt.err (!%p1275_p4)
}
 0x7fa   : > { %1137 = dma.vmem_to_hbm [thread:$0]  (%p1443_p11), %s988_s20, 128, %s990_s28, %s975_s25  }
 0x7fb   : > { %v970_v15 = vpop.f32.mrf.mxu3 }
 0x7fc PF: > { %s1672_s17 = sld [smem:[#allocation8_spill]]  ;;  %p1674_p7 = scmp.ge.s32.totalorder %s1317_s24, 2 }
 0x7fe   : > { %p1144_p5 = pnand %p1674_p7, %p1447_p12 }
 0x800   : > { %p1145_p8 = pneg %p1144_p5 }
 0x802   : > { %s1001_s26 = sand.u32 1, %s1672_s17  }
 0x803   : > { %s1002_s19 = scalar_lea.sflag [#allocation4], %s1001_s26 }
 0x804   : > { %1300 = dma.done.wait (%p1145_p8), %s1002_s19, 128  }
 0x805   : > { %1302 = vsyncadd (%p1145_p8), %s1002_s19, 4294967168  ;;  %s1675_s24 = sld [smem:[#allocation10_spill]]  ;;  %s1678_s21 = smov %s1309_s22 }
 0x806   : > { %s1676_s13 = sld [smem:[#allocation9_spill]] }
 0x807   : > { %s1677_s23 = sld [smem:[#allocation11_spill]] }
 0x80b   : > { %p25_p10 = scmp.ge.s32.totalorder %s1675_s24, 4  }
 0x80c   : > { %s1679_s22 = smov %s1676_s13 }
 0x80d   :  { %27 = sbr.rel (!%p25_p10) target bundleno = 5 (0x5), region = 113 }
 0x812   :  { %1008 = vsyncpa [#allocation3], 1 }
 0x813   :  { %1010 = vsyncpa [#allocation3 + $0x1], 1 }
 0x814   :  { %1011 = vsyncpa [#allocation4], 1 }
 0x815   :  { %1013 = vsyncpa [#allocation4 + $0x1], 1 }

// kernel: transformer_forward.3
= control target key start
LH: loop header
LB: loop body
LE: loop exit
PB: predicated region body
PF: predicated region fallthrough
CT: control target
= control target key end

     0   :  { %17 = vsyncpa [#allocation3], 0  ;;  %s1640_s0 = inlined_call_operand.hbm [shape: f32[2,8,32], index: 0, kind: input, shape index: {}, may-alias: {0,12}]   ;;  %s1641_s1 = inlined_call_operand.vmem [shape: f32[1,32], index: 1, kind: input, shape index: {}]   ;;  %s1642_s2 = inlined_call_operand.vmem [shape: f32[1,32], index: 2, kind: input, shape index: {}]   ;;  %s1643_s3 = inlined_call_operand.vmem [shape: bf16[32,96], index: 3, kind: input, shape index: {}]   ;;  %s1644_s4 = inlined_call_operand.vmem [shape: bf16[32,32], index: 4, kind: input, shape index: {}]   ;;  %s1645_s5 = inlined_call_operand.vmem [shape: f32[1,32], index: 5, kind: input, shape index: {}]   ;;  %s1646_s6 = inlined_call_operand.vmem [shape: f32[1,32], index: 6, kind: input, shape index: {}]   ;;  %s1647_s7 = inlined_call_operand.vmem [shape: f32[1,32], index: 7, kind: input, shape index: {}]   ;;  %s1648_s8 = inlined_call_operand.vmem [shape: bf16[32,64], index: 8, kind: input, shape index: {}]   ;;  %s1649_s9 = inlined_call_operand.vmem [shape: f32[1,64], index: 9, kind: input, shape index: {}]   ;;  %s1650_s10 = inlined_call_operand.vmem [shape: bf16[64,32], index: 10, kind: input, shape index: {}]   ;;  %s1651_s11 = inlined_call_operand.vmem [shape: f32[1,32], index: 11, kind: input, shape index: {}]   ;;  %s1652_s12 = inlined_call_operand.hbm [shape: f32[2,8,32], index: 12, kind: output, shape index: {}, may-alias: {0,12}]  }
   0x1   :  { %19 = vsyncpa [#allocation3 + $0x1], 0 }
   0x2   :  { %20 = vsyncpa [#allocation4], 0 }
   0x3   :  { %22 = vsyncpa [#allocation4 + $0x1], 0  ;;  %s1393_s21 = smov 0   ;;  %s1395_s22 = smov 0  }
   0x4   :  { %s1397_s23 = smov 0   ;;  %s1399_s24 = smov 0  }
   0x5 LB: > { %1660 = sst [smem:[#allocation8_spill]] %s1305_s21  ;;  %s1414_s25 = sadd.s32 4294967295, %s1317_s24   ;;  %s1317_s24 = sphi %s1399_s24, %s1675_s24   ;;  %s1313_s23 = sphi %s1397_s23, %s1677_s23   ;;  %s1309_s22 = sphi %s1395_s22, %s1679_s22   ;;  %s1305_s21 = sphi %s1393_s21, %s1678_s21  }
   0x6   : > { %1661 = sst [smem:[#allocation9_spill]] %s1313_s23  ;;  %s1060_s26 = sadd.s32 4294967294, %s1317_s24  }
   0x7   : > { %s1418_s27 = sadd.s32 1, %s1317_s24   ;;  %s35_s28 = sadd.s32 1, %s1313_s23 }
   0x8   : > { %1662 = sst [smem:[#allocation10_spill]] %s1418_s27  ;;  %s32_s29 = ssub.s32 %s1317_s24, %s1418_s27 }
   0x9   : > { %p42_p0 = scmp.ne.s32.totalorder %s1313_s23, %s1309_s22  ;;  %p33_p1 = scmp.eq.s32.totalorder %s32_s29, 0 }
   0xa   : > { %p43_p2 = scmp.eq.s32.totalorder %s1317_s24, 0  ;;  %p48_p3 = scmp.ne.s32.totalorder %s1309_s22, %s1305_s21 }
   0xb   : > { %p49_p4 = scmp.eq.s32.totalorder %s1414_s25, 0  ;;  %p303_p7 = scmp.eq.s32.totalorder %s1414_s25, 1 }
   0xc   : > { %s1430_s30 = scalar_select %p33_p1, %s1313_s23, %s35_s28  }
   0xd   : > { %p1432_p5 = por %p43_p2, %p42_p0  ;;  %p1436_p6 = por %p49_p4, %p48_p3 }
   0xe   : > { %1663 = sst [smem:[#allocation11_spill]] %s1430_s30  ;;  %p309_p8 = scmp.eq.s32.totalorder %s1060_s26, 1 }
   0xf   : > { %p1147_p10 = scmp.lt.s32.totalorder %s1317_s24, 2  ;;  %p1443_p11 = por %p303_p7, %p42_p0 }
  0x10   : > { %p1447_p12 = por %p309_p8, %p48_p3  ;;  %s362_s17 = sand.u32 1, %s1313_s23  }
  0x11   : > { %s1666_s15 = scalar_select %p1443_p11, 1, 0 }
  0x12   : > { %s1668_s16 = scalar_select %p1447_p12, 1, 0 }
  0x13   : > { %1667 = sst [smem:[#allocation12_spill]] %s1666_s15  ;;  %s1064_s18 = sshll.u32 %s1317_s24, 3 }
  0x14   : > { %1669 = sst [smem:[#allocation13_spill]] %s1668_s16  ;;  %s1063_s19 = sshll.u32 %s362_s17, 3 }
  0x15   : > { %s370_s29 = scalar_lea.hbm %s1640_s0, %s1064_s18  ;;  %s366_s26 = scalar_lea.vmem [#allocation2], %s1063_s19 }
  0x16   : > { %s372_s30 = sshll.u32 %s370_s29, 4  ;;  %s374_s27 = sshll.u32 %s366_s26, 4  ;;  %s373_s30 = int_to_ptr.hbm [resolvable:$true] %s372_s30  ;;  %s375_s27 = int_to_ptr.vmem [resolvable:$true] %s374_s27 }
  0x17   : > { %p1458_p13 = pnand %p1147_p10, %p1432_p5  ;;  %p1065_p0 = scmp.ge.s32.totalorder %s1317_s24, 1 }
  0x18   : > { %p379_p1 = scmp.lt.s32.totalorder %s1317_s24, 3  ;;  %s363_s23 = scalar_lea.sflag [#allocation3], %s362_s17 }
  0x19   : > { %s1221_s16 = sshra.s32 %s373_s30, 4  ;;  %p1225_p3 = pneg %p1458_p13  ;;  %s1222_s16 = int_to_ptr.hbm [resolvable:$true] %s1221_s16 }
  0x1a   : > { %s1223_s15 = scalar_lea.hbm %s1222_s16, 8  ;;  %s1228_s13 = scalar_lea.hbm %s1640_s0, 16 }
  0x1b   : > { %p1224_p2 = scmp.ne.s32.totalorder %s1222_s16, %s1223_s15  ;;  %p1229_p5 = scmp.lt.s32.totalorder %s1222_s16, %s1640_s0 }
  0x1c   : > { %p1230_p8 = scmp.lt.s32.totalorder %s1228_s13, %s1223_s15 }
  0x1d   : > { %p1226_p4 = pnand %p1225_p3, %p1224_p2 }
  0x1e   : > { %p1231_p10 = por %p1230_p8, %p1229_p5 }
  0x1f   : > { %p1227_p7 = pneg %p1226_p4 }
  0x21   : > { %p1232_p9 = pnand %p1231_p10, %p1227_p7 }
  0x23   : > { %1235 = shalt.err (!%p1232_p9)
}
  0x24   : > { %1142 = dma.hbm_to_vmem [thread:$0]  (!%p1458_p13), %s373_s30, 128, %s375_s27, %s363_s23  }
  0x25   : > { %p380_p2 = pnand %p1065_p0, %p379_p1 }
  0x26   : > { %s1479_s17 = sand.u32 (!%p380_p2), 1, %s1309_s22  }
  0x27   : > { %383 = sbr.rel (%p380_p2) target bundleno = 2044 (0x7fc), region = 68  ;;  %s1066_s15 = sshll.u32 (!%p380_p2), %s1479_s17, 3 }
  0x28   : > { %s386_s16 = scalar_lea.sflag (!%p380_p2), [#allocation3], %s1479_s17  ;;  %s389_s29 = scalar_lea.vmem (!%p380_p2), [#allocation2], %s1066_s15 }
  0x2c   : > { %1296 = dma.done.wait (%p1436_p6), %s386_s16, 128  }
  0x2d   : > { %1298 = vsyncadd (%p1436_p6), %s386_s16, 4294967168  ;;  %vm435_vm0 = vcmask 261120   ;;  %v1489_v0 = vld [vmem:[%s389_s29] sm:$0xff]  ;;  %v1319_v2 = vmov 32.0   ;;  %s1320_s13 = smov 104   ;;  %s1321_s20 = smov 120  }
  0x2e   : > { %v436_v1 = vsel %vm435_vm0, %v1489_v0, 0.0  ;;  %1197 = vrcp.f32 %v1319_v2  ;;  %v1126_v14 = vld [vmem:[%s1643_s3 + $0x8] sm:$0xff]  ;;  %v1125_v15 = vld [vmem:[%s1643_s3] sm:$0xff]  ;;  %s1322_s28 = smov 112   ;;  %s1323_s16 = smov 96   ;;  %vm518_vm5 = vcmask 64512  }
  0x2f   : > { %437 = vadd.xlane.f32.xlu0 %v436_v1  ;;  %499 = vmatpush.bf16.msra.mxu0 %v1126_v14  ;;  %v1190_v25 = vld [vmem:[%s1641_s1] ss:$0 sm:$0xff]  ;;  %s1324_s29 = smov 64   ;;  %vm660_vm6 = vcmask 1043456   ;;  %s1325_s21 = smov 8   ;;  %vm762_vm7 = vcmask 130048  }
  0x30   : > { %v1191_v28 = vld [vmem:[%s1642_s2] ss:$0 sm:$0xff]  ;;  %s1326_s23 = smov 24   ;;  %s1327_s27 = smov 16   ;;  %vm765_vm8 = vcmask 195584  }
  0x33   : > { %500 = vmatpush.bf16.msra.mxu0 %v1125_v15 }
  0x34   : > { %v1198_v3 = vpop.eup %1197 }
  0x35   : > { %v440_v4 = vmul.f32 32.0, %v1198_v3  ;;  %vm444_vm1 = vweird.f32 %v1198_v3 }
  0x37   : > { %v441_v5 = vsub.f32 1.0, %v440_v4 }
  0x39   : > { %v442_v6 = vmul.f32 %v1198_v3, %v441_v5 }
  0x3b   : > { %v443_v7 = vadd.f32 %v1198_v3, %v442_v6 }
  0x3d   : > { %v1493_v8 = vsel %vm444_vm1, %v1198_v3, %v443_v7  ;;  %vm955_vm1 = vcmask 523264  }
  0xa2   : > { %v438_v9 = vpop.xlane.xlu0 %437 }
  0xa3   : > { %v446_v10 = vmul.f32 %v1493_v8, %v438_v9 }
  0xa5   : > { %v447_v11 = vsub.f32 %v1489_v0, %v446_v10 }
  0xa7   : > { %v448_v12 = vmul.f32 %v447_v11, %v447_v11 }
  0xa9   : > { %v449_v13 = vsel %vm435_vm0, %v448_v12, 0.0 }
  0xaa   : > { %450 = vadd.xlane.f32.xlu0 %v449_v13 }
 0x11d   : > { %v451_v16 = vpop.xlane.xlu0 %450 }
 0x11e   : > { %v452_v17 = vmul.f32 %v451_v16, %v1493_v8 }
 0x120   : > { %v453_v18 = vadd.f32 1e-05, %v452_v17 }
 0x122   : > { %1199 = vrsqrt.f32 %v453_v18  ;;  %vm460_vm3 = vweird.f32 %v453_v18 }
 0x128   : > { %v1200_v19 = vpop.eup %1199 }
 0x129   : > { %v455_v20 = vmul.f32 %v1200_v19, %v453_v18  ;;  %vm461_vm2 = vweird.f32 %v1200_v19 }
 0x12a   : > { %vm462_vm4 = vmor %vm460_vm3, %vm461_vm2 }
 0x12b   : > { %v456_v21 = vmul.f32 %v1200_v19, %v455_v20 }
 0x12d   : > { %v457_v22 = vmul.f32 0.5, %v456_v21 }
 0x12f   : > { %v458_v23 = vsub.f32 1.5, %v457_v22 }
 0x131   : > { %v459_v24 = vmul.f32 %v1200_v19, %v458_v23 }
 0x133   : > { %v463_v26 = vsel %vm462_vm4, %v1200_v19, %v459_v24 }
 0x134   : > { %v464_v27 = vmul.f32 %v463_v26, %v447_v11 }
 0x136   : > { %v468_v29 = vmul.f32 %v1190_v25, %v464_v27 }
 0x138   : > { %v472_v30 = vadd.f32 %v1191_v28, %v468_v29 }
 0x13a   : > { %v473_v31 = vpack.c.bf16 %v472_v30, %v472_v30 }
 0x13c   : > { %1076 = vmatmul.msk.bf16.vlgmr.msra.gmra.mxu0 %vm435_vm0, %v473_v31 }
 0x1b9   : > { %v502_v32 = vpop.f32.mrf.mxu0 }
 0x1ba   : > { %v506_v33 = vpack.c.bf16 %v502_v32, %v502_v32 }
 0x1bc   : > { %512 = vrot.lane.b32.xlu2 %v506_v33, %s1320_s13  ;;  %508 = vrot.lane.b32.xlu1 %v506_v33, %s1321_s20  ;;  %v514_v41 = vunpack.c.l.b16 %v506_v33  ;;  %s430_s13 = scalar_lea.vmem [#allocation5], %s1066_s15  ;;  %s1271_s15 = scalar_lea.hbm %s1652_s12, 16 }
 0x1bd   : > { %s987_s20 = sshll.u32 %s430_s13, 4  ;;  %s988_s20 = int_to_ptr.vmem [resolvable:$true] %s987_s20 }
 0x1be   : > { %v1517_v45 = vpack.c.b16 %v514_v41, %v514_v41 }
 0x1c1   : > { %v504_v34 = vpop.f32.mrf.mxu0 }
 0x1c4   : > { %510 = vrot.lane.b32.xlu1 %v506_v33, %s1322_s28 }
 0x216   : > { %v513_v35 = vpop.permute.xlu2 %512 }
 0x217   : > { %v584_v36 = vunpack.c.l.b16 %v513_v35 }
 0x219   : > { %v1512_v37 = vpack.c.b16 %v584_v36, %v584_v36 }
 0x21b   : > { %586 = vrot.lane.b32.xlu1 %v1512_v37, %s1323_s16 }
 0x22e   : > { %v509_v38 = vpop.permute.xlu1 %508 }
 0x22f   : > { %v538_v39 = vunpack.c.l.b16 %v509_v38 }
 0x231   : > { %v539_v40 = vpack.c.b16 %v538_v39, %v538_v39 }
 0x233   : > { %540 = vrot.lane.b32.xlu2 %v539_v40, %s1323_s16 }
 0x236   : > { %v511_v42 = vpop.permute.xlu1 %510 }
 0x237   : > { %v561_v43 = vunpack.c.l.b16 %v511_v42 }
 0x239   : > { %v1515_v44 = vpack.c.b16 %v561_v43, %v561_v43 }
 0x23b   : > { %563 = vrot.lane.b32.xlu0 %v1515_v44, %s1323_s16  ;;  %516 = vrot.lane.b32.xlu2 %v1517_v45, %s1323_s16 }
 0x28d   : > { %v541_v46 = vpop.permute.xlu2 %540  ;;  %v587_v47 = vpop.permute.xlu1 %586 }
 0x28e   : > { %v546_v48 = vsel %vm518_vm5, %v541_v46, 0  ;;  %v592_v49 = vsel %vm518_vm5, %v587_v47, 0 }
 0x28f   : > { %555 = vmatpush.bf16.xpose.msra.mxu2 %v546_v48  ;;  %601 = vmatpush.bf16.xpose.msrb.mxu0 %v592_v49 }
 0x295   : > { %v517_v50 = vpop.permute.xlu2 %516 }
 0x296   : > { %1078 = vmatmul.msk.bf16.vlgmr.msra.gmra.mxu2 %vm518_vm5, %v509_v38  ;;  %1080 = vmatmul.msk.bf16.vlgmr.msrb.gmra.mxu0 %vm518_vm5, %v513_v35  ;;  %v523_v51 = vsel %vm518_vm5, %v517_v50, 0 }
 0x297   : > { %532 = vmatpush.bf16.xpose.msra.mxu1 %v523_v51 }
 0x29e   : > { %1077 = vmatmul.msk.bf16.vlgmr.msra.gmra.mxu1 %vm518_vm5, %v506_v33 }
 0x2ad   : > { %v564_v52 = vpop.permute.xlu0 %563 }
 0x2ae   : > { %v569_v53 = vsel %vm518_vm5, %v564_v52, 0 }
 0x2af   : > { %578 = vmatpush.bf16.xpose.msra.mxu3 %v569_v53 }
 0x2b6   : > { %1079 = vmatmul.msk.bf16.vlgmr.msra.gmra.mxu3 %vm518_vm5, %v511_v42 }
 0x313   : > { %v603_v54 = vpop.f32.mrf.mxu0 }
 0x314   : > { %v616_v55 = vsel %vm518_vm5, %v603_v54, -inf }
 0x315   : > { %617 = vmax.xlane.f32.xlu0 %v616_v55 }
 0x319   : > { %v557_v56 = vpop.f32.mrf.mxu2 }
 0x31a   : > { %v610_v57 = vsel %vm518_vm5, %v557_v56, -inf }
 0x31b   : > { %611 = vmax.xlane.f32.xlu1 %v610_v57  ;;  %v534_v58 = vpop.f32.mrf.mxu1  ;;  %v605_v59 = vpop.f32.mrf.mxu0 }
 0x31c   : > { %v607_v2 = vsel %vm518_vm5, %v534_v58, -inf }
 0x321   : > { %v559_v60 = vpop.f32.mrf.mxu2 }
 0x323   : > { %v536_v61 = vpop.f32.mrf.mxu1 }
 0x329   : > { %677 = vrot.lane.b32.xlu0 %v539_v40, %s1324_s29 }
 0x339   : > { %v580_v62 = vpop.f32.mrf.mxu3 }
 0x33a   : > { %v613_v63 = vsel %vm518_vm5, %v580_v62, -inf }
 0x33b   : > { %614 = vmax.xlane.f32.xlu2 %v613_v63 }
 0x341   : > { %v582_v1 = vpop.f32.mrf.mxu3 }
 0x343   : > { %608 = vmax.xlane.f32.xlu2 %v607_v2  ;;  %v1128_v2 = vld [vmem:[%s1644_s4 + $0x8] sm:$0xff] }
 0x388   : > { %v618_v3 = vpop.xlane.xlu0 %617 }
 0x389   : > { %v622_v4 = vsub.f32 %v603_v54, %v618_v3  ;;  %v1127_v3 = vld [vmem:[%s1644_s4] sm:$0xff] }
 0x38b   : > { %v629_v5 = vmul.f32 1.442695, %v622_v4 }
 0x38d   : > { %1201 = vpow2.f32 %v629_v5 }
 0x38e   : > { %v612_v6 = vpop.xlane.xlu1 %611 }
 0x38f   : > { %v620_v7 = vsub.f32 %v557_v56, %v612_v6 }
 0x391   : > { %v625_v9 = vmul.f32 1.442695, %v620_v7 }
 0x393   : > { %v1202_v10 = vpop.eup %1201  ;;  %1203 = vpow2.f32 %v625_v9 }
 0x394   : > { %v640_v11 = vsel %vm518_vm5, %v1202_v10, 0.0 }
 0x395   : > { %641 = vadd.xlane.f32.xlu1 %v640_v11 }
 0x399   : > { %v1204_v12 = vpop.eup %1203 }
 0x39a   : > { %v634_v14 = vsel %vm518_vm5, %v1204_v12, 0.0 }
 0x39b   : > { %v678_v13 = vpop.permute.xlu0 %677 }
 0x39c   : > { %v683_v15 = vsel %vm660_vm6, %v678_v13, 0 }
 0x39d   : > { %635 = vadd.xlane.f32.xlu1 %v634_v14  ;;  %692 = vmatpush.bf16.msrb.mxu2 %v683_v15 }
 0x3ae   : > { %v615_v16 = vpop.xlane.xlu2 %614 }
 0x3af   : > { %v621_v17 = vsub.f32 %v580_v62, %v615_v16 }
 0x3b1   : > { %v627_v18 = vmul.f32 1.442695, %v621_v17 }
 0x3b3   : > { %1205 = vpow2.f32 %v627_v18 }
 0x3b6   : > { %v609_v19 = vpop.xlane.xlu2 %608  ;;  %719 = vrot.lane.b32.xlu1 %v1512_v37, %s1324_s29 }
 0x3b7   : > { %v619_v20 = vsub.f32 %v534_v58, %v609_v19 }
 0x3b9   : > { %v1206_v21 = vpop.eup %1205  ;;  %v623_v22 = vmul.f32 1.442695, %v619_v20 }
 0x3ba   : > { %v637_v23 = vsel %vm518_vm5, %v1206_v21, 0.0 }
 0x3bb   : > { %1207 = vpow2.f32 %v623_v22  ;;  %638 = vadd.xlane.f32.xlu2 %v637_v23  ;;  %v1129_v23 = vld [vmem:[%s1648_s8] sm:$0xff] }
 0x3c1   : > { %v1208_v24 = vpop.eup %1207 }
 0x3c2   : > { %v631_v25 = vsel %vm518_vm5, %v1208_v24, 0.0 }
 0x3c3   : > { %632 = vadd.xlane.f32.xlu0 %v631_v25 }
 0x3d3   : > { %698 = vrot.lane.b32.xlu2 %v1515_v44, %s1324_s29 }
 0x3db   : > { %655 = vrot.lane.b32.xlu2 %v1517_v45, %s1324_s29 }
 0x408   : > { %v642_v26 = vpop.xlane.xlu1 %641 }
 0x410   : > { %v636_v27 = vpop.xlane.xlu1 %635 }
 0x411   : > { %1209 = vrcp.f32 %v636_v27 }
 0x412   : > { %1211 = vrcp.f32 %v642_v26 }
 0x417   : > { %v1210_v28 = vpop.eup %1209 }
 0x418   : > { %v648_v29 = vmul.f32 %v1210_v28, %v1204_v12  ;;  %v1212_v31 = vpop.eup %1211  ;;  %v1192_v12 = vld [vmem:[%s1645_s5] ss:$0 sm:$0xff] }
 0x419   : > { %v650_v32 = vmul.f32 %v1212_v31, %v1202_v10 }
 0x41a   : > { %v652_v30 = vpack.c.bf16 %v648_v29, %v648_v29 }
 0x41b   : > { %v654_v35 = vpack.c.bf16 %v650_v32, %v650_v32 }
 0x41c   : > { %1082 = vmatmul.msk.bf16.vlgmr.msrb.gmra.mxu2 %vm518_vm5, %v652_v30 }
 0x428   : > { %v720_v33 = vpop.permute.xlu1 %719 }
 0x429   : > { %v725_v34 = vsel %vm660_vm6, %v720_v33, 0  ;;  %v1193_v33 = vld [vmem:[%s1646_s6] ss:$0 sm:$0xff] }
 0x42a   : > { %734 = vmatpush.bf16.msra.mxu0 %v725_v34 }
 0x42d   : > { %1084 = vmatmul.msk.bf16.vlgmr.msra.gmra.mxu0 %vm518_vm5, %v654_v35 }
 0x42e   : > { %v639_v36 = vpop.xlane.xlu2 %638 }
 0x42f   : > { %1213 = vrcp.f32 %v639_v36 }
 0x435   : > { %v1214_v37 = vpop.eup %1213 }
 0x436   : > { %v649_v38 = vmul.f32 %v1214_v37, %v1206_v21  ;;  %v699_v39 = vpop.permute.xlu2 %698  ;;  %v633_v40 = vpop.xlane.xlu0 %632 }
 0x437   : > { %1215 = vrcp.f32 %v633_v40  ;;  %v704_v41 = vsel %vm660_vm6, %v699_v39, 0  ;;  %v1195_v39 = vld [vmem:[%s1649_s9] ss:$0 sm:$0xff] }
 0x438   : > { %713 = vmatpush.bf16.msrb.mxu3 %v704_v41  ;;  %v653_v42 = vpack.c.bf16 %v649_v38, %v649_v38 }
 0x43b   : > { %1083 = vmatmul.msk.bf16.vlgmr.msrb.gmra.mxu3 %vm518_vm5, %v653_v42 }
 0x43d   : > { %v1216_v43 = vpop.eup %1215 }
 0x43e   : > { %v647_v44 = vmul.f32 %v1216_v43, %v1208_v24  ;;  %v656_v45 = vpop.permute.xlu2 %655 }
 0x43f   : > { %v662_v46 = vsel %vm660_vm6, %v656_v45, 0 }
 0x440   : > { %v651_v47 = vpack.c.bf16 %v647_v44, %v647_v44  ;;  %671 = vmatpush.bf16.msrb.mxu1 %v662_v46  ;;  %v1134_v46 = vld [vmem:[%s1650_s10 + $0x18] sm:$0xff] }
 0x441   : > { %963 = vmatpush.bf16.msra.mxu3 %v1134_v46 }
 0x443   : > { %1081 = vmatmul.msk.bf16.vlgmr.msrb.gmra.mxu1 %vm518_vm5, %v651_v47 }
 0x444   : > { %792 = vmatpush.bf16.msra.mxu1 %v1128_v2 }
 0x448   : > { %793 = vmatpush.bf16.msra.mxu1 %v1127_v3 }
 0x49f   : > { %v694_v48 = vpop.f32.mrf.mxu2 }
 0x4a0   : > { %v741_v49 = vpack.c.bf16 %v694_v48, %v694_v48 }
 0x4a2   : > { %v745_v50 = vunpack.c.l.b16 %v741_v49 }
 0x4a4   : > { %v746_v51 = vpack.c.b16 %v745_v50, %v745_v50 }
 0x4a6   : > { %747 = vrot.lane.b32.xlu1 %v746_v51, %s1325_s21  ;;  %v1133_v51 = vld [vmem:[%s1650_s10 + $0x10] sm:$0xff] }
 0x4a7   : > { %v696_v52 = vpop.f32.mrf.mxu2  ;;  %964 = vmatpush.bf16.msra.mxu3 %v1133_v51 }
 0x4aa   : > { %v736_v53 = vpop.f32.mrf.mxu0 }
 0x4ab   : > { %v743_v54 = vpack.c.bf16 %v736_v53, %v736_v53 }
 0x4ad   : > { %v755_v55 = vunpack.c.l.b16 %v743_v54 }
 0x4af   : > { %v756_v56 = vpack.c.b16 %v755_v55, %v755_v55 }
 0x4b1   : > { %757 = vrot.lane.b32.xlu1 %v756_v56, %s1326_s23  ;;  %v1132_v56 = vld [vmem:[%s1650_s10 + $0x8] sm:$0xff]  ;;  %s1122_s23 = sshll.u32 %s1414_s25, 3  ;;  %s975_s25 = scalar_lea.sflag [#allocation4], %s1479_s17 }
 0x4b2   : > { %v738_v57 = vpop.f32.mrf.mxu0  ;;  %965 = vmatpush.bf16.msra.mxu3 %v1132_v56  ;;  %s985_s19 = scalar_lea.hbm %s1652_s12, %s1122_s23 }
 0x4b3   : > { %s989_s28 = sshll.u32 %s985_s19, 4  ;;  %s990_s28 = int_to_ptr.hbm [resolvable:$true] %s989_s28 }
 0x4b4   : > { %s1265_s16 = sshra.s32 %s990_s28, 4  ;;  %s1266_s16 = int_to_ptr.hbm [resolvable:$true] %s1265_s16 }
 0x4b5   : > { %s1267_s29 = scalar_lea.hbm %s1266_s16, 8  ;;  %p1272_p0 = scmp.lt.s32.totalorder %s1266_s16, %s1652_s12 }
 0x4b6   : > { %p1268_p6 = scmp.ne.s32.totalorder %s1266_s16, %s1267_s29  ;;  %p1273_p1 = scmp.lt.s32.totalorder %s1271_s15, %s1267_s29 }
 0x4b8   : > { %p1269_p9 = pnand %p1268_p6, %p1443_p11  ;;  %p1274_p3 = por %p1273_p1, %p1272_p0 }
 0x4ba   : > { %p1270_p13 = pneg %p1269_p9 }
 0x4bc   : > { %p1275_p4 = pnand %p1274_p3, %p1270_p13 }
 0x4be   : > { %v715_v58 = vpop.f32.mrf.mxu3 }
 0x4bf   : > { %v742_v59 = vpack.c.bf16 %v715_v58, %v715_v58 }
 0x4c0   : > { %v673_v60 = vpop.f32.mrf.mxu1 }
 0x4c1   : > { %v750_v61 = vunpack.c.l.b16 %v742_v59  ;;  %v740_v5 = vpack.c.bf16 %v673_v60, %v673_v60  ;;  %v1131_v60 = vld [vmem:[%s1650_s10] sm:$0xff] }
 0x4c2   : > { %966 = vmatpush.bf16.msra.mxu3 %v1131_v60 }
 0x4c3   : > { %v751_v62 = vpack.c.b16 %v750_v61, %v750_v61 }
 0x4c5   : > { %752 = vrot.lane.b32.xlu2 %v751_v62, %s1327_s27 }
 0x4c6   : > { %v717_v63 = vpop.f32.mrf.mxu3 }
 0x4c8   : > { %v675_v1 = vpop.f32.mrf.mxu1 }
 0x518   : > { %v748_v4 = vpop.permute.xlu1 %747 }
 0x519   : > { %v761_v7 = vsel %vm518_vm5, %v740_v5, %v748_v4 }
 0x51f   : > { %v753_v6 = vpop.permute.xlu2 %752 }
 0x520   : > { %v764_v9 = vsel %vm762_vm7, %v761_v7, %v753_v6 }
 0x523   : > { %v758_v10 = vpop.permute.xlu1 %757 }
 0x524   : > { %v767_v11 = vsel %vm765_vm8, %v764_v9, %v758_v10 }
 0x525   : > { %1093 = vmatmul.msk.bf16.vlgmr.msra.gmra.mxu1 %vm435_vm0, %v767_v11 }
 0x5a2   : > { %v795_v13 = vpop.f32.mrf.mxu1 }
 0x5a3   : > { %v799_v14 = vadd.f32 %v795_v13, %v1489_v0  ;;  %v1130_v0 = vld [vmem:[%s1648_s8 + $0x8] sm:$0xff] }
 0x5a4   : > { %867 = vmatpush.bf16.msra.mxu2 %v1130_v0 }
 0x5a5   : > { %v1564_v15 = vadd.f32 %v1192_v12, %v799_v14 }
 0x5a7   : > { %v807_v16 = vsel %vm435_vm0, %v1564_v15, 0.0 }
 0x5a8   : > { %808 = vadd.xlane.f32.xlu2 %v807_v16  ;;  %868 = vmatpush.bf16.msra.mxu2 %v1129_v23 }
 0x5aa   : > { %v797_v17 = vpop.f32.mrf.mxu1 }
 0x61b   : > { %v809_v18 = vpop.xlane.xlu2 %808 }
 0x61c   : > { %v810_v19 = vmul.f32 %v809_v18, %v1493_v8 }
 0x61e   : > { %v811_v20 = vsub.f32 %v1564_v15, %v810_v19 }
 0x620   : > { %v812_v21 = vmul.f32 %v811_v20, %v811_v20 }
 0x622   : > { %v813_v22 = vsel %vm435_vm0, %v812_v21, 0.0 }
 0x623   : > { %814 = vadd.xlane.f32.xlu1 %v813_v22 }
 0x696   : > { %v815_v24 = vpop.xlane.xlu1 %814 }
 0x697   : > { %v816_v25 = vmul.f32 %v815_v24, %v1493_v8  ;;  %v1194_v8 = vld [vmem:[%s1647_s7] ss:$0 sm:$0xff] }
 0x699   : > { %v817_v26 = vadd.f32 1e-05, %v816_v25  ;;  %v1196_v25 = vld [vmem:[%s1651_s11] ss:$0 sm:$0xff] }
 0x69b   : > { %1217 = vrsqrt.f32 %v817_v26  ;;  %vm824_vm10 = vweird.f32 %v817_v26 }
 0x6a1   : > { %v1218_v27 = vpop.eup %1217 }
 0x6a2   : > { %v819_v28 = vmul.f32 %v1218_v27, %v817_v26  ;;  %vm825_vm9 = vweird.f32 %v1218_v27 }
 0x6a3   : > { %vm826_vm11 = vmor %vm824_vm10, %vm825_vm9 }
 0x6a4   : > { %v820_v29 = vmul.f32 %v1218_v27, %v819_v28 }
 0x6a6   : > { %v821_v30 = vmul.f32 0.5, %v820_v29 }
 0x6a8   : > { %v822_v31 = vsub.f32 1.5, %v821_v30 }
 0x6aa   : > { %v823_v32 = vmul.f32 %v1218_v27, %v822_v31 }
 0x6ac   : > { %v827_v34 = vsel %vm826_vm11, %v1218_v27, %v823_v32 }
 0x6ad   : > { %v828_v35 = vmul.f32 %v827_v34, %v811_v20 }
 0x6af   : > { %v832_v36 = vmul.f32 %v1193_v33, %v828_v35 }
 0x6b1   : > { %v836_v37 = vadd.f32 %v1194_v8, %v832_v36 }
 0x6b3   : > { %v837_v38 = vpack.c.bf16 %v836_v37, %v836_v37 }
 0x6b5   : > { %1102 = vmatmul.msk.bf16.vlgmr.msra.gmra.mxu2 %vm435_vm0, %v837_v38 }
 0x738   : > { %v870_v40 = vpop.f32.mrf.mxu2 }
 0x739   : > { %v871_v41 = vadd.f32 %v1195_v39, %v870_v40 }
 0x73b   : > { %v875_v42 = vmul.f32 0.70710677, %v871_v41  ;;  %v874_v22 = vmul.f32 0.5, %v871_v41 }
 0x73d   : > { %v876_v43 = vmul.f32 %v875_v42, %v875_v42 }
 0x73f   : > { %v877_v44 = vmin.f32 %v876_v43, 16.0 }
 0x740   : > { %v872_v45 = vpop.f32.mrf.mxu2 }
 0x741   : > { %v878_v47 = vmul.f32 2.1237322e-06, %v877_v44  ;;  %v889_v48 = vmul.f32 3.8918573e-05, %v877_v44 }
 0x743   : > { %v879_v49 = vadd.f32 0.00028619796, %v878_v47  ;;  %v890_v50 = vadd.f32 0.001143296, %v889_v48 }
 0x745   : > { %v880_v52 = vmul.f32 %v879_v49, %v877_v44  ;;  %v891_v53 = vmul.f32 %v890_v50, %v877_v44 }
 0x747   : > { %v892_v54 = vadd.f32 0.014752088, %v891_v53  ;;  %v881_v55 = vadd.f32 0.0036580483, %v880_v52 }
 0x749   : > { %v893_v57 = vmul.f32 %v892_v54, %v877_v44  ;;  %v882_v59 = vmul.f32 %v881_v55, %v877_v44 }
 0x74b   : > { %v894_v58 = vadd.f32 0.112945676, %v893_v57  ;;  %v883_v63 = vadd.f32 0.05243302, %v882_v59 }
 0x74d   : > { %v895_v61 = vmul.f32 %v894_v58, %v877_v44  ;;  %v884_v3 = vmul.f32 %v883_v63, %v877_v44 }
 0x74f   : > { %v896_v62 = vadd.f32 0.4994258, %v895_v61  ;;  %v885_v4 = vadd.f32 0.18741608, %v884_v3 }
 0x751   : > { %v897_v1 = vmul.f32 %v896_v62, %v877_v44  ;;  %v886_v6 = vmul.f32 %v885_v4, %v877_v44 }
 0x753   : > { %v898_v2 = vadd.f32 1.0, %v897_v1  ;;  %v887_v11 = vadd.f32 1.1283791, %v886_v6 }
 0x755   : > { %1219 = vrcp.f32 %v898_v2  ;;  %v910_v10 = vand.u32 2147483648, %v898_v2  ;;  %v908_v13 = vand.u32 2147483647, %v898_v2  ;;  %vm904_vm13 = vweird.f32 %v898_v2 }
 0x756   : > { %v888_v17 = vmul.f32 %v887_v11, %v875_v42 }
 0x757   : > { %v911_v16 = vor.u32 1.1754944e-38, %v910_v10  ;;  %vm909_vm15 = vcmp.eq.f32.partialorder %v908_v13, 8.507059e+37 }
 0x75b   : > { %v1220_v5 = vpop.eup %1219 }
 0x75c   : > { %v900_v7 = vmul.f32 %v1220_v5, %v898_v2  ;;  %vm905_vm12 = vweird.f32 %v1220_v5 }
 0x75d   : > { %vm906_vm14 = vmor %vm904_vm13, %vm905_vm12 }
 0x75e   : > { %v901_v9 = vsub.f32 1.0, %v900_v7 }
 0x760   : > { %v902_v12 = vmul.f32 %v1220_v5, %v901_v9 }
 0x762   : > { %v903_v14 = vadd.f32 %v1220_v5, %v902_v12 }
 0x764   : > { %v907_v18 = vsel %vm906_vm14, %v1220_v5, %v903_v14 }
 0x765   : > { %v912_v19 = vsel %vm909_vm15, %v911_v16, %v907_v18 }
 0x766   : > { %v913_v20 = vmul.f32 %v912_v19, %v888_v17 }
 0x768   : > { %v1103_v21 = vclamps-f32 %v913_v20, 1.0 }
 0x76a   : > { %v916_v0 = vadd.f32 1.0, %v1103_v21 }
 0x76c   : > { %v917_v23 = vmul.f32 %v916_v0, %v874_v22 }
 0x76e   : > { %v918_v24 = vpack.c.bf16 %v917_v23, %v917_v23 }
 0x770   : > { %1120 = vmatmul.msk.bf16.vlgmr.msra.gmra.mxu3 %vm955_vm1, %v918_v24 }
 0x7f3   : > { %v968_v26 = vpop.f32.mrf.mxu3 }
 0x7f4   : > { %v969_v27 = vadd.f32 %v1196_v25, %v968_v26 }
 0x7f6   : > { %v972_v28 = vadd.f32 %v969_v27, %v1564_v15 }
 0x7f8   : > { %973 = vst.msk [vmem:[%s430_s13] sm:$0xff] %vm435_vm0, %v972_v28 }
 0x7f9   : > { %1278 = shalt.err (!%p1275_p4)
}
 0x7fa   : > { %1137 = dma.vmem_to_hbm [thread:$0]  (%p1443_p11), %s988_s20, 128, %s990_s28, %s975_s25  }
 0x7fb   : > { %v970_v15 = vpop.f32.mrf.mxu3 }
 0x7fc PF: > { %s1672_s17 = sld [smem:[#allocation8_spill]]  ;;  %p1674_p7 = scmp.ge.s32.totalorder %s1317_s24, 2 }
 0x7fe   : > { %p1144_p5 = pnand %p1674_p7, %p1447_p12 }
 0x800   : > { %p1145_p8 = pneg %p1144_p5 }
 0x802   : > { %s1001_s26 = sand.u32 1, %s1672_s17  }
 0x803   : > { %s1002_s19 = scalar_lea.sflag [#allocation4], %s1001_s26 }
 0x804   : > { %1300 = dma.done.wait (%p1145_p8), %s1002_s19, 128  }
 0x805   : > { %1302 = vsyncadd (%p1145_p8), %s1002_s19, 4294967168  ;;  %s1675_s24 = sld [smem:[#allocation10_spill]]  ;;  %s1678_s21 = smov %s1309_s22 }
 0x806   : > { %s1676_s13 = sld [smem:[#allocation9_spill]] }
 0x807   : > { %s1677_s23 = sld [smem:[#allocation11_spill]] }
 0x80b   : > { %p25_p10 = scmp.ge.s32.totalorder %s1675_s24, 4  }
 0x80c   : > { %s1679_s22 = smov %s1676_s13 }
 0x80d   :  { %27 = sbr.rel (!%p25_p10) target bundleno = 5 (0x5), region = 113 }
 0x812   :  { %1008 = vsyncpa [#allocation3], 1 }
 0x813   :  { %1010 = vsyncpa [#allocation3 + $0x1], 1 }
 0x814   :  { %1011 = vsyncpa [#allocation4], 1 }
 0x815   :  { %1013 = vsyncpa [#allocation4 + $0x1], 1 }

// kernel: transformer_forward.2
= control target key start
LH: loop header
LB: loop body
LE: loop exit
PB: predicated region body
PF: predicated region fallthrough
CT: control target
= control target key end

     0   :  { %s1674_s0 = inlined_call_operand.vmem [shape: f32[2,8,32], index: 0, kind: input, shape index: {}, may-alias: {0,12}]   ;;  %s1675_s1 = inlined_call_operand.vmem [shape: f32[1,32], index: 1, kind: input, shape index: {}]   ;;  %s1676_s2 = inlined_call_operand.vmem [shape: f32[1,32], index: 2, kind: input, shape index: {}]   ;;  %s1677_s3 = inlined_call_operand.vmem [shape: bf16[32,96], index: 3, kind: input, shape index: {}]   ;;  %s1678_s4 = inlined_call_operand.vmem [shape: bf16[32,32], index: 4, kind: input, shape index: {}]   ;;  %s1679_s5 = inlined_call_operand.hbm [shape: f32[1,32], index: 5, kind: input, shape index: {}]   ;;  %s1680_s6 = inlined_call_operand.vmem [shape: f32[1,32], index: 6, kind: input, shape index: {}]   ;;  %s1681_s7 = inlined_call_operand.vmem [shape: f32[1,32], index: 7, kind: input, shape index: {}]   ;;  %s1682_s8 = inlined_call_operand.hbm [shape: bf16[32,64], index: 8, kind: input, shape index: {}]   ;;  %s1683_s9 = inlined_call_operand.hbm [shape: f32[1,64], index: 9, kind: input, shape index: {}]   ;;  %s1684_s10 = inlined_call_operand.vmem [shape: bf16[64,32], index: 10, kind: input, shape index: {}]   ;;  %s1685_s11 = inlined_call_operand.hbm [shape: f32[1,32], index: 11, kind: input, shape index: {}]   ;;  %s1686_s12 = inlined_call_operand.vmem [shape: f32[2,8,32], index: 12, kind: output, shape index: {}, may-alias: {0,12}]  }
   0x1   :  { %1687 = sst [smem:[#allocation12_spill]] %s1679_s5 }
   0x2   :  { %17 = vsyncpa [#allocation3], 0 }
   0x3   :  { %18 = vsyncpa [#allocation5], 0 }
   0x4   :  { %19 = vsyncpa [#allocation8], 0  ;;  %s1498_s21 = smov 0  }
   0x5 LB: > { %s354_s24 = sshll.u32 %s1682_s8, 4  ;;  %s1507_s25 = sadd.s32 4294967295, %s1416_s21   ;;  %s1416_s21 = sphi %s1498_s21, %s25_s21   ;;  %s355_s24 = int_to_ptr.hbm [resolvable:$true] %s354_s24 }
   0x6   : > { %p1109_p0 = scmp.ge.s32.totalorder %s1416_s21, 1  ;;  %p313_p1 = scmp.lt.s32.totalorder %s1416_s21, 3 }
   0x7   : > { %p1216_p2 = scmp.eq.s32.totalorder %s1507_s25, 0  ;;  %s1418_s27 = smov [#allocation4]  }
   0x8   : > { %p1512_p3 = pnand %p1109_p0, %p313_p1  ;;  %s356_s28 = sshll.u32 %s1418_s27, 4  ;;  %s357_s28 = int_to_ptr.vmem [resolvable:$true] %s356_s28 }
   0x9   : > { %s1689_s5 = sld [smem:[#allocation12_spill]]  ;;  %s1419_s15 = smov [#allocation2]  }
   0xa   : > { %p1203_p4 = pneg %p1512_p3  ;;  %s339_s16 = sshll.u32 %s1419_s15, 4  ;;  %s340_s16 = int_to_ptr.vmem [resolvable:$true] %s339_s16 }
   0xb   : > { %s369_s19 = sshll.u32 %s1683_s9, 4  ;;  %s1420_s20 = smov 64   ;;  %s370_s19 = int_to_ptr.hbm [resolvable:$true] %s369_s19 }
   0xc   : > { %p1523_p5 = pnand %p1216_p2, %p1203_p4  ;;  %s1421_s22 = smov 4  }
   0xd   : > { %s1422_s23 = smov [#allocation6]   ;;  %s1423_s15 = smov [#allocation7]  }
   0xe   : > { %1209 = dma.hbm_to_vmem [thread:$0]  (!%p1523_p5), %s355_s24, 256, %s357_s28, [#allocation5], %s1420_s20, %s1420_s20, %s1421_s22  }
   0xf   : > { %s337_s13 = sshll.u32 %s1689_s5, 4  ;;  %s371_s27 = sshll.u32 %s1422_s23, 4  ;;  %s338_s13 = int_to_ptr.hbm [resolvable:$true] %s337_s13  ;;  %s372_s27 = int_to_ptr.vmem [resolvable:$true] %s371_s27 }
  0x10   : > { %1206 = dma.hbm_to_vmem [thread:$0]  (!%p1523_p5), %s338_s13, 16, %s340_s16, [#allocation3]  }
  0x11   : > { %s384_s5 = sshll.u32 %s1685_s11, 4  ;;  %s386_s17 = sshll.u32 %s1423_s15, 4  ;;  %s385_s5 = int_to_ptr.hbm [resolvable:$true] %s384_s5  ;;  %s387_s17 = int_to_ptr.vmem [resolvable:$true] %s386_s17 }
  0x12   : > { %1212 = dma.hbm_to_vmem [thread:$0]  (!%p1523_p5), %s370_s19, 16, %s372_s27, [#allocation5]  }
  0x13   : > { %1215 = dma.hbm_to_vmem [thread:$0]  (!%p1523_p5), %s385_s5, 16, %s387_s17, [#allocation8]  }
  0x14   : > { %406 = sbr.rel (%p1512_p3) target bundleno = 2034 (0x7f2), region = 68 }
  0x19   : > { %1403 = dma.done.wait (%p1216_p2), [#allocation3], 16  }
  0x1a   : > { %1405 = vsyncadd (%p1216_p2), [#allocation3], 4294967280 }
  0x1b   : > { %1407 = dma.done.wait (%p1216_p2), [#allocation5], 272  }
  0x1c   : > { %1409 = vsyncadd (%p1216_p2), [#allocation5], 4294967024 }
  0x1d   : > { %1411 = dma.done.wait (%p1216_p2), [#allocation8], 16  }
  0x1e   : > { %1413 = vsyncadd (%p1216_p2), [#allocation8], 4294967280  ;;  %p462_p6 = scmp.lt.s32.totalorder %s1507_s25, 1  ;;  %vm474_vm0 = vcmask 261120   ;;  %v1424_v2 = vmov 32.0   ;;  %v1178_v14 = vld [vmem:[%s1677_s3 + $0x8] sm:$0xff] }
  0x1f   : > { %1254 = vrcp.f32 %v1424_v2  ;;  %538 = vmatpush.bf16.msra.mxu0 %v1178_v14  ;;  %v1177_v15 = vld [vmem:[%s1677_s3] sm:$0xff]  ;;  %s1425_s27 = smov 104   ;;  %s1426_s29 = smov 120   ;;  %vm557_vm5 = vcmask 64512   ;;  %vm699_vm6 = vcmask 1043456   ;;  %vm801_vm7 = vcmask 130048  }
  0x20   : > { %s1692_s25 = smov (!%p462_p6, %s1507_s25), 1  ;;  %v1247_v25 = vld [vmem:[%s1675_s1] ss:$0 sm:$0xff]  ;;  %s1427_s30 = smov 112   ;;  %vm804_vm8 = vcmask 195584  }
  0x21   : > { %s1120_s5 = sshll.u32 %s1692_s25, 3  ;;  %v1248_v28 = vld [vmem:[%s1676_s2] ss:$0 sm:$0xff]  ;;  %s1428_s15 = smov 96  }
  0x22   : > { %s465_s28 = scalar_lea.vmem %s1674_s0, %s1120_s5  ;;  %s1429_s17 = smov 64  }
  0x23   : > { %v1565_v0 = vld [vmem:[%s465_s28] sm:$0xff]  ;;  %539 = vmatpush.bf16.msra.mxu0 %v1177_v15  ;;  %s1430_s24 = smov 8   ;;  %s1431_s26 = smov 24  }
  0x24   : > { %v475_v1 = vsel %vm474_vm0, %v1565_v0, 0.0  ;;  %s1432_s28 = smov 16   ;;  %s469_s16 = scalar_lea.vmem %s1686_s12, %s1120_s5 }
  0x25   : > { %476 = vadd.xlane.f32.xlu0 %v475_v1  ;;  %v1255_v3 = vpop.eup %1254 }
  0x26   : > { %v479_v4 = vmul.f32 32.0, %v1255_v3  ;;  %vm483_vm1 = vweird.f32 %v1255_v3 }
  0x28   : > { %v480_v5 = vsub.f32 1.0, %v479_v4 }
  0x2a   : > { %v481_v6 = vmul.f32 %v1255_v3, %v480_v5 }
  0x2c   : > { %v482_v7 = vadd.f32 %v1255_v3, %v481_v6 }
  0x2e   : > { %v1569_v8 = vsel %vm483_vm1, %v1255_v3, %v482_v7  ;;  %vm994_vm1 = vcmask 523264  }
  0x98   : > { %v477_v9 = vpop.xlane.xlu0 %476 }
  0x99   : > { %v485_v10 = vmul.f32 %v1569_v8, %v477_v9 }
  0x9b   : > { %v486_v11 = vsub.f32 %v1565_v0, %v485_v10 }
  0x9d   : > { %v487_v12 = vmul.f32 %v486_v11, %v486_v11 }
  0x9f   : > { %v488_v13 = vsel %vm474_vm0, %v487_v12, 0.0 }
  0xa0   : > { %489 = vadd.xlane.f32.xlu0 %v488_v13 }
 0x113   : > { %v490_v16 = vpop.xlane.xlu0 %489 }
 0x114   : > { %v491_v17 = vmul.f32 %v490_v16, %v1569_v8 }
 0x116   : > { %v492_v18 = vadd.f32 1e-05, %v491_v17 }
 0x118   : > { %1256 = vrsqrt.f32 %v492_v18  ;;  %vm499_vm3 = vweird.f32 %v492_v18 }
 0x11e   : > { %v1257_v19 = vpop.eup %1256 }
 0x11f   : > { %v494_v20 = vmul.f32 %v1257_v19, %v492_v18  ;;  %vm500_vm2 = vweird.f32 %v1257_v19 }
 0x120   : > { %vm501_vm4 = vmor %vm499_vm3, %vm500_vm2 }
 0x121   : > { %v495_v21 = vmul.f32 %v1257_v19, %v494_v20 }
 0x123   : > { %v496_v22 = vmul.f32 0.5, %v495_v21 }
 0x125   : > { %v497_v23 = vsub.f32 1.5, %v496_v22 }
 0x127   : > { %v498_v24 = vmul.f32 %v1257_v19, %v497_v23 }
 0x129   : > { %v502_v26 = vsel %vm501_vm4, %v1257_v19, %v498_v24 }
 0x12a   : > { %v503_v27 = vmul.f32 %v502_v26, %v486_v11 }
 0x12c   : > { %v507_v29 = vmul.f32 %v1247_v25, %v503_v27 }
 0x12e   : > { %v511_v30 = vadd.f32 %v1248_v28, %v507_v29 }
 0x130   : > { %v512_v31 = vpack.c.bf16 %v511_v30, %v511_v30 }
 0x132   : > { %1130 = vmatmul.msk.bf16.vlgmr.msra.gmra.mxu0 %vm474_vm0, %v512_v31 }
 0x1af   : > { %v541_v32 = vpop.f32.mrf.mxu0 }
 0x1b0   : > { %v545_v33 = vpack.c.bf16 %v541_v32, %v541_v32 }
 0x1b2   : > { %551 = vrot.lane.b32.xlu2 %v545_v33, %s1425_s27  ;;  %547 = vrot.lane.b32.xlu1 %v545_v33, %s1426_s29  ;;  %v553_v41 = vunpack.c.l.b16 %v545_v33 }
 0x1b4   : > { %v1593_v45 = vpack.c.b16 %v553_v41, %v553_v41 }
 0x1b7   : > { %v543_v34 = vpop.f32.mrf.mxu0 }
 0x1ba   : > { %549 = vrot.lane.b32.xlu1 %v545_v33, %s1427_s30 }
 0x20c   : > { %v552_v35 = vpop.permute.xlu2 %551 }
 0x20d   : > { %v623_v36 = vunpack.c.l.b16 %v552_v35 }
 0x20f   : > { %v1588_v37 = vpack.c.b16 %v623_v36, %v623_v36 }
 0x211   : > { %625 = vrot.lane.b32.xlu1 %v1588_v37, %s1428_s15 }
 0x224   : > { %v548_v38 = vpop.permute.xlu1 %547 }
 0x225   : > { %v577_v39 = vunpack.c.l.b16 %v548_v38 }
 0x227   : > { %v578_v40 = vpack.c.b16 %v577_v39, %v577_v39 }
 0x229   : > { %579 = vrot.lane.b32.xlu2 %v578_v40, %s1428_s15 }
 0x22c   : > { %v550_v42 = vpop.permute.xlu1 %549 }
 0x22d   : > { %v600_v43 = vunpack.c.l.b16 %v550_v42 }
 0x22f   : > { %v1591_v44 = vpack.c.b16 %v600_v43, %v600_v43 }
 0x231   : > { %602 = vrot.lane.b32.xlu0 %v1591_v44, %s1428_s15  ;;  %555 = vrot.lane.b32.xlu2 %v1593_v45, %s1428_s15 }
 0x283   : > { %v580_v46 = vpop.permute.xlu2 %579  ;;  %v626_v47 = vpop.permute.xlu1 %625 }
 0x284   : > { %v585_v48 = vsel %vm557_vm5, %v580_v46, 0  ;;  %v631_v49 = vsel %vm557_vm5, %v626_v47, 0 }
 0x285   : > { %594 = vmatpush.bf16.xpose.msra.mxu2 %v585_v48  ;;  %640 = vmatpush.bf16.xpose.msrb.mxu0 %v631_v49 }
 0x28b   : > { %v556_v50 = vpop.permute.xlu2 %555 }
 0x28c   : > { %1132 = vmatmul.msk.bf16.vlgmr.msra.gmra.mxu2 %vm557_vm5, %v548_v38  ;;  %1134 = vmatmul.msk.bf16.vlgmr.msrb.gmra.mxu0 %vm557_vm5, %v552_v35  ;;  %v562_v51 = vsel %vm557_vm5, %v556_v50, 0 }
 0x28d   : > { %571 = vmatpush.bf16.xpose.msra.mxu1 %v562_v51 }
 0x294   : > { %1131 = vmatmul.msk.bf16.vlgmr.msra.gmra.mxu1 %vm557_vm5, %v545_v33 }
 0x2a3   : > { %v603_v52 = vpop.permute.xlu0 %602 }
 0x2a4   : > { %v608_v53 = vsel %vm557_vm5, %v603_v52, 0 }
 0x2a5   : > { %617 = vmatpush.bf16.xpose.msra.mxu3 %v608_v53 }
 0x2ac   : > { %1133 = vmatmul.msk.bf16.vlgmr.msra.gmra.mxu3 %vm557_vm5, %v550_v42 }
 0x309   : > { %v642_v54 = vpop.f32.mrf.mxu0 }
 0x30a   : > { %v655_v55 = vsel %vm557_vm5, %v642_v54, -inf }
 0x30b   : > { %656 = vmax.xlane.f32.xlu0 %v655_v55 }
 0x30f   : > { %v596_v56 = vpop.f32.mrf.mxu2 }
 0x310   : > { %v649_v57 = vsel %vm557_vm5, %v596_v56, -inf }
 0x311   : > { %650 = vmax.xlane.f32.xlu1 %v649_v57  ;;  %v573_v58 = vpop.f32.mrf.mxu1  ;;  %v644_v59 = vpop.f32.mrf.mxu0 }
 0x312   : > { %v646_v2 = vsel %vm557_vm5, %v573_v58, -inf }
 0x317   : > { %v598_v60 = vpop.f32.mrf.mxu2 }
 0x319   : > { %v575_v61 = vpop.f32.mrf.mxu1 }
 0x31f   : > { %716 = vrot.lane.b32.xlu0 %v578_v40, %s1429_s17 }
 0x32f   : > { %v619_v62 = vpop.f32.mrf.mxu3 }
 0x330   : > { %v652_v63 = vsel %vm557_vm5, %v619_v62, -inf }
 0x331   : > { %653 = vmax.xlane.f32.xlu2 %v652_v63 }
 0x337   : > { %v621_v1 = vpop.f32.mrf.mxu3 }
 0x339   : > { %647 = vmax.xlane.f32.xlu2 %v646_v2  ;;  %v1180_v2 = vld [vmem:[%s1678_s4 + $0x8] sm:$0xff] }
 0x37e   : > { %v657_v3 = vpop.xlane.xlu0 %656 }
 0x37f   : > { %v661_v4 = vsub.f32 %v642_v54, %v657_v3  ;;  %v1179_v3 = vld [vmem:[%s1678_s4] sm:$0xff] }
 0x381   : > { %v668_v5 = vmul.f32 1.442695, %v661_v4 }
 0x383   : > { %1258 = vpow2.f32 %v668_v5 }
 0x384   : > { %v651_v6 = vpop.xlane.xlu1 %650 }
 0x385   : > { %v659_v7 = vsub.f32 %v596_v56, %v651_v6 }
 0x387   : > { %v664_v9 = vmul.f32 1.442695, %v659_v7 }
 0x389   : > { %v1259_v10 = vpop.eup %1258  ;;  %1260 = vpow2.f32 %v664_v9 }
 0x38a   : > { %v679_v11 = vsel %vm557_vm5, %v1259_v10, 0.0 }
 0x38b   : > { %680 = vadd.xlane.f32.xlu1 %v679_v11 }
 0x38f   : > { %v1261_v12 = vpop.eup %1260 }
 0x390   : > { %v673_v14 = vsel %vm557_vm5, %v1261_v12, 0.0 }
 0x391   : > { %v717_v13 = vpop.permute.xlu0 %716 }
 0x392   : > { %v722_v15 = vsel %vm699_vm6, %v717_v13, 0 }
 0x393   : > { %674 = vadd.xlane.f32.xlu1 %v673_v14  ;;  %731 = vmatpush.bf16.msrb.mxu2 %v722_v15 }
 0x3a4   : > { %v654_v16 = vpop.xlane.xlu2 %653 }
 0x3a5   : > { %v660_v17 = vsub.f32 %v619_v62, %v654_v16 }
 0x3a7   : > { %v666_v18 = vmul.f32 1.442695, %v660_v17 }
 0x3a9   : > { %1262 = vpow2.f32 %v666_v18 }
 0x3ac   : > { %v648_v19 = vpop.xlane.xlu2 %647  ;;  %758 = vrot.lane.b32.xlu1 %v1588_v37, %s1429_s17 }
 0x3ad   : > { %v658_v20 = vsub.f32 %v573_v58, %v648_v19 }
 0x3af   : > { %v1263_v21 = vpop.eup %1262  ;;  %v662_v22 = vmul.f32 1.442695, %v658_v20 }
 0x3b0   : > { %v676_v23 = vsel %vm557_vm5, %v1263_v21, 0.0 }
 0x3b1   : > { %1264 = vpow2.f32 %v662_v22  ;;  %677 = vadd.xlane.f32.xlu2 %v676_v23  ;;  %v1182_v23 = vld [vmem:[#allocation4 + $0x8] sm:$0xff] }
 0x3b2   : > { %906 = vmatpush.bf16.msra.mxu2 %v1182_v23 }
 0x3b7   : > { %v1265_v24 = vpop.eup %1264 }
 0x3b8   : > { %v670_v25 = vsel %vm557_vm5, %v1265_v24, 0.0 }
 0x3b9   : > { %671 = vadd.xlane.f32.xlu0 %v670_v25 }
 0x3c9   : > { %737 = vrot.lane.b32.xlu2 %v1591_v44, %s1429_s17 }
 0x3d1   : > { %694 = vrot.lane.b32.xlu2 %v1593_v45, %s1429_s17 }
 0x3fe   : > { %v681_v26 = vpop.xlane.xlu1 %680 }
 0x406   : > { %v675_v27 = vpop.xlane.xlu1 %674 }
 0x407   : > { %1266 = vrcp.f32 %v675_v27 }
 0x408   : > { %1268 = vrcp.f32 %v681_v26 }
 0x40d   : > { %v1267_v28 = vpop.eup %1266 }
 0x40e   : > { %v687_v29 = vmul.f32 %v1267_v28, %v1261_v12  ;;  %v1269_v31 = vpop.eup %1268  ;;  %v1249_v12 = vld [vmem:[#allocation2] ss:$0 sm:$0xff] }
 0x40f   : > { %v689_v32 = vmul.f32 %v1269_v31, %v1259_v10 }
 0x410   : > { %v691_v30 = vpack.c.bf16 %v687_v29, %v687_v29 }
 0x411   : > { %v693_v35 = vpack.c.bf16 %v689_v32, %v689_v32 }
 0x412   : > { %1136 = vmatmul.msk.bf16.vlgmr.msrb.gmra.mxu2 %vm557_vm5, %v691_v30 }
 0x41e   : > { %v759_v33 = vpop.permute.xlu1 %758 }
 0x41f   : > { %v764_v34 = vsel %vm699_vm6, %v759_v33, 0  ;;  %v1250_v33 = vld [vmem:[%s1680_s6] ss:$0 sm:$0xff] }
 0x420   : > { %773 = vmatpush.bf16.msra.mxu0 %v764_v34 }
 0x423   : > { %1138 = vmatmul.msk.bf16.vlgmr.msra.gmra.mxu0 %vm557_vm5, %v693_v35 }
 0x424   : > { %v678_v36 = vpop.xlane.xlu2 %677 }
 0x425   : > { %1270 = vrcp.f32 %v678_v36 }
 0x42b   : > { %v1271_v37 = vpop.eup %1270 }
 0x42c   : > { %v688_v38 = vmul.f32 %v1271_v37, %v1263_v21  ;;  %v738_v39 = vpop.permute.xlu2 %737  ;;  %v672_v40 = vpop.xlane.xlu0 %671 }
 0x42d   : > { %1272 = vrcp.f32 %v672_v40  ;;  %v743_v41 = vsel %vm699_vm6, %v738_v39, 0  ;;  %v1252_v39 = vld [vmem:[#allocation6] ss:$0 sm:$0xff] }
 0x42e   : > { %752 = vmatpush.bf16.msrb.mxu3 %v743_v41  ;;  %v692_v42 = vpack.c.bf16 %v688_v38, %v688_v38 }
 0x431   : > { %1137 = vmatmul.msk.bf16.vlgmr.msrb.gmra.mxu3 %vm557_vm5, %v692_v42 }
 0x433   : > { %v1273_v43 = vpop.eup %1272 }
 0x434   : > { %v686_v44 = vmul.f32 %v1273_v43, %v1265_v24  ;;  %v695_v45 = vpop.permute.xlu2 %694  ;;  %v1181_v24 = vld [vmem:[#allocation4] sm:$0xff] }
 0x435   : > { %v701_v46 = vsel %vm699_vm6, %v695_v45, 0  ;;  %907 = vmatpush.bf16.msra.mxu2 %v1181_v24 }
 0x436   : > { %v690_v47 = vpack.c.bf16 %v686_v44, %v686_v44  ;;  %710 = vmatpush.bf16.msrb.mxu1 %v701_v46  ;;  %v1186_v46 = vld [vmem:[%s1684_s10 + $0x18] sm:$0xff] }
 0x437   : > { %1002 = vmatpush.bf16.msra.mxu3 %v1186_v46 }
 0x439   : > { %1135 = vmatmul.msk.bf16.vlgmr.msrb.gmra.mxu1 %vm557_vm5, %v690_v47 }
 0x43a   : > { %831 = vmatpush.bf16.msra.mxu1 %v1180_v2 }
 0x43e   : > { %832 = vmatpush.bf16.msra.mxu1 %v1179_v3 }
 0x495   : > { %v733_v48 = vpop.f32.mrf.mxu2 }
 0x496   : > { %v780_v49 = vpack.c.bf16 %v733_v48, %v733_v48 }
 0x498   : > { %v784_v50 = vunpack.c.l.b16 %v780_v49 }
 0x49a   : > { %v785_v51 = vpack.c.b16 %v784_v50, %v784_v50 }
 0x49c   : > { %786 = vrot.lane.b32.xlu1 %v785_v51, %s1430_s24  ;;  %v1185_v51 = vld [vmem:[%s1684_s10 + $0x10] sm:$0xff] }
 0x49d   : > { %v735_v52 = vpop.f32.mrf.mxu2  ;;  %1003 = vmatpush.bf16.msra.mxu3 %v1185_v51 }
 0x4a0   : > { %v775_v53 = vpop.f32.mrf.mxu0 }
 0x4a1   : > { %v782_v54 = vpack.c.bf16 %v775_v53, %v775_v53 }
 0x4a3   : > { %v794_v55 = vunpack.c.l.b16 %v782_v54 }
 0x4a5   : > { %v795_v56 = vpack.c.b16 %v794_v55, %v794_v55 }
 0x4a7   : > { %796 = vrot.lane.b32.xlu1 %v795_v56, %s1431_s26  ;;  %v1184_v56 = vld [vmem:[%s1684_s10 + $0x8] sm:$0xff] }
 0x4a8   : > { %v777_v57 = vpop.f32.mrf.mxu0  ;;  %1004 = vmatpush.bf16.msra.mxu3 %v1184_v56 }
 0x4b4   : > { %v754_v58 = vpop.f32.mrf.mxu3 }
 0x4b5   : > { %v781_v59 = vpack.c.bf16 %v754_v58, %v754_v58 }
 0x4b6   : > { %v712_v60 = vpop.f32.mrf.mxu1 }
 0x4b7   : > { %v789_v61 = vunpack.c.l.b16 %v781_v59  ;;  %v779_v5 = vpack.c.bf16 %v712_v60, %v712_v60  ;;  %v1183_v60 = vld [vmem:[%s1684_s10] sm:$0xff] }
 0x4b8   : > { %1005 = vmatpush.bf16.msra.mxu3 %v1183_v60 }
 0x4b9   : > { %v790_v62 = vpack.c.b16 %v789_v61, %v789_v61 }
 0x4bb   : > { %791 = vrot.lane.b32.xlu2 %v790_v62, %s1432_s28 }
 0x4bc   : > { %v756_v63 = vpop.f32.mrf.mxu3 }
 0x4be   : > { %v714_v1 = vpop.f32.mrf.mxu1 }
 0x50e   : > { %v787_v4 = vpop.permute.xlu1 %786 }
 0x50f   : > { %v800_v7 = vsel %vm557_vm5, %v779_v5, %v787_v4 }
 0x515   : > { %v792_v6 = vpop.permute.xlu2 %791 }
 0x516   : > { %v803_v9 = vsel %vm801_vm7, %v800_v7, %v792_v6 }
 0x519   : > { %v797_v10 = vpop.permute.xlu1 %796 }
 0x51a   : > { %v806_v11 = vsel %vm804_vm8, %v803_v9, %v797_v10 }
 0x51b   : > { %1147 = vmatmul.msk.bf16.vlgmr.msra.gmra.mxu1 %vm474_vm0, %v806_v11 }
 0x598   : > { %v834_v13 = vpop.f32.mrf.mxu1 }
 0x599   : > { %v838_v14 = vadd.f32 %v834_v13, %v1565_v0 }
 0x59b   : > { %v1637_v15 = vadd.f32 %v1249_v12, %v838_v14 }
 0x59d   : > { %v846_v16 = vsel %vm474_vm0, %v1637_v15, 0.0 }
 0x59e   : > { %847 = vadd.xlane.f32.xlu2 %v846_v16 }
 0x5a0   : > { %v836_v17 = vpop.f32.mrf.mxu1 }
 0x611   : > { %v848_v18 = vpop.xlane.xlu2 %847 }
 0x612   : > { %v849_v19 = vmul.f32 %v848_v18, %v1569_v8 }
 0x614   : > { %v850_v20 = vsub.f32 %v1637_v15, %v849_v19 }
 0x616   : > { %v851_v21 = vmul.f32 %v850_v20, %v850_v20 }
 0x618   : > { %v852_v22 = vsel %vm474_vm0, %v851_v21, 0.0 }
 0x619   : > { %853 = vadd.xlane.f32.xlu1 %v852_v22 }
 0x68c   : > { %v854_v0 = vpop.xlane.xlu1 %853 }
 0x68d   : > { %v855_v25 = vmul.f32 %v854_v0, %v1569_v8  ;;  %v1251_v8 = vld [vmem:[%s1681_s7] ss:$0 sm:$0xff] }
 0x68f   : > { %v856_v26 = vadd.f32 1e-05, %v855_v25  ;;  %v1253_v25 = vld [vmem:[#allocation7] ss:$0 sm:$0xff] }
 0x691   : > { %1274 = vrsqrt.f32 %v856_v26  ;;  %vm863_vm10 = vweird.f32 %v856_v26 }
 0x697   : > { %v1275_v27 = vpop.eup %1274 }
 0x698   : > { %v858_v28 = vmul.f32 %v1275_v27, %v856_v26  ;;  %vm864_vm9 = vweird.f32 %v1275_v27 }
 0x699   : > { %vm865_vm11 = vmor %vm863_vm10, %vm864_vm9 }
 0x69a   : > { %v859_v29 = vmul.f32 %v1275_v27, %v858_v28 }
 0x69c   : > { %v860_v30 = vmul.f32 0.5, %v859_v29 }
 0x69e   : > { %v861_v31 = vsub.f32 1.5, %v860_v30 }
 0x6a0   : > { %v862_v32 = vmul.f32 %v1275_v27, %v861_v31 }
 0x6a2   : > { %v866_v34 = vsel %vm865_vm11, %v1275_v27, %v862_v32 }
 0x6a3   : > { %v867_v35 = vmul.f32 %v866_v34, %v850_v20 }
 0x6a5   : > { %v871_v36 = vmul.f32 %v1250_v33, %v867_v35 }
 0x6a7   : > { %v875_v37 = vadd.f32 %v1251_v8, %v871_v36 }
 0x6a9   : > { %v876_v38 = vpack.c.bf16 %v875_v37, %v875_v37 }
 0x6ab   : > { %1156 = vmatmul.msk.bf16.vlgmr.msra.gmra.mxu2 %vm474_vm0, %v876_v38 }
 0x72e   : > { %v909_v40 = vpop.f32.mrf.mxu2 }
 0x72f   : > { %v910_v41 = vadd.f32 %v1252_v39, %v909_v40 }
 0x731   : > { %v914_v42 = vmul.f32 0.70710677, %v910_v41  ;;  %v913_v22 = vmul.f32 0.5, %v910_v41 }
 0x733   : > { %v915_v43 = vmul.f32 %v914_v42, %v914_v42 }
 0x735   : > { %v916_v44 = vmin.f32 %v915_v43, 16.0 }
 0x736   : > { %v911_v45 = vpop.f32.mrf.mxu2 }
 0x737   : > { %v917_v47 = vmul.f32 2.1237322e-06, %v916_v44  ;;  %v928_v48 = vmul.f32 3.8918573e-05, %v916_v44 }
 0x739   : > { %v918_v49 = vadd.f32 0.00028619796, %v917_v47  ;;  %v929_v50 = vadd.f32 0.001143296, %v928_v48 }
 0x73b   : > { %v919_v52 = vmul.f32 %v918_v49, %v916_v44  ;;  %v930_v53 = vmul.f32 %v929_v50, %v916_v44 }
 0x73d   : > { %v931_v54 = vadd.f32 0.014752088, %v930_v53  ;;  %v920_v55 = vadd.f32 0.0036580483, %v919_v52 }
 0x73f   : > { %v932_v57 = vmul.f32 %v931_v54, %v916_v44  ;;  %v921_v59 = vmul.f32 %v920_v55, %v916_v44 }
 0x741   : > { %v933_v58 = vadd.f32 0.112945676, %v932_v57  ;;  %v922_v63 = vadd.f32 0.05243302, %v921_v59 }
 0x743   : > { %v934_v61 = vmul.f32 %v933_v58, %v916_v44  ;;  %v923_v3 = vmul.f32 %v922_v63, %v916_v44 }
 0x745   : > { %v935_v62 = vadd.f32 0.4994258, %v934_v61  ;;  %v924_v4 = vadd.f32 0.18741608, %v923_v3 }
 0x747   : > { %v936_v1 = vmul.f32 %v935_v62, %v916_v44  ;;  %v925_v6 = vmul.f32 %v924_v4, %v916_v44 }
 0x749   : > { %v937_v2 = vadd.f32 1.0, %v936_v1  ;;  %v926_v11 = vadd.f32 1.1283791, %v925_v6 }
 0x74b   : > { %1276 = vrcp.f32 %v937_v2  ;;  %v949_v10 = vand.u32 2147483648, %v937_v2  ;;  %v947_v13 = vand.u32 2147483647, %v937_v2  ;;  %vm943_vm13 = vweird.f32 %v937_v2 }
 0x74c   : > { %v927_v17 = vmul.f32 %v926_v11, %v914_v42 }
 0x74d   : > { %v950_v16 = vor.u32 1.1754944e-38, %v949_v10  ;;  %vm948_vm15 = vcmp.eq.f32.partialorder %v947_v13, 8.507059e+37 }
 0x751   : > { %v1277_v5 = vpop.eup %1276 }
 0x752   : > { %v939_v7 = vmul.f32 %v1277_v5, %v937_v2  ;;  %vm944_vm12 = vweird.f32 %v1277_v5 }
 0x753   : > { %vm945_vm14 = vmor %vm943_vm13, %vm944_vm12 }
 0x754   : > { %v940_v9 = vsub.f32 1.0, %v939_v7 }
 0x756   : > { %v941_v12 = vmul.f32 %v1277_v5, %v940_v9 }
 0x758   : > { %v942_v14 = vadd.f32 %v1277_v5, %v941_v12 }
 0x75a   : > { %v946_v18 = vsel %vm945_vm14, %v1277_v5, %v942_v14 }
 0x75b   : > { %v951_v19 = vsel %vm948_vm15, %v950_v16, %v946_v18 }
 0x75c   : > { %v952_v20 = vmul.f32 %v951_v19, %v927_v17 }
 0x75e   : > { %v1157_v21 = vclamps-f32 %v952_v20, 1.0 }
 0x760   : > { %v955_v23 = vadd.f32 1.0, %v1157_v21 }
 0x762   : > { %v956_v24 = vmul.f32 %v955_v23, %v913_v22 }
 0x764   : > { %v957_v0 = vpack.c.bf16 %v956_v24, %v956_v24 }
 0x766   : > { %1174 = vmatmul.msk.bf16.vlgmr.msra.gmra.mxu3 %vm994_vm1, %v957_v0 }
 0x7e9   : > { %v1007_v26 = vpop.f32.mrf.mxu3 }
 0x7ea   : > { %v1008_v27 = vadd.f32 %v1253_v25, %v1007_v26 }
 0x7ec   : > { %v1011_v28 = vadd.f32 %v1008_v27, %v1637_v15 }
 0x7ee   : > { %1012 = vst.msk [vmem:[%s469_s16] sm:$0xff] %vm474_vm0, %v1011_v28 }
 0x7f1   : > { %v1009_v29 = vpop.f32.mrf.mxu3 }
 0x7f2 PF: > { %s25_s21 = sadd.s32 1, %s1416_s21  }
 0x7f3   : > { %p22_p7 = scmp.ge.s32.totalorder %s25_s21, 4  }
 0x7f5   :  { %24 = sbr.rel (!%p22_p7) target bundleno = 5 (0x5), region = 115 }
 0x7fa   :  { %1032 = vsyncpa [#allocation3], 1 }
 0x7fb   :  { %1034 = vsyncpa [#allocation3 + $0x1], 1 }
 0x7fc   :  { %1035 = vsyncpa [#allocation5], 1 }
 0x7fd   :  { %1036 = vsyncpa [#allocation8], 1 }

</bundles_post_ra>
